<compile_context>
chip_gen: v7x
topology: tpu7x:2x2x1
jax: 0.10.0
libtpu: 0.0.40
codegen_flags: <defaults>
</compile_context>

<pallas_src>
import jax
import jax.numpy as jnp
import numpy as np
from jax.experimental import pallas as pl
from jax.experimental.pallas import tpu as pltpu

B = 2          # graphs
N_NODES = 8    # nodes per graph
HIDDEN = 32    # hidden_nf
IN_NODE = 4    # in_node_nf
IN_EDGE = 3    # in_edge_nf
N_LAYERS = 4
F32 = jnp.float32

BN = B * N_NODES              # total nodes
NE = B * N_NODES * N_NODES    # total dense edges (incl. masked self loops)

# packed per-layer weight row layout (last dim is always HIDDEN)
_E1 = 2 * HIDDEN + 1 + IN_EDGE     # edge_mlp[0] input width  (68)
_N1 = 2 * HIDDEN + IN_NODE         # node_mlp[0] input width  (68)
LAYER_ROWS = _E1 + 1 + HIDDEN + 1 + _N1 + 1 + HIDDEN + 1     # 204
DEC_ROWS = 4 * HIDDEN + 4                                     # 132


def _silu(x):
    return x * jax.nn.sigmoid(x)


# ------------------------------ fused kernel --------------------------------

def _egnn_kernel(h0_ref, coord_ref, nmask_ref, eattr_ref, emask_ref,
                 emb_w_ref, emb_b_ref, lw_ref, dec_ref, out_ref):
    n, H = N_NODES, HIDDEN
    h0 = h0_ref[...]        # (BN, IN_NODE)  also node_attr for every layer
    coord = coord_ref[...]  # (BN, 3)
    nmask = nmask_ref[...]  # (BN, 1)
    eattr = eattr_ref[...]  # (NE, IN_EDGE)
    emask = emask_ref[...]  # (NE, 1)

    # embedding (fused, no standalone pallas_call)
    h = jnp.dot(h0, emb_w_ref[...], preferred_element_type=F32) + emb_b_ref[...]

    # coord2radial via Gram matrix (work goes to the MXU), computed once:
    # radial[b,i,j] = |x_i|^2 + |x_j|^2 - 2 <x_i, x_j>
    cb = coord.reshape(B, n, 3)
    gram = jnp.einsum('bid,bjd->bij', cb, cb, preferred_element_type=F32)
    sq = jnp.sum(cb * cb, axis=-1)                           # (B, n)
    radial = sq[:, :, None] + sq[:, None, :] - 2.0 * gram    # (B, n, n)
    radial4 = radial[:, :, :, None]                          # (B, n, n, 1)

    # ---- N_LAYERS x E_GCL_mask, unrolled, h resident in VMEM ----
    for l in range(N_LAYERS):
        lw = lw_ref[l]                                       # (LAYER_ROWS, H)
        o = 0
        w_src = lw[o:o + H]
        w_tgt = lw[o + H:o + 2 * H]
        w_rad = lw[o + 2 * H:o + 2 * H + 1]
        w_ea = lw[o + 2 * H + 1:o + _E1]
        o += _E1
        be1 = lw[o:o + 1]; o += 1
        we2 = lw[o:o + H]; o += H
        be2 = lw[o:o + 1]; o += 1
        wn1 = lw[o:o + _N1]; o += _N1
        bn1 = lw[o:o + 1]; o += 1
        wn2 = lw[o:o + H]; o += H
        bn2 = lw[o:o + 1]

        # edge_model, first linear: concat [h_src, h_tgt, radial, e_attr] is
        # expressed via split weights (no gather); h_src/h_tgt share one matmul.
        w_st = jnp.concatenate([w_src, w_tgt], axis=1)       # (H, 2H)
        hst = jnp.dot(h, w_st, preferred_element_type=F32)   # (BN, 2H)
        hs4 = hst[:, :H].reshape(B, n, 1, H)                 # broadcast over j
        ht4 = hst[:, H:].reshape(B, 1, n, H)                 # broadcast over i
        ea4 = jnp.dot(eattr, w_ea,
                      preferred_element_type=F32).reshape(B, n, n, H)
        m1 = _silu(hs4 + ht4 + radial4 * w_rad + ea4 + be1)  # (B, n, n, H)
        m1 = m1.reshape(NE, H)
        ef = _silu(jnp.dot(m1, we2, preferred_element_type=F32) + be2)
        ef = ef * emask                                      # edge_feat * edge_mask

        # unsorted_segment_sum over row index == sum over the col axis
        agg = jnp.sum(ef.reshape(B, n, n, H), axis=2).reshape(BN, H)

        # node_model: single K = 2H + IN_NODE matmul on [h | agg | h0] slab
        ninp = jnp.concatenate([h, agg, h0], axis=-1)        # (BN, 2H+IN_NODE)
        t = _silu(jnp.dot(ninp, wn1, preferred_element_type=F32) + bn1)
        h = h + jnp.dot(t, wn2, preferred_element_type=F32) + bn2   # recurrent

    # ---- node_dec -> node_mask -> per-graph sum -> graph_dec ----
    dec = dec_ref[...]                                       # (DEC_ROWS, H)
    o = 0
    wd1 = dec[o:o + H]; o += H
    bd1 = dec[o:o + 1]; o += 1
    wd2 = dec[o:o + H]; o += H
    bd2 = dec[o:o + 1]; o += 1
    wg1 = dec[o:o + H]; o += H
    bg1 = dec[o:o + 1]; o += 1
    wg2 = dec[o:o + H]; o += H          # (H, H); energy weight in column 0
    bg2 = dec[o:o + 1]

    t = _silu(jnp.dot(h, wd1, preferred_element_type=F32) + bd1)
    t = (jnp.dot(t, wd2, preferred_element_type=F32) + bd2) * nmask
    g = jnp.sum(t.reshape(B, n, H), axis=1)                  # (B, H) readout
    e = _silu(jnp.dot(g, wg1, preferred_element_type=F32) + bg1)
    out_ref[...] = jnp.dot(e, wg2, preferred_element_type=F32) + bg2   # (B, H)


def egnn_pallas(h0, x, node_mask, eattr_flat, emask_flat, emb_w, emb_b, lw, dec):
    out = pl.pallas_call(
        _egnn_kernel,
        out_shape=jax.ShapeDtypeStruct((B, HIDDEN), F32),
        in_specs=[pl.BlockSpec(memory_space=pltpu.MemorySpace.VMEM)] * 9,
        out_specs=pl.BlockSpec(memory_space=pltpu.MemorySpace.VMEM),
    )(h0, x, node_mask, eattr_flat, emask_flat, emb_w, emb_b, lw, dec)
    return out[:, 0]                                         # energy, shape (B,)


egnn_pallas_jit = jax.jit(egnn_pallas)


# -------------------------- deterministic parameters ------------------------

def init_params(key):
    ks = iter(jax.random.split(key, 128))

    def lin(fi, fo):
        w = jax.random.normal(next(ks), (fi, fo), F32) / np.sqrt(fi)
        b = 0.1 * jax.random.normal(next(ks), (1, fo), F32)
        return w, b

    p = {}
    p['emb_w'], p['emb_b'] = lin(IN_NODE, HIDDEN)
    layers = []
    for _ in range(N_LAYERS):
        we1, be1 = lin(_E1, HIDDEN)          # edge_mlp[0]
        we2, be2 = lin(HIDDEN, HIDDEN)       # edge_mlp[2]
        wn1, bn1 = lin(_N1, HIDDEN)          # node_mlp[0]
        wn2, bn2 = lin(HIDDEN, HIDDEN)       # node_mlp[2]
        layers.append(dict(we1=we1, be1=be1, we2=we2, be2=be2,
                           wn1=wn1, bn1=bn1, wn2=wn2, bn2=bn2))
    p['layers'] = layers
    p['wd1'], p['bd1'] = lin(HIDDEN, HIDDEN)                 # node_dec
    p['wd2'], p['bd2'] = lin(HIDDEN, HIDDEN)
    p['wg1'], p['bg1'] = lin(HIDDEN, HIDDEN)                 # graph_dec
    p['wg2'], p['bg2'] = lin(HIDDEN, 1)
    return p


def pack_params(p):
    """Stack/pack per-layer + decoder weights into a few contiguous arrays."""
    def pack_layer(lp):
        return jnp.concatenate([lp['we1'], lp['be1'], lp['we2'], lp['be2'],
                                lp['wn1'], lp['bn1'], lp['wn2'], lp['bn2']],
                               axis=0)                       # (LAYER_ROWS, H)
    lw = jnp.stack([pack_layer(lp) for lp in p['layers']], axis=0)
    assert lw.shape == (N_LAYERS, LAYER_ROWS, HIDDEN)
    wg2_pad = jnp.zeros((HIDDEN, HIDDEN), F32).at[:, 0:1].set(p['wg2'])
    bg2_pad = jnp.zeros((1, HIDDEN), F32).at[:, 0:1].set(p['bg2'])
    dec = jnp.concatenate([p['wd1'], p['bd1'], p['wd2'], p['bd2'],
                           p['wg1'], p['bg1'], wg2_pad, bg2_pad], axis=0)
    assert dec.shape == (DEC_ROWS, HIDDEN)
    return p['emb_w'], p['emb_b'], lw, dec


# ----------------- pure-JAX reference (edge-list semantics) ------------------

def egnn_ref(h0, x, edges, edge_attr, node_mask, edge_mask, n_nodes, p):
    row, col = edges
    h = h0 @ p['emb_w'] + p['emb_b'][0]
    for lp in p['layers']:
        coord_diff = x[row] - x[col]
        radial = jnp.sum(coord_diff ** 2, axis=1, keepdims=True)
        einp = jnp.concatenate([h[row], h[col], radial, edge_attr], axis=1)
        m = _silu(einp @ lp['we1'] + lp['be1'][0])
        m = _silu(m @ lp['we2'] + lp['be2'][0])
        m = m * edge_mask
        agg = jnp.zeros((h.shape[0], HIDDEN), F32).at[row].add(m)
        ninp = jnp.concatenate([h, agg, h0], axis=1)
        t = _silu(ninp @ lp['wn1'] + lp['bn1'][0])
        h = h + (t @ lp['wn2'] + lp['bn2'][0])
    h = _silu(h @ p['wd1'] + p['bd1'][0]) @ p['wd2'] + p['bd2'][0]
    h = h * node_mask
    h = h.reshape(-1, n_nodes, HIDDEN).sum(axis=1)
    e = _silu(h @ p['wg1'] + p['bg1'][0]) @ p['wg2'] + p['bg2'][0]
    return e[:, 0]


# ----------------------------------- main ------------------------------------

if __name__ == "__main__":
    key = jax.random.PRNGKey(0)
    kh, kx, ke, kp = jax.random.split(key, 4)
    params = init_params(kp)
    emb_w, emb_b, lw, dec = pack_params(params)

    h0 = jax.random.normal(kh, (BN, IN_NODE), F32)
    x = jax.random.normal(kx, (BN, 3), F32)
    node_mask = jnp.ones((BN, 1), F32).at[BN - 1, 0].set(0.0)  # pad last node of graph 1

    # dense edge attributes; edge-list view derived from them for the reference
    eattr_full = jax.random.normal(ke, (B, N_NODES, N_NODES, IN_EDGE), F32)

    rows, cols, bs, iis, jjs = [], [], [], [], []
    for b in range(B):
        for i in range(N_NODES):
            for j in range(N_NODES):
                if i != j:
                    rows.append(b * N_NODES + i)
                    cols.append(b * N_NODES + j)
                    bs.append(b); iis.append(i); jjs.append(j)
    row = jnp.array(rows, dtype=jnp.int32)
    col = jnp.array(cols, dtype=jnp.int32)
    edge_attr = eattr_full[jnp.array(bs), jnp.array(iis), jnp.array(jjs)]
    edge_mask = node_mask[row] * node_mask[col]

    # dense tensors consumed by the fused kernel (flat edge index b*n*n + i*n + j)
    eattr_flat = eattr_full.reshape(NE, IN_EDGE)
    nm = node_mask.reshape(B, N_NODES)
    eye = jnp.eye(N_NODES, dtype=F32)
    emask_flat = (nm[:, :, None] * nm[:, None, :] * (1.0 - eye)[None]
                  ).reshape(NE, 1)

    energy = egnn_pallas_jit(h0, x, node_mask, eattr_flat, emask_flat,
                             emb_w, emb_b, lw, dec)
    energy = jax.block_until_ready(energy)

    energy_ref = egnn_ref(h0, x, (row, col), edge_attr, node_mask, edge_mask,
                          N_NODES, params)
    assert np.allclose(np.asarray(energy), np.asarray(energy_ref),
                       rtol=1e-2, atol=1e-2), (energy, energy_ref)
    print("KERNEL_OK")
</pallas_src>

<mosaic_0001>
module attributes {stable_mosaic.version = 11 : i64} {
  func.func @_egnn_kernel(%arg0: memref<16x4xf32, #tpu.memory_space<vmem>>, %arg1: memref<16x3xf32, #tpu.memory_space<vmem>>, %arg2: memref<16x1xf32, #tpu.memory_space<vmem>>, %arg3: memref<128x3xf32, #tpu.memory_space<vmem>>, %arg4: memref<128x1xf32, #tpu.memory_space<vmem>>, %arg5: memref<4x32xf32, #tpu.memory_space<vmem>>, %arg6: memref<1x32xf32, #tpu.memory_space<vmem>>, %arg7: memref<4x204x32xf32, #tpu.memory_space<vmem>>, %arg8: memref<132x32xf32, #tpu.memory_space<vmem>>, %arg9: memref<2x32xf32, #tpu.memory_space<vmem>>) attributes {dimension_semantics = [], scalar_prefetch = 0 : i64, scratch_operands = 0 : i64, tpu.core_type = #tpu.core_type<tc>} {
    %c0 = arith.constant 0 : index
    %c0_0 = arith.constant 0 : index
    %0 = vector.load %arg0[%c0, %c0_0] : memref<16x4xf32, #tpu.memory_space<vmem>>, vector<16x4xf32>
    %c0_1 = arith.constant 0 : index
    %c0_2 = arith.constant 0 : index
    %1 = vector.load %arg1[%c0_1, %c0_2] : memref<16x3xf32, #tpu.memory_space<vmem>>, vector<16x3xf32>
    %c0_3 = arith.constant 0 : index
    %c0_4 = arith.constant 0 : index
    %2 = vector.load %arg2[%c0_3, %c0_4] : memref<16x1xf32, #tpu.memory_space<vmem>>, vector<16x1xf32>
    %c0_5 = arith.constant 0 : index
    %c0_6 = arith.constant 0 : index
    %3 = vector.load %arg3[%c0_5, %c0_6] : memref<128x3xf32, #tpu.memory_space<vmem>>, vector<128x3xf32>
    %c0_7 = arith.constant 0 : index
    %c0_8 = arith.constant 0 : index
    %4 = vector.load %arg4[%c0_7, %c0_8] : memref<128x1xf32, #tpu.memory_space<vmem>>, vector<128x1xf32>
    %c0_9 = arith.constant 0 : index
    %c0_10 = arith.constant 0 : index
    %5 = vector.load %arg5[%c0_9, %c0_10] : memref<4x32xf32, #tpu.memory_space<vmem>>, vector<4x32xf32>
    %cst = arith.constant dense<0.000000e+00> : vector<16x32xf32>
    %6 = tpu.matmul %0, %5, %cst {dimension_numbers = #tpu.dot_dimension_numbers<[1], [0], [0], [1], [0, 0, 1, 1], [], []>} : vector<16x4xf32>, vector<4x32xf32>, vector<16x32xf32> -> vector<16x32xf32>
    %c0_11 = arith.constant 0 : index
    %c0_12 = arith.constant 0 : index
    %7 = vector.load %arg6[%c0_11, %c0_12] : memref<1x32xf32, #tpu.memory_space<vmem>>, vector<1x32xf32>
    %8 = vector.broadcast %7 : vector<1x32xf32> to vector<16x32xf32>
    %9 = arith.addf %6, %8 : vector<16x32xf32>
    %10 = vector.shape_cast %1 : vector<16x3xf32> to vector<2x8x3xf32>
    "tpu.trace_start"() <{level = 10 : i32, message = "bid,bjd->bij"}> : () -> ()
    %cst_13 = arith.constant dense<0.000000e+00> : vector<2x8x8xf32>
    %11 = tpu.matmul %10, %10, %cst_13 {dimension_numbers = #tpu.dot_dimension_numbers<[2], [2], [1], [1], [0, 0, 0, 1, 1, 1], [0], [0]>} : vector<2x8x3xf32>, vector<2x8x3xf32>, vector<2x8x8xf32> -> vector<2x8x8xf32>
    "tpu.trace_stop"() : () -> ()
    %12 = arith.mulf %10, %10 : vector<2x8x3xf32>
    %cst_14 = arith.constant dense<0.000000e+00> : vector<2x8xf32>
    %13 = vector.multi_reduction <add>, %12, %cst_14 [2] : vector<2x8x3xf32> to vector<2x8xf32>
    %14 = vector.shape_cast %13 : vector<2x8xf32> to vector<2x8x1xf32>
    %15 = vector.shape_cast %13 : vector<2x8xf32> to vector<2x1x8xf32>
    %16 = vector.broadcast %14 : vector<2x8x1xf32> to vector<2x8x8xf32>
    %17 = vector.broadcast %15 : vector<2x1x8xf32> to vector<2x8x8xf32>
    %18 = arith.addf %16, %17 : vector<2x8x8xf32>
    %cst_15 = arith.constant 2.000000e+00 : f32
    %19 = vector.broadcast %cst_15 : f32 to vector<2x8x8xf32>
    %20 = arith.mulf %19, %11 : vector<2x8x8xf32>
    %21 = arith.subf %18, %20 : vector<2x8x8xf32>
    %22 = vector.shape_cast %21 : vector<2x8x8xf32> to vector<2x8x8x1xf32>
    %c0_16 = arith.constant 0 : index
    %c0_17 = arith.constant 0 : index
    %c0_18 = arith.constant 0 : index
    %23 = vector.load %arg7[%c0_16, %c0_17, %c0_18] : memref<4x204x32xf32, #tpu.memory_space<vmem>>, vector<1x204x32xf32>
    %24 = vector.shape_cast %23 : vector<1x204x32xf32> to vector<204x32xf32>
    %25 = vector.extract_strided_slice %24 {offsets = [0, 0], sizes = [32, 32], strides = [1, 1]} : vector<204x32xf32> to vector<32x32xf32>
    %26 = vector.extract_strided_slice %24 {offsets = [32, 0], sizes = [32, 32], strides = [1, 1]} : vector<204x32xf32> to vector<32x32xf32>
    %27 = vector.extract_strided_slice %24 {offsets = [64, 0], sizes = [1, 32], strides = [1, 1]} : vector<204x32xf32> to vector<1x32xf32>
    %28 = vector.extract_strided_slice %24 {offsets = [65, 0], sizes = [3, 32], strides = [1, 1]} : vector<204x32xf32> to vector<3x32xf32>
    %29 = vector.extract_strided_slice %24 {offsets = [68, 0], sizes = [1, 32], strides = [1, 1]} : vector<204x32xf32> to vector<1x32xf32>
    %30 = vector.extract_strided_slice %24 {offsets = [69, 0], sizes = [32, 32], strides = [1, 1]} : vector<204x32xf32> to vector<32x32xf32>
    %31 = vector.extract_strided_slice %24 {offsets = [101, 0], sizes = [1, 32], strides = [1, 1]} : vector<204x32xf32> to vector<1x32xf32>
    %32 = vector.extract_strided_slice %24 {offsets = [102, 0], sizes = [68, 32], strides = [1, 1]} : vector<204x32xf32> to vector<68x32xf32>
    %33 = vector.extract_strided_slice %24 {offsets = [170, 0], sizes = [1, 32], strides = [1, 1]} : vector<204x32xf32> to vector<1x32xf32>
    %34 = vector.extract_strided_slice %24 {offsets = [171, 0], sizes = [32, 32], strides = [1, 1]} : vector<204x32xf32> to vector<32x32xf32>
    %35 = vector.extract_strided_slice %24 {offsets = [203, 0], sizes = [1, 32], strides = [1, 1]} : vector<204x32xf32> to vector<1x32xf32>
    %36 = tpu.concatenate %25, %26 in 1 : vector<32x32xf32>, vector<32x32xf32> -> vector<32x64xf32>
    %cst_19 = arith.constant dense<0.000000e+00> : vector<16x64xf32>
    %37 = tpu.matmul %9, %36, %cst_19 {dimension_numbers = #tpu.dot_dimension_numbers<[1], [0], [0], [1], [0, 0, 1, 1], [], []>} : vector<16x32xf32>, vector<32x64xf32>, vector<16x64xf32> -> vector<16x64xf32>
    %38 = vector.extract_strided_slice %37 {offsets = [0, 0], sizes = [16, 32], strides = [1, 1]} : vector<16x64xf32> to vector<16x32xf32>
    %39 = vector.shape_cast %38 : vector<16x32xf32> to vector<2x8x1x32xf32>
    %40 = vector.extract_strided_slice %37 {offsets = [0, 32], sizes = [16, 32], strides = [1, 1]} : vector<16x64xf32> to vector<16x32xf32>
    %41 = vector.shape_cast %40 : vector<16x32xf32> to vector<2x1x8x32xf32>
    %cst_20 = arith.constant dense<0.000000e+00> : vector<128x32xf32>
    %42 = tpu.matmul %3, %28, %cst_20 {dimension_numbers = #tpu.dot_dimension_numbers<[1], [0], [0], [1], [0, 0, 1, 1], [], []>} : vector<128x3xf32>, vector<3x32xf32>, vector<128x32xf32> -> vector<128x32xf32>
    %43 = vector.shape_cast %42 : vector<128x32xf32> to vector<2x8x8x32xf32>
    %44 = vector.broadcast %39 : vector<2x8x1x32xf32> to vector<2x8x8x32xf32>
    %45 = vector.broadcast %41 : vector<2x1x8x32xf32> to vector<2x8x8x32xf32>
    %46 = arith.addf %44, %45 : vector<2x8x8x32xf32>
    %47 = vector.shape_cast %27 : vector<1x32xf32> to vector<1x1x1x32xf32>
    %48 = vector.broadcast %22 : vector<2x8x8x1xf32> to vector<2x8x8x32xf32>
    %49 = vector.broadcast %47 : vector<1x1x1x32xf32> to vector<2x8x8x32xf32>
    %50 = arith.mulf %48, %49 : vector<2x8x8x32xf32>
    %51 = arith.addf %46, %50 : vector<2x8x8x32xf32>
    %52 = arith.addf %51, %43 : vector<2x8x8x32xf32>
    %53 = vector.shape_cast %29 : vector<1x32xf32> to vector<1x1x1x32xf32>
    %54 = vector.broadcast %53 : vector<1x1x1x32xf32> to vector<2x8x8x32xf32>
    %55 = arith.addf %52, %54 : vector<2x8x8x32xf32>
    %56 = arith.negf %55 : vector<2x8x8x32xf32>
    %57 = math.exp %56 : vector<2x8x8x32xf32>
    %cst_21 = arith.constant 1.000000e+00 : f32
    %58 = vector.broadcast %cst_21 : f32 to vector<2x8x8x32xf32>
    %59 = arith.addf %58, %57 : vector<2x8x8x32xf32>
    %60 = arith.divf %58, %59 : vector<2x8x8x32xf32>
    %61 = arith.mulf %55, %60 : vector<2x8x8x32xf32>
    %62 = vector.shape_cast %61 : vector<2x8x8x32xf32> to vector<128x32xf32>
    %cst_22 = arith.constant dense<0.000000e+00> : vector<128x32xf32>
    %63 = tpu.matmul %62, %30, %cst_22 {dimension_numbers = #tpu.dot_dimension_numbers<[1], [0], [0], [1], [0, 0, 1, 1], [], []>} : vector<128x32xf32>, vector<32x32xf32>, vector<128x32xf32> -> vector<128x32xf32>
    %64 = vector.broadcast %31 : vector<1x32xf32> to vector<128x32xf32>
    %65 = arith.addf %63, %64 : vector<128x32xf32>
    %66 = arith.negf %65 : vector<128x32xf32>
    %67 = math.exp %66 : vector<128x32xf32>
    %cst_23 = arith.constant 1.000000e+00 : f32
    %68 = vector.broadcast %cst_23 : f32 to vector<128x32xf32>
    %69 = arith.addf %68, %67 : vector<128x32xf32>
    %70 = arith.divf %68, %69 : vector<128x32xf32>
    %71 = arith.mulf %65, %70 : vector<128x32xf32>
    %72 = vector.broadcast %4 : vector<128x1xf32> to vector<128x32xf32>
    %73 = arith.mulf %71, %72 : vector<128x32xf32>
    %74 = vector.shape_cast %73 : vector<128x32xf32> to vector<2x8x8x32xf32>
    %cst_24 = arith.constant dense<0.000000e+00> : vector<2x8x32xf32>
    %75 = vector.multi_reduction <add>, %74, %cst_24 [2] : vector<2x8x8x32xf32> to vector<2x8x32xf32>
    %76 = vector.shape_cast %75 : vector<2x8x32xf32> to vector<16x32xf32>
    %77 = tpu.concatenate %9, %76, %0 in 1 : vector<16x32xf32>, vector<16x32xf32>, vector<16x4xf32> -> vector<16x68xf32>
    %cst_25 = arith.constant dense<0.000000e+00> : vector<16x32xf32>
    %78 = tpu.matmul %77, %32, %cst_25 {dimension_numbers = #tpu.dot_dimension_numbers<[1], [0], [0], [1], [0, 0, 1, 1], [], []>} : vector<16x68xf32>, vector<68x32xf32>, vector<16x32xf32> -> vector<16x32xf32>
    %79 = vector.broadcast %33 : vector<1x32xf32> to vector<16x32xf32>
    %80 = arith.addf %78, %79 : vector<16x32xf32>
    %81 = arith.negf %80 : vector<16x32xf32>
    %82 = math.exp %81 : vector<16x32xf32>
    %cst_26 = arith.constant 1.000000e+00 : f32
    %83 = vector.broadcast %cst_26 : f32 to vector<16x32xf32>
    %84 = arith.addf %83, %82 : vector<16x32xf32>
    %85 = arith.divf %83, %84 : vector<16x32xf32>
    %86 = arith.mulf %80, %85 : vector<16x32xf32>
    %cst_27 = arith.constant dense<0.000000e+00> : vector<16x32xf32>
    %87 = tpu.matmul %86, %34, %cst_27 {dimension_numbers = #tpu.dot_dimension_numbers<[1], [0], [0], [1], [0, 0, 1, 1], [], []>} : vector<16x32xf32>, vector<32x32xf32>, vector<16x32xf32> -> vector<16x32xf32>
    %88 = arith.addf %9, %87 : vector<16x32xf32>
    %89 = vector.broadcast %35 : vector<1x32xf32> to vector<16x32xf32>
    %90 = arith.addf %88, %89 : vector<16x32xf32>
    %c1 = arith.constant 1 : index
    %c0_28 = arith.constant 0 : index
    %c0_29 = arith.constant 0 : index
    %91 = vector.load %arg7[%c1, %c0_28, %c0_29] : memref<4x204x32xf32, #tpu.memory_space<vmem>>, vector<1x204x32xf32>
    %92 = vector.shape_cast %91 : vector<1x204x32xf32> to vector<204x32xf32>
    %93 = vector.extract_strided_slice %92 {offsets = [0, 0], sizes = [32, 32], strides = [1, 1]} : vector<204x32xf32> to vector<32x32xf32>
    %94 = vector.extract_strided_slice %92 {offsets = [32, 0], sizes = [32, 32], strides = [1, 1]} : vector<204x32xf32> to vector<32x32xf32>
    %95 = vector.extract_strided_slice %92 {offsets = [64, 0], sizes = [1, 32], strides = [1, 1]} : vector<204x32xf32> to vector<1x32xf32>
    %96 = vector.extract_strided_slice %92 {offsets = [65, 0], sizes = [3, 32], strides = [1, 1]} : vector<204x32xf32> to vector<3x32xf32>
    %97 = vector.extract_strided_slice %92 {offsets = [68, 0], sizes = [1, 32], strides = [1, 1]} : vector<204x32xf32> to vector<1x32xf32>
    %98 = vector.extract_strided_slice %92 {offsets = [69, 0], sizes = [32, 32], strides = [1, 1]} : vector<204x32xf32> to vector<32x32xf32>
    %99 = vector.extract_strided_slice %92 {offsets = [101, 0], sizes = [1, 32], strides = [1, 1]} : vector<204x32xf32> to vector<1x32xf32>
    %100 = vector.extract_strided_slice %92 {offsets = [102, 0], sizes = [68, 32], strides = [1, 1]} : vector<204x32xf32> to vector<68x32xf32>
    %101 = vector.extract_strided_slice %92 {offsets = [170, 0], sizes = [1, 32], strides = [1, 1]} : vector<204x32xf32> to vector<1x32xf32>
    %102 = vector.extract_strided_slice %92 {offsets = [171, 0], sizes = [32, 32], strides = [1, 1]} : vector<204x32xf32> to vector<32x32xf32>
    %103 = vector.extract_strided_slice %92 {offsets = [203, 0], sizes = [1, 32], strides = [1, 1]} : vector<204x32xf32> to vector<1x32xf32>
    %104 = tpu.concatenate %93, %94 in 1 : vector<32x32xf32>, vector<32x32xf32> -> vector<32x64xf32>
    %cst_30 = arith.constant dense<0.000000e+00> : vector<16x64xf32>
    %105 = tpu.matmul %90, %104, %cst_30 {dimension_numbers = #tpu.dot_dimension_numbers<[1], [0], [0], [1], [0, 0, 1, 1], [], []>} : vector<16x32xf32>, vector<32x64xf32>, vector<16x64xf32> -> vector<16x64xf32>
    %106 = vector.extract_strided_slice %105 {offsets = [0, 0], sizes = [16, 32], strides = [1, 1]} : vector<16x64xf32> to vector<16x32xf32>
    %107 = vector.shape_cast %106 : vector<16x32xf32> to vector<2x8x1x32xf32>
    %108 = vector.extract_strided_slice %105 {offsets = [0, 32], sizes = [16, 32], strides = [1, 1]} : vector<16x64xf32> to vector<16x32xf32>
    %109 = vector.shape_cast %108 : vector<16x32xf32> to vector<2x1x8x32xf32>
    %cst_31 = arith.constant dense<0.000000e+00> : vector<128x32xf32>
    %110 = tpu.matmul %3, %96, %cst_31 {dimension_numbers = #tpu.dot_dimension_numbers<[1], [0], [0], [1], [0, 0, 1, 1], [], []>} : vector<128x3xf32>, vector<3x32xf32>, vector<128x32xf32> -> vector<128x32xf32>
    %111 = vector.shape_cast %110 : vector<128x32xf32> to vector<2x8x8x32xf32>
    %112 = vector.broadcast %107 : vector<2x8x1x32xf32> to vector<2x8x8x32xf32>
    %113 = vector.broadcast %109 : vector<2x1x8x32xf32> to vector<2x8x8x32xf32>
    %114 = arith.addf %112, %113 : vector<2x8x8x32xf32>
    %115 = vector.shape_cast %95 : vector<1x32xf32> to vector<1x1x1x32xf32>
    %116 = vector.broadcast %22 : vector<2x8x8x1xf32> to vector<2x8x8x32xf32>
    %117 = vector.broadcast %115 : vector<1x1x1x32xf32> to vector<2x8x8x32xf32>
    %118 = arith.mulf %116, %117 : vector<2x8x8x32xf32>
    %119 = arith.addf %114, %118 : vector<2x8x8x32xf32>
    %120 = arith.addf %119, %111 : vector<2x8x8x32xf32>
    %121 = vector.shape_cast %97 : vector<1x32xf32> to vector<1x1x1x32xf32>
    %122 = vector.broadcast %121 : vector<1x1x1x32xf32> to vector<2x8x8x32xf32>
    %123 = arith.addf %120, %122 : vector<2x8x8x32xf32>
    %124 = arith.negf %123 : vector<2x8x8x32xf32>
    %125 = math.exp %124 : vector<2x8x8x32xf32>
    %cst_32 = arith.constant 1.000000e+00 : f32
    %126 = vector.broadcast %cst_32 : f32 to vector<2x8x8x32xf32>
    %127 = arith.addf %126, %125 : vector<2x8x8x32xf32>
    %128 = arith.divf %126, %127 : vector<2x8x8x32xf32>
    %129 = arith.mulf %123, %128 : vector<2x8x8x32xf32>
    %130 = vector.shape_cast %129 : vector<2x8x8x32xf32> to vector<128x32xf32>
    %cst_33 = arith.constant dense<0.000000e+00> : vector<128x32xf32>
    %131 = tpu.matmul %130, %98, %cst_33 {dimension_numbers = #tpu.dot_dimension_numbers<[1], [0], [0], [1], [0, 0, 1, 1], [], []>} : vector<128x32xf32>, vector<32x32xf32>, vector<128x32xf32> -> vector<128x32xf32>
    %132 = vector.broadcast %99 : vector<1x32xf32> to vector<128x32xf32>
    %133 = arith.addf %131, %132 : vector<128x32xf32>
    %134 = arith.negf %133 : vector<128x32xf32>
    %135 = math.exp %134 : vector<128x32xf32>
    %cst_34 = arith.constant 1.000000e+00 : f32
    %136 = vector.broadcast %cst_34 : f32 to vector<128x32xf32>
    %137 = arith.addf %136, %135 : vector<128x32xf32>
    %138 = arith.divf %136, %137 : vector<128x32xf32>
    %139 = arith.mulf %133, %138 : vector<128x32xf32>
    %140 = vector.broadcast %4 : vector<128x1xf32> to vector<128x32xf32>
    %141 = arith.mulf %139, %140 : vector<128x32xf32>
    %142 = vector.shape_cast %141 : vector<128x32xf32> to vector<2x8x8x32xf32>
    %cst_35 = arith.constant dense<0.000000e+00> : vector<2x8x32xf32>
    %143 = vector.multi_reduction <add>, %142, %cst_35 [2] : vector<2x8x8x32xf32> to vector<2x8x32xf32>
    %144 = vector.shape_cast %143 : vector<2x8x32xf32> to vector<16x32xf32>
    %145 = tpu.concatenate %90, %144, %0 in 1 : vector<16x32xf32>, vector<16x32xf32>, vector<16x4xf32> -> vector<16x68xf32>
    %cst_36 = arith.constant dense<0.000000e+00> : vector<16x32xf32>
    %146 = tpu.matmul %145, %100, %cst_36 {dimension_numbers = #tpu.dot_dimension_numbers<[1], [0], [0], [1], [0, 0, 1, 1], [], []>} : vector<16x68xf32>, vector<68x32xf32>, vector<16x32xf32> -> vector<16x32xf32>
    %147 = vector.broadcast %101 : vector<1x32xf32> to vector<16x32xf32>
    %148 = arith.addf %146, %147 : vector<16x32xf32>
    %149 = arith.negf %148 : vector<16x32xf32>
    %150 = math.exp %149 : vector<16x32xf32>
    %cst_37 = arith.constant 1.000000e+00 : f32
    %151 = vector.broadcast %cst_37 : f32 to vector<16x32xf32>
    %152 = arith.addf %151, %150 : vector<16x32xf32>
    %153 = arith.divf %151, %152 : vector<16x32xf32>
    %154 = arith.mulf %148, %153 : vector<16x32xf32>
    %cst_38 = arith.constant dense<0.000000e+00> : vector<16x32xf32>
    %155 = tpu.matmul %154, %102, %cst_38 {dimension_numbers = #tpu.dot_dimension_numbers<[1], [0], [0], [1], [0, 0, 1, 1], [], []>} : vector<16x32xf32>, vector<32x32xf32>, vector<16x32xf32> -> vector<16x32xf32>
    %156 = arith.addf %90, %155 : vector<16x32xf32>
    %157 = vector.broadcast %103 : vector<1x32xf32> to vector<16x32xf32>
    %158 = arith.addf %156, %157 : vector<16x32xf32>
    %c2 = arith.constant 2 : index
    %c0_39 = arith.constant 0 : index
    %c0_40 = arith.constant 0 : index
    %159 = vector.load %arg7[%c2, %c0_39, %c0_40] : memref<4x204x32xf32, #tpu.memory_space<vmem>>, vector<1x204x32xf32>
    %160 = vector.shape_cast %159 : vector<1x204x32xf32> to vector<204x32xf32>
    %161 = vector.extract_strided_slice %160 {offsets = [0, 0], sizes = [32, 32], strides = [1, 1]} : vector<204x32xf32> to vector<32x32xf32>
    %162 = vector.extract_strided_slice %160 {offsets = [32, 0], sizes = [32, 32], strides = [1, 1]} : vector<204x32xf32> to vector<32x32xf32>
    %163 = vector.extract_strided_slice %160 {offsets = [64, 0], sizes = [1, 32], strides = [1, 1]} : vector<204x32xf32> to vector<1x32xf32>
    %164 = vector.extract_strided_slice %160 {offsets = [65, 0], sizes = [3, 32], strides = [1, 1]} : vector<204x32xf32> to vector<3x32xf32>
    %165 = vector.extract_strided_slice %160 {offsets = [68, 0], sizes = [1, 32], strides = [1, 1]} : vector<204x32xf32> to vector<1x32xf32>
    %166 = vector.extract_strided_slice %160 {offsets = [69, 0], sizes = [32, 32], strides = [1, 1]} : vector<204x32xf32> to vector<32x32xf32>
    %167 = vector.extract_strided_slice %160 {offsets = [101, 0], sizes = [1, 32], strides = [1, 1]} : vector<204x32xf32> to vector<1x32xf32>
    %168 = vector.extract_strided_slice %160 {offsets = [102, 0], sizes = [68, 32], strides = [1, 1]} : vector<204x32xf32> to vector<68x32xf32>
    %169 = vector.extract_strided_slice %160 {offsets = [170, 0], sizes = [1, 32], strides = [1, 1]} : vector<204x32xf32> to vector<1x32xf32>
    %170 = vector.extract_strided_slice %160 {offsets = [171, 0], sizes = [32, 32], strides = [1, 1]} : vector<204x32xf32> to vector<32x32xf32>
    %171 = vector.extract_strided_slice %160 {offsets = [203, 0], sizes = [1, 32], strides = [1, 1]} : vector<204x32xf32> to vector<1x32xf32>
    %172 = tpu.concatenate %161, %162 in 1 : vector<32x32xf32>, vector<32x32xf32> -> vector<32x64xf32>
    %cst_41 = arith.constant dense<0.000000e+00> : vector<16x64xf32>
    %173 = tpu.matmul %158, %172, %cst_41 {dimension_numbers = #tpu.dot_dimension_numbers<[1], [0], [0], [1], [0, 0, 1, 1], [], []>} : vector<16x32xf32>, vector<32x64xf32>, vector<16x64xf32> -> vector<16x64xf32>
    %174 = vector.extract_strided_slice %173 {offsets = [0, 0], sizes = [16, 32], strides = [1, 1]} : vector<16x64xf32> to vector<16x32xf32>
    %175 = vector.shape_cast %174 : vector<16x32xf32> to vector<2x8x1x32xf32>
    %176 = vector.extract_strided_slice %173 {offsets = [0, 32], sizes = [16, 32], strides = [1, 1]} : vector<16x64xf32> to vector<16x32xf32>
    %177 = vector.shape_cast %176 : vector<16x32xf32> to vector<2x1x8x32xf32>
    %cst_42 = arith.constant dense<0.000000e+00> : vector<128x32xf32>
    %178 = tpu.matmul %3, %164, %cst_42 {dimension_numbers = #tpu.dot_dimension_numbers<[1], [0], [0], [1], [0, 0, 1, 1], [], []>} : vector<128x3xf32>, vector<3x32xf32>, vector<128x32xf32> -> vector<128x32xf32>
    %179 = vector.shape_cast %178 : vector<128x32xf32> to vector<2x8x8x32xf32>
    %180 = vector.broadcast %175 : vector<2x8x1x32xf32> to vector<2x8x8x32xf32>
    %181 = vector.broadcast %177 : vector<2x1x8x32xf32> to vector<2x8x8x32xf32>
    %182 = arith.addf %180, %181 : vector<2x8x8x32xf32>
    %183 = vector.shape_cast %163 : vector<1x32xf32> to vector<1x1x1x32xf32>
    %184 = vector.broadcast %22 : vector<2x8x8x1xf32> to vector<2x8x8x32xf32>
    %185 = vector.broadcast %183 : vector<1x1x1x32xf32> to vector<2x8x8x32xf32>
    %186 = arith.mulf %184, %185 : vector<2x8x8x32xf32>
    %187 = arith.addf %182, %186 : vector<2x8x8x32xf32>
    %188 = arith.addf %187, %179 : vector<2x8x8x32xf32>
    %189 = vector.shape_cast %165 : vector<1x32xf32> to vector<1x1x1x32xf32>
    %190 = vector.broadcast %189 : vector<1x1x1x32xf32> to vector<2x8x8x32xf32>
    %191 = arith.addf %188, %190 : vector<2x8x8x32xf32>
    %192 = arith.negf %191 : vector<2x8x8x32xf32>
    %193 = math.exp %192 : vector<2x8x8x32xf32>
    %cst_43 = arith.constant 1.000000e+00 : f32
    %194 = vector.broadcast %cst_43 : f32 to vector<2x8x8x32xf32>
    %195 = arith.addf %194, %193 : vector<2x8x8x32xf32>
    %196 = arith.divf %194, %195 : vector<2x8x8x32xf32>
    %197 = arith.mulf %191, %196 : vector<2x8x8x32xf32>
    %198 = vector.shape_cast %197 : vector<2x8x8x32xf32> to vector<128x32xf32>
    %cst_44 = arith.constant dense<0.000000e+00> : vector<128x32xf32>
    %199 = tpu.matmul %198, %166, %cst_44 {dimension_numbers = #tpu.dot_dimension_numbers<[1], [0], [0], [1], [0, 0, 1, 1], [], []>} : vector<128x32xf32>, vector<32x32xf32>, vector<128x32xf32> -> vector<128x32xf32>
    %200 = vector.broadcast %167 : vector<1x32xf32> to vector<128x32xf32>
    %201 = arith.addf %199, %200 : vector<128x32xf32>
    %202 = arith.negf %201 : vector<128x32xf32>
    %203 = math.exp %202 : vector<128x32xf32>
    %cst_45 = arith.constant 1.000000e+00 : f32
    %204 = vector.broadcast %cst_45 : f32 to vector<128x32xf32>
    %205 = arith.addf %204, %203 : vector<128x32xf32>
    %206 = arith.divf %204, %205 : vector<128x32xf32>
    %207 = arith.mulf %201, %206 : vector<128x32xf32>
    %208 = vector.broadcast %4 : vector<128x1xf32> to vector<128x32xf32>
    %209 = arith.mulf %207, %208 : vector<128x32xf32>
    %210 = vector.shape_cast %209 : vector<128x32xf32> to vector<2x8x8x32xf32>
    %cst_46 = arith.constant dense<0.000000e+00> : vector<2x8x32xf32>
    %211 = vector.multi_reduction <add>, %210, %cst_46 [2] : vector<2x8x8x32xf32> to vector<2x8x32xf32>
    %212 = vector.shape_cast %211 : vector<2x8x32xf32> to vector<16x32xf32>
    %213 = tpu.concatenate %158, %212, %0 in 1 : vector<16x32xf32>, vector<16x32xf32>, vector<16x4xf32> -> vector<16x68xf32>
    %cst_47 = arith.constant dense<0.000000e+00> : vector<16x32xf32>
    %214 = tpu.matmul %213, %168, %cst_47 {dimension_numbers = #tpu.dot_dimension_numbers<[1], [0], [0], [1], [0, 0, 1, 1], [], []>} : vector<16x68xf32>, vector<68x32xf32>, vector<16x32xf32> -> vector<16x32xf32>
    %215 = vector.broadcast %169 : vector<1x32xf32> to vector<16x32xf32>
    %216 = arith.addf %214, %215 : vector<16x32xf32>
    %217 = arith.negf %216 : vector<16x32xf32>
    %218 = math.exp %217 : vector<16x32xf32>
    %cst_48 = arith.constant 1.000000e+00 : f32
    %219 = vector.broadcast %cst_48 : f32 to vector<16x32xf32>
    %220 = arith.addf %219, %218 : vector<16x32xf32>
    %221 = arith.divf %219, %220 : vector<16x32xf32>
    %222 = arith.mulf %216, %221 : vector<16x32xf32>
    %cst_49 = arith.constant dense<0.000000e+00> : vector<16x32xf32>
    %223 = tpu.matmul %222, %170, %cst_49 {dimension_numbers = #tpu.dot_dimension_numbers<[1], [0], [0], [1], [0, 0, 1, 1], [], []>} : vector<16x32xf32>, vector<32x32xf32>, vector<16x32xf32> -> vector<16x32xf32>
    %224 = arith.addf %158, %223 : vector<16x32xf32>
    %225 = vector.broadcast %171 : vector<1x32xf32> to vector<16x32xf32>
    %226 = arith.addf %224, %225 : vector<16x32xf32>
    %c3 = arith.constant 3 : index
    %c0_50 = arith.constant 0 : index
    %c0_51 = arith.constant 0 : index
    %227 = vector.load %arg7[%c3, %c0_50, %c0_51] : memref<4x204x32xf32, #tpu.memory_space<vmem>>, vector<1x204x32xf32>
    %228 = vector.shape_cast %227 : vector<1x204x32xf32> to vector<204x32xf32>
    %229 = vector.extract_strided_slice %228 {offsets = [0, 0], sizes = [32, 32], strides = [1, 1]} : vector<204x32xf32> to vector<32x32xf32>
    %230 = vector.extract_strided_slice %228 {offsets = [32, 0], sizes = [32, 32], strides = [1, 1]} : vector<204x32xf32> to vector<32x32xf32>
    %231 = vector.extract_strided_slice %228 {offsets = [64, 0], sizes = [1, 32], strides = [1, 1]} : vector<204x32xf32> to vector<1x32xf32>
    %232 = vector.extract_strided_slice %228 {offsets = [65, 0], sizes = [3, 32], strides = [1, 1]} : vector<204x32xf32> to vector<3x32xf32>
    %233 = vector.extract_strided_slice %228 {offsets = [68, 0], sizes = [1, 32], strides = [1, 1]} : vector<204x32xf32> to vector<1x32xf32>
    %234 = vector.extract_strided_slice %228 {offsets = [69, 0], sizes = [32, 32], strides = [1, 1]} : vector<204x32xf32> to vector<32x32xf32>
    %235 = vector.extract_strided_slice %228 {offsets = [101, 0], sizes = [1, 32], strides = [1, 1]} : vector<204x32xf32> to vector<1x32xf32>
    %236 = vector.extract_strided_slice %228 {offsets = [102, 0], sizes = [68, 32], strides = [1, 1]} : vector<204x32xf32> to vector<68x32xf32>
    %237 = vector.extract_strided_slice %228 {offsets = [170, 0], sizes = [1, 32], strides = [1, 1]} : vector<204x32xf32> to vector<1x32xf32>
    %238 = vector.extract_strided_slice %228 {offsets = [171, 0], sizes = [32, 32], strides = [1, 1]} : vector<204x32xf32> to vector<32x32xf32>
    %239 = vector.extract_strided_slice %228 {offsets = [203, 0], sizes = [1, 32], strides = [1, 1]} : vector<204x32xf32> to vector<1x32xf32>
    %240 = tpu.concatenate %229, %230 in 1 : vector<32x32xf32>, vector<32x32xf32> -> vector<32x64xf32>
    %cst_52 = arith.constant dense<0.000000e+00> : vector<16x64xf32>
    %241 = tpu.matmul %226, %240, %cst_52 {dimension_numbers = #tpu.dot_dimension_numbers<[1], [0], [0], [1], [0, 0, 1, 1], [], []>} : vector<16x32xf32>, vector<32x64xf32>, vector<16x64xf32> -> vector<16x64xf32>
    %242 = vector.extract_strided_slice %241 {offsets = [0, 0], sizes = [16, 32], strides = [1, 1]} : vector<16x64xf32> to vector<16x32xf32>
    %243 = vector.shape_cast %242 : vector<16x32xf32> to vector<2x8x1x32xf32>
    %244 = vector.extract_strided_slice %241 {offsets = [0, 32], sizes = [16, 32], strides = [1, 1]} : vector<16x64xf32> to vector<16x32xf32>
    %245 = vector.shape_cast %244 : vector<16x32xf32> to vector<2x1x8x32xf32>
    %cst_53 = arith.constant dense<0.000000e+00> : vector<128x32xf32>
    %246 = tpu.matmul %3, %232, %cst_53 {dimension_numbers = #tpu.dot_dimension_numbers<[1], [0], [0], [1], [0, 0, 1, 1], [], []>} : vector<128x3xf32>, vector<3x32xf32>, vector<128x32xf32> -> vector<128x32xf32>
    %247 = vector.shape_cast %246 : vector<128x32xf32> to vector<2x8x8x32xf32>
    %248 = vector.broadcast %243 : vector<2x8x1x32xf32> to vector<2x8x8x32xf32>
    %249 = vector.broadcast %245 : vector<2x1x8x32xf32> to vector<2x8x8x32xf32>
    %250 = arith.addf %248, %249 : vector<2x8x8x32xf32>
    %251 = vector.shape_cast %231 : vector<1x32xf32> to vector<1x1x1x32xf32>
    %252 = vector.broadcast %22 : vector<2x8x8x1xf32> to vector<2x8x8x32xf32>
    %253 = vector.broadcast %251 : vector<1x1x1x32xf32> to vector<2x8x8x32xf32>
    %254 = arith.mulf %252, %253 : vector<2x8x8x32xf32>
    %255 = arith.addf %250, %254 : vector<2x8x8x32xf32>
    %256 = arith.addf %255, %247 : vector<2x8x8x32xf32>
    %257 = vector.shape_cast %233 : vector<1x32xf32> to vector<1x1x1x32xf32>
    %258 = vector.broadcast %257 : vector<1x1x1x32xf32> to vector<2x8x8x32xf32>
    %259 = arith.addf %256, %258 : vector<2x8x8x32xf32>
    %260 = arith.negf %259 : vector<2x8x8x32xf32>
    %261 = math.exp %260 : vector<2x8x8x32xf32>
    %cst_54 = arith.constant 1.000000e+00 : f32
    %262 = vector.broadcast %cst_54 : f32 to vector<2x8x8x32xf32>
    %263 = arith.addf %262, %261 : vector<2x8x8x32xf32>
    %264 = arith.divf %262, %263 : vector<2x8x8x32xf32>
    %265 = arith.mulf %259, %264 : vector<2x8x8x32xf32>
    %266 = vector.shape_cast %265 : vector<2x8x8x32xf32> to vector<128x32xf32>
    %cst_55 = arith.constant dense<0.000000e+00> : vector<128x32xf32>
    %267 = tpu.matmul %266, %234, %cst_55 {dimension_numbers = #tpu.dot_dimension_numbers<[1], [0], [0], [1], [0, 0, 1, 1], [], []>} : vector<128x32xf32>, vector<32x32xf32>, vector<128x32xf32> -> vector<128x32xf32>
    %268 = vector.broadcast %235 : vector<1x32xf32> to vector<128x32xf32>
    %269 = arith.addf %267, %268 : vector<128x32xf32>
    %270 = arith.negf %269 : vector<128x32xf32>
    %271 = math.exp %270 : vector<128x32xf32>
    %cst_56 = arith.constant 1.000000e+00 : f32
    %272 = vector.broadcast %cst_56 : f32 to vector<128x32xf32>
    %273 = arith.addf %272, %271 : vector<128x32xf32>
    %274 = arith.divf %272, %273 : vector<128x32xf32>
    %275 = arith.mulf %269, %274 : vector<128x32xf32>
    %276 = vector.broadcast %4 : vector<128x1xf32> to vector<128x32xf32>
    %277 = arith.mulf %275, %276 : vector<128x32xf32>
    %278 = vector.shape_cast %277 : vector<128x32xf32> to vector<2x8x8x32xf32>
    %cst_57 = arith.constant dense<0.000000e+00> : vector<2x8x32xf32>
    %279 = vector.multi_reduction <add>, %278, %cst_57 [2] : vector<2x8x8x32xf32> to vector<2x8x32xf32>
    %280 = vector.shape_cast %279 : vector<2x8x32xf32> to vector<16x32xf32>
    %281 = tpu.concatenate %226, %280, %0 in 1 : vector<16x32xf32>, vector<16x32xf32>, vector<16x4xf32> -> vector<16x68xf32>
    %cst_58 = arith.constant dense<0.000000e+00> : vector<16x32xf32>
    %282 = tpu.matmul %281, %236, %cst_58 {dimension_numbers = #tpu.dot_dimension_numbers<[1], [0], [0], [1], [0, 0, 1, 1], [], []>} : vector<16x68xf32>, vector<68x32xf32>, vector<16x32xf32> -> vector<16x32xf32>
    %283 = vector.broadcast %237 : vector<1x32xf32> to vector<16x32xf32>
    %284 = arith.addf %282, %283 : vector<16x32xf32>
    %285 = arith.negf %284 : vector<16x32xf32>
    %286 = math.exp %285 : vector<16x32xf32>
    %cst_59 = arith.constant 1.000000e+00 : f32
    %287 = vector.broadcast %cst_59 : f32 to vector<16x32xf32>
    %288 = arith.addf %287, %286 : vector<16x32xf32>
    %289 = arith.divf %287, %288 : vector<16x32xf32>
    %290 = arith.mulf %284, %289 : vector<16x32xf32>
    %cst_60 = arith.constant dense<0.000000e+00> : vector<16x32xf32>
    %291 = tpu.matmul %290, %238, %cst_60 {dimension_numbers = #tpu.dot_dimension_numbers<[1], [0], [0], [1], [0, 0, 1, 1], [], []>} : vector<16x32xf32>, vector<32x32xf32>, vector<16x32xf32> -> vector<16x32xf32>
    %292 = arith.addf %226, %291 : vector<16x32xf32>
    %293 = vector.broadcast %239 : vector<1x32xf32> to vector<16x32xf32>
    %294 = arith.addf %292, %293 : vector<16x32xf32>
    %c0_61 = arith.constant 0 : index
    %c0_62 = arith.constant 0 : index
    %295 = vector.load %arg8[%c0_61, %c0_62] : memref<132x32xf32, #tpu.memory_space<vmem>>, vector<132x32xf32>
    %296 = vector.extract_strided_slice %295 {offsets = [0, 0], sizes = [32, 32], strides = [1, 1]} : vector<132x32xf32> to vector<32x32xf32>
    %297 = vector.extract_strided_slice %295 {offsets = [32, 0], sizes = [1, 32], strides = [1, 1]} : vector<132x32xf32> to vector<1x32xf32>
    %298 = vector.extract_strided_slice %295 {offsets = [33, 0], sizes = [32, 32], strides = [1, 1]} : vector<132x32xf32> to vector<32x32xf32>
    %299 = vector.extract_strided_slice %295 {offsets = [65, 0], sizes = [1, 32], strides = [1, 1]} : vector<132x32xf32> to vector<1x32xf32>
    %300 = vector.extract_strided_slice %295 {offsets = [66, 0], sizes = [32, 32], strides = [1, 1]} : vector<132x32xf32> to vector<32x32xf32>
    %301 = vector.extract_strided_slice %295 {offsets = [98, 0], sizes = [1, 32], strides = [1, 1]} : vector<132x32xf32> to vector<1x32xf32>
    %302 = vector.extract_strided_slice %295 {offsets = [99, 0], sizes = [32, 32], strides = [1, 1]} : vector<132x32xf32> to vector<32x32xf32>
    %303 = vector.extract_strided_slice %295 {offsets = [131, 0], sizes = [1, 32], strides = [1, 1]} : vector<132x32xf32> to vector<1x32xf32>
    %cst_63 = arith.constant dense<0.000000e+00> : vector<16x32xf32>
    %304 = tpu.matmul %294, %296, %cst_63 {dimension_numbers = #tpu.dot_dimension_numbers<[1], [0], [0], [1], [0, 0, 1, 1], [], []>} : vector<16x32xf32>, vector<32x32xf32>, vector<16x32xf32> -> vector<16x32xf32>
    %305 = vector.broadcast %297 : vector<1x32xf32> to vector<16x32xf32>
    %306 = arith.addf %304, %305 : vector<16x32xf32>
    %307 = arith.negf %306 : vector<16x32xf32>
    %308 = math.exp %307 : vector<16x32xf32>
    %cst_64 = arith.constant 1.000000e+00 : f32
    %309 = vector.broadcast %cst_64 : f32 to vector<16x32xf32>
    %310 = arith.addf %309, %308 : vector<16x32xf32>
    %311 = arith.divf %309, %310 : vector<16x32xf32>
    %312 = arith.mulf %306, %311 : vector<16x32xf32>
    %cst_65 = arith.constant dense<0.000000e+00> : vector<16x32xf32>
    %313 = tpu.matmul %312, %298, %cst_65 {dimension_numbers = #tpu.dot_dimension_numbers<[1], [0], [0], [1], [0, 0, 1, 1], [], []>} : vector<16x32xf32>, vector<32x32xf32>, vector<16x32xf32> -> vector<16x32xf32>
    %314 = vector.broadcast %299 : vector<1x32xf32> to vector<16x32xf32>
    %315 = arith.addf %313, %314 : vector<16x32xf32>
    %316 = vector.broadcast %2 : vector<16x1xf32> to vector<16x32xf32>
    %317 = arith.mulf %315, %316 : vector<16x32xf32>
    %318 = vector.shape_cast %317 : vector<16x32xf32> to vector<2x8x32xf32>
    %cst_66 = arith.constant dense<0.000000e+00> : vector<2x32xf32>
    %319 = vector.multi_reduction <add>, %318, %cst_66 [1] : vector<2x8x32xf32> to vector<2x32xf32>
    %cst_67 = arith.constant dense<0.000000e+00> : vector<2x32xf32>
    %320 = tpu.matmul %319, %300, %cst_67 {dimension_numbers = #tpu.dot_dimension_numbers<[1], [0], [0], [1], [0, 0, 1, 1], [], []>} : vector<2x32xf32>, vector<32x32xf32>, vector<2x32xf32> -> vector<2x32xf32>
    %321 = vector.broadcast %301 : vector<1x32xf32> to vector<2x32xf32>
    %322 = arith.addf %320, %321 : vector<2x32xf32>
    %323 = arith.negf %322 : vector<2x32xf32>
    %324 = math.exp %323 : vector<2x32xf32>
    %cst_68 = arith.constant 1.000000e+00 : f32
    %325 = vector.broadcast %cst_68 : f32 to vector<2x32xf32>
    %326 = arith.addf %325, %324 : vector<2x32xf32>
    %327 = arith.divf %325, %326 : vector<2x32xf32>
    %328 = arith.mulf %322, %327 : vector<2x32xf32>
    %cst_69 = arith.constant dense<0.000000e+00> : vector<2x32xf32>
    %329 = tpu.matmul %328, %302, %cst_69 {dimension_numbers = #tpu.dot_dimension_numbers<[1], [0], [0], [1], [0, 0, 1, 1], [], []>} : vector<2x32xf32>, vector<32x32xf32>, vector<2x32xf32> -> vector<2x32xf32>
    %330 = vector.broadcast %303 : vector<1x32xf32> to vector<2x32xf32>
    %331 = arith.addf %329, %330 : vector<2x32xf32>
    %c0_70 = arith.constant 0 : index
    %c0_71 = arith.constant 0 : index
    %332 = vector.load %arg9[%c0_70, %c0_71] : memref<2x32xf32, #tpu.memory_space<vmem>>, vector<2x32xf32>
    tpu.vector_store %arg9[%c0_70, %c0_71], %331 {strides = array<i32>} : memref<2x32xf32, #tpu.memory_space<vmem>>, vector<2x32xf32>,
    return
  }
}

</mosaic_0001>

<bundles_post_ra>
// kernel: egnn_pallas.1
= control target key start
LH: loop header
LB: loop body
LE: loop exit
PB: predicated region body
PF: predicated region fallthrough
CT: control target
= control target key end

     0   :  { %vm85_vm0 = vcmask 1043456   ;;  %vm78_vm1 = vcmask 31744   ;;  %v11412_v8 = vmov 0.0   ;;  %s8627_s22 = smov 32   ;;  %vm8628_vm2 = vmmov 0   ;;  %s8632_s19 = smov 64   ;;  %s11402_s5 = inlined_call_operand.vmem [shape: f32[4,32], index: 5, kind: input, shape index: {}]   ;;  %s11403_s0 = inlined_call_operand.vmem [shape: f32[16,4], index: 0, kind: input, shape index: {}]   ;;  %s11404_s7 = inlined_call_operand.vmem [shape: f32[4,204,32], index: 7, kind: input, shape index: {}]   ;;  %s11405_s1 = inlined_call_operand.vmem [shape: f32[16,3], index: 1, kind: input, shape index: {}]   ;;  %s11406_s3 = inlined_call_operand.vmem [shape: f32[128,3], index: 3, kind: input, shape index: {}]   ;;  %s11407_s6 = inlined_call_operand.vmem [shape: f32[1,32], index: 6, kind: input, shape index: {}]   ;;  %s11408_s4 = inlined_call_operand.vmem [shape: f32[128,1], index: 4, kind: input, shape index: {}]   ;;  %s11409_s2 = inlined_call_operand.vmem [shape: f32[16,1], index: 2, kind: input, shape index: {}]   ;;  %s11410_s8 = inlined_call_operand.vmem [shape: f32[132,32], index: 8, kind: input, shape index: {}]   ;;  %s11411_s9 = inlined_call_operand.vmem [shape: f32[2,32], index: 9, kind: output, shape index: {}]  }
   0x1   :  { %v70_v0 = vld [vmem:[%s11402_s5] sm:$0xf]  ;;  %v33_v2 = vld [vmem:[%s11403_s0 + $0x8] sm:$0xff]  ;;  %v476_v5 = vld [vmem:[%s11404_s7 + $0x30] sm:$0xff]  ;;  %vm164_vm3 = vcmask 23552   ;;  %vm748_vm4 = vcmask 1042432   ;;  %v321_v56 = vlaneseq }
   0x2   :  { %v32_v1 = vld [vmem:[%s11403_s0] sm:$0xff]  ;;  %7319 = vmatprep.subr.msk.mxu0 %vm85_vm0, %v70_v0  ;;  %v475_v4 = vld [vmem:[%s11404_s7 + $0x28] sm:$0xff]  ;;  %v477_v7 = vld [vmem:[%s11404_s7 + $0x38] sm:$0xff]  ;;  %vm512_vm5 = vcmask 261120   ;;  %vm1776_vm6 = vcmask 1041408   ;;  %vm331_vm7 = vcmask 1041409  }
   0x3   :  { %7321 = vmatprep.mubr.msk.f32.mxu0 %vm78_vm1, %v32_v1  ;;  %v474_v3 = vld [vmem:[%s11404_s7 + $0x20] sm:$0xff]  ;;  %7320 = vmatpush3.msk.msra.mxu0 %vm85_vm0, %v70_v0  ;;  %v7983_v9 = vpack.i.bf16 %v477_v7, %v476_v5  ;;  %v35_v11 = vld [vmem:[%s11405_s1 + $0x8] sm:$0xff]  ;;  %v40_v19 = vld [vmem:[%s11406_s3 + $0x10] sm:$0xff]  ;;  %v8826_v59 = vshrl.u32 %v321_v56, 7  ;;  %v322_v60 = vand.u32 127, %v321_v56  ;;  %vm332_vm8 = vcmask 1042434  }
   0x4   :  { %v7978_v6 = vpack.i.bf16 %v475_v4, %v474_v3  ;;  %7322 = vmatmul.mubr.msk.f32.vlgmr.msra.gmra.mrb[0].mxu0 %vm78_vm1, %v33_v2  ;;  %7324 = vmatprep.subr.mxu0 %v11412_v8  ;;  %v34_v10 = vld [vmem:[%s11405_s1] sm:$0xff]  ;;  %v312_v13 = vmul.f32 %v35_v11, %v35_v11  ;;  %v39_v18 = vld [vmem:[%s11406_s3 + $0x8] sm:$0xff]  ;;  %v41_v21 = vld [vmem:[%s11406_s3 + $0x18] sm:$0xff]  ;;  %vm334_vm9 = vcmask 1043459   ;;  %vm336_vm10 = vcmask 1044484  }
   0x5   :  { %7326 = vmatprep.mubr.msk.f32.mxu0 %vm8628_vm2, %v11412_v8  ;;  %v311_v12 = vmul.f32 %v34_v10, %v34_v10  ;;  %v8728_v14 = vld [vmem:[%s11404_s7 + $0x40] sm:$0xff]  ;;  %v43_v23 = vld [vmem:[%s11406_s3 + $0x28] sm:$0xff]  ;;  %v44_v24 = vld [vmem:[%s11406_s3 + $0x30] sm:$0xff]  ;;  %v325_v62 = vsub.s32 %v322_v60, %v8826_v59  ;;  %v8830_v2 = vsub.s32 0, %v8826_v59  ;;  %v8833_v5 = vsub.s32 1, %v8826_v59 }
   0x6   :  { %7979 = vrot.lane.b32.xlu0 %v7978_v6, %s8627_s22  ;;  %v699_v15 = vrot.slane %v8728_v14, 1  ;;  %v38_v16 = vld [vmem:[%s11406_s3] sm:$0xff]  ;;  %v316_v20 = vsel %vm164_vm3, %v312_v13, 0.0  ;;  %v45_v25 = vld [vmem:[%s11406_s3 + $0x38] sm:$0xff]  ;;  %v47_v27 = vld [vmem:[%s11406_s3 + $0x48] sm:$0xff]  ;;  %vm338_vm11 = vcmask 1045509  }
   0x7   :  { %v313_v17 = vsel %vm164_vm3, %v311_v12, 0.0  ;;  %v42_v22 = vld [vmem:[%s11406_s3 + $0x20] sm:$0xff]  ;;  %v48_v28 = vld [vmem:[%s11406_s3 + $0x50] sm:$0xff]  ;;  %v49_v29 = vld [vmem:[%s11406_s3 + $0x58] sm:$0xff]  ;;  %11509 = vst [vmem:[#allocation2_spill] sm:$0xff] %v8833_v5  ;;  %vm340_vm12 = vcmask 1046534  }
   0x8   :  { %314 = vadd.xlane.f32.xlu1 %v313_v17  ;;  %v46_v26 = vld [vmem:[%s11406_s3 + $0x40] sm:$0xff]  ;;  %v51_v31 = vld [vmem:[%s11406_s3 + $0x68] sm:$0xff]  ;;  %v52_v35 = vld [vmem:[%s11406_s3 + $0x70] sm:$0xff]  ;;  %vm342_vm13 = vcmask 1047559   ;;  %vm1760_vm14 = vcmask 523264   ;;  %vm1804_vm15 = vcmask 556032  }
   0x9   :  { %v50_v30 = vld [vmem:[%s11406_s3 + $0x60] sm:$0xff]  ;;  %v471_v34 = vld [vmem:[%s11404_s7 + $0x8] sm:$0xff]  ;;  %v53_v40 = vld [vmem:[%s11406_s3 + $0x78] sm:$0xff]  ;;  %vm1906_vm1 = vcmask 1044480  }
   0xa   :  { %7984 = vrot.lane.b32.xlu0 %v7983_v9, %s8627_s22  ;;  %7325 = vmatpush3.xpose.msk.msra.mxu0 %vm164_vm3, %v34_v10  ;;  %v470_v33 = vld [vmem:[%s11404_s7] sm:$0xff]  ;;  %v472_v43 = vld [vmem:[%s11404_s7 + $0x10] sm:$0xff]  ;;  %v473_v44 = vld [vmem:[%s11404_s7 + $0x18] sm:$0xff]  ;;  %v8838_v9 = vsub.s32 2, %v8826_v59 }
   0xb   :  { %7329 = vmatprep.subr.mxu0 %v11412_v8  ;;  %v6659_v50 = vld [vmem:[%s11407_s6] ss:$0 sm:$0xff]  ;;  %s8629_s6 = smov 96  }
   0xc   :  { %317 = vadd.xlane.f32.xlu1 %v316_v20  ;;  %11510 = vst [vmem:[#allocation3_spill] sm:$0xff] %v8838_v9 }
   0xd   :  { %7327 = vmatmul.mubr.msk.f32.vlgmr.msra.gmra.mrb[2].mxu0 %vm164_vm3, %v34_v10 }
   0xe   :  { %7330 = vmatpush3.xpose.msk.msra.mxu0 %vm164_vm3, %v35_v11  ;;  %7331 = vmatprep.mubr.msk.f32.mxu0 %vm8628_vm2, %v11412_v8 }
   0xf   :  { %7345 = vmatprep.subr.msk.mxu0 %vm748_vm4, %v699_v15 }
  0x11   :  { %7332 = vmatmul.mubr.msk.f32.vlgmr.msra.gmra.mrb[4].mxu0 %vm164_vm3, %v35_v11  ;;  %v8842_v11 = vsub.s32 3, %v8826_v59 }
  0x12   :  { %7347 = vmatprep.mubr.msk.f32.mxu0 %vm164_vm3, %v38_v16  ;;  %7346 = vmatpush3.msk.msra.mxu0 %vm748_vm4, %v699_v15  ;;  %v8846_v15 = vsub.s32 4, %v8826_v59 }
  0x13   :  { %11511 = vst [vmem:[#allocation4_spill] sm:$0xff] %v8842_v11 }
  0x14   :  { %11512 = vst [vmem:[#allocation5_spill] sm:$0xff] %v8846_v15 }
  0x15   :  { %7348 = vmatmul.mubr.msk.f32.vlgmr.msra.gmra.mrb[6].mxu0 %vm164_vm3, %v39_v18 }
  0x16   :  { %7350 = vmatprep.mubr.msk.f32.mxu0 %vm164_vm3, %v40_v19  ;;  %v402_v19 = vsub.s32 6, %v8826_v59 }
  0x19   :  { %7351 = vmatmul.mubr.msk.f32.gmra.mrb[8].mxu0 %vm164_vm3, %v41_v21 }
  0x1a   :  { %7353 = vmatprep.mubr.msk.f32.mxu0 %vm164_vm3, %v42_v22 }
  0x1d   :  { %7354 = vmatmul.mubr.msk.f32.gmra.mrb[10].mxu0 %vm164_vm3, %v43_v23 }
  0x1e   :  { %7356 = vmatprep.mubr.msk.f32.mxu0 %vm164_vm3, %v44_v24  ;;  %v409_v24 = vsub.s32 7, %v8826_v59 }
  0x21   :  { %7357 = vmatmul.mubr.msk.f32.gmra.mrb[12].mxu0 %vm164_vm3, %v45_v25 }
  0x22   :  { %7359 = vmatprep.mubr.msk.f32.mxu0 %vm164_vm3, %v46_v26 }
  0x25   :  { %7360 = vmatmul.mubr.msk.f32.gmra.mrb[14].mxu0 %vm164_vm3, %v47_v27 }
  0x26   :  { %7362 = vmatprep.mubr.msk.f32.mxu0 %vm164_vm3, %v48_v28  ;;  %v8855_v28 = vsub.s32 5, %v8826_v59 }
  0x28   :  { %11513 = vst [vmem:[#allocation6_spill] sm:$0xff] %v8855_v28 }
  0x29   :  { %7363 = vmatmul.mubr.msk.f32.gmra.mrb[16].mxu0 %vm164_vm3, %v49_v29 }
  0x2a   :  { %7365 = vmatprep.mubr.msk.f32.mxu0 %vm164_vm3, %v50_v30 }
  0x2d   :  { %7366 = vmatmul.mubr.msk.f32.gmra.mrb[18].mxu0 %vm164_vm3, %v51_v31 }
  0x2e   :  { %7368 = vmatprep.mubr.msk.f32.mxu0 %vm164_vm3, %v52_v35 }
  0x31   :  { %7369 = vmatmul.mubr.msk.f32.gmra.mrb[20].mxu0 %vm164_vm3, %v53_v40 }
  0x78   :  { %v7980_v32 = vpop.permute.xlu0 %7979 }
  0x79   :  { %v7982_v36 = vunpack.i.h.bf16 %v7980_v32  ;;  %v7981_v37 = vunpack.i.l.bf16 %v7980_v32 }
  0x7b   :  { %v513_v38 = vsel %vm512_vm5, %v470_v33, %v7981_v37  ;;  %v514_v39 = vsel %vm512_vm5, %v471_v34, %v7982_v36 }
  0x7c   :  { %v7985_v41 = vpop.permute.xlu0 %7984  ;;  %v7782_v42 = vpack.c.bf16 %v514_v39, %v513_v38 }
  0x7d   :  { %v7987_v45 = vunpack.i.h.bf16 %v7985_v41  ;;  %v7986_v46 = vunpack.i.l.bf16 %v7985_v41 }
  0x7e   :  { %7783 = vmatprep.subr.bf16.mxu1 %v7782_v42 }
  0x7f   :  { %7785 = vmatpush3.bf16.msra.mxu1 %v7782_v42  ;;  %v515_v47 = vsel %vm512_vm5, %v472_v43, %v7986_v46  ;;  %v516_v48 = vsel %vm512_vm5, %v473_v44, %v7987_v45 }
  0x80   :  { %v7786_v49 = vpack.c.bf16 %v516_v48, %v515_v47 }
  0x82   :  { %7787 = vmatprep.subr.bf16.mxu1 %v7786_v49 }
  0x83   :  { %7789 = vmatpush3.bf16.msra.mxu1 %v7786_v49 }
  0x95   :  { %v315_v63 = vpop.xlane.xlu1 %314 }
  0x96   :  { %v326_v0 = vrot.slane %v315_v63, %v325_v62 }
  0x98   :  { %v352_v3 = vadd.f32 %v326_v0, %v315_v63  ;;  %v481_v63 = vld [vmem:[%s11404_s7 + $0x58] sm:$0xff]  ;;  %v8916_v0 = vld [vmem:[%s11404_s7 + $0x60] sm:$0xff] }
  0x99   :  { %v318_v12 = vpop.xlane.xlu1 %317 }
  0x9a   :  { %v330_v16 = vrot.slane %v318_v12, %v325_v62 }
  0x9c   :  { %v353_v18 = vadd.f32 %v330_v16, %v318_v12  ;;  %v8630_v12 = vmov 0   ;;  %v55_v16 = vld [vmem:[%s11408_s4 + $0x8] sm:$0xff] }
  0x9d   :  { %7988 = vset.pattern.permute.xlu1 %v8630_v12  ;;  %7989 = vset.pattern.permute.xlu0 %v8630_v12 }
  0xd7   :  { %v7323_v51 = vpop.f32.mrb[0].mxu0 }
  0xd8   :  { %v155_v52 = vpop.f32.mrb[1].mxu0  ;;  %v8820_v54 = vadd.f32 %v7323_v51, %v6659_v50  ;;  %v480_v51 = vld [vmem:[%s11404_s7 + $0x50] sm:$0xff] }
  0xd9   :  { %v8818_v53 = vadd.f32 %v6659_v50, %v155_v52  ;;  %v479_v50 = vld [vmem:[%s11404_s7 + $0x48] sm:$0xff]  ;;  %v1190_v52 = vrot.slane %v8728_v14, 5  ;;  %v1193_v56 = vrot.slane %v480_v51, 5  ;;  %v61_v51 = vld [vmem:[%s11408_s4 + $0x38] sm:$0xff] }
  0xdb   :  { %7342 = vmatprep.mubr.msk.f32.mxu1 %vm512_vm5, %v8818_v53 }
  0xdc   :  { %7343 = vmatmul.mubr.msk.f32.vlgmr.msra.gmra.mrb[0].mxu1 %vm512_vm5, %v8820_v54 }
  0xe0   :  { %v234_v55 = vpop.f32.mrb[2].mxu0 }
  0xe1   :  { %v7328_v57 = vpop.f32.mrb[3].mxu0  ;;  %v354_v1 = vmul.f32 2.0, %v234_v55  ;;  %v1191_v55 = vrot.slane %v479_v50, 5  ;;  %v68_v50 = vld [vmem:[%s11408_s4 + $0x70] sm:$0xff] }
  0xe3   :  { %v356_v4 = vsub.f32 %v352_v3, %v354_v1  ;;  %v1194_v60 = vsel %vm748_vm4, %v1191_v55, %v1193_v56  ;;  %v1195_v1 = vrot.slane %v481_v63, 5  ;;  %v1197_v3 = vrot.slane %v8916_v0, 5 }
  0xe4   :  { %v307_v58 = vpop.f32.mrb[4].mxu0 }
  0xe5   :  { %v7333_v61 = vpop.f32.mrb[5].mxu0  ;;  %v361_v6 = vrot.slane %v356_v4, %v8830_v2  ;;  %v368_v7 = vrot.slane %v356_v4, %v8833_v5  ;;  %v375_v10 = vrot.slane %v356_v4, %v8838_v9  ;;  %v382_v13 = vrot.slane %v356_v4, %v8842_v11 }
  0xe6   :  { %v389_v17 = vrot.slane %v356_v4, %v8846_v15  ;;  %v355_v20 = vmul.f32 2.0, %v307_v58  ;;  %v403_v21 = vrot.slane %v356_v4, %v402_v19  ;;  %v410_v25 = vrot.slane %v356_v4, %v409_v24 }
  0xe7   :  { %363 = vbcast.lane.b32.xlu0 %v361_v6, 256  ;;  %v396_v44 = vrot.slane %v356_v4, %v8855_v28  ;;  %v1192_v58 = vsel %vm748_vm4, %v1190_v52, %v1191_v55  ;;  %v1196_v6 = vsel %vm748_vm4, %v1193_v56, %v1195_v1  ;;  %v8631_v52 = vmov 1966171168  }
  0xe8   :  { %v357_v22 = vsub.f32 %v353_v18, %v355_v20  ;;  %v8858_v31 = vpop.f32.mrb[6].mxu0  ;;  %v7790_v62 = vpack.c.bf16 %v1194_v60, %v1192_v58  ;;  %v63_v18 = vld [vmem:[%s11408_s4 + $0x48] sm:$0xff]  ;;  %v62_v20 = vld [vmem:[%s11408_s4 + $0x40] sm:$0xff]  ;;  %v602_v55 = vunpack.c.l.s4 %v8631_v52 }
  0xe9   :  { %v8860_v32 = vpop.f32.mrb[7].mxu0 }
  0xea   :  { %v417_v23 = vrot.slane %v357_v22, %v8830_v2  ;;  %v424_v26 = vrot.slane %v357_v22, %v8833_v5  ;;  %v438_v27 = vrot.slane %v357_v22, %v8842_v11  ;;  %v452_v29 = vrot.slane %v357_v22, %v8855_v28  ;;  %7791 = vmatprep.subr.bf16.mxu1 %v7790_v62 }
  0xeb   :  { %370 = vbcast.lane.b32.xlu0 %v368_v7, 256  ;;  %v466_v30 = vrot.slane %v357_v22, %v409_v24  ;;  %v431_v49 = vrot.slane %v357_v22, %v8838_v9  ;;  %v445_v57 = vrot.slane %v357_v22, %v8846_v15  ;;  %v459_v4 = vrot.slane %v357_v22, %v402_v19  ;;  %v65_v24 = vld [vmem:[%s11408_s4 + $0x58] sm:$0xff] }
  0xec   :  { %v8862_v33 = vpop.f32.mrb[8].mxu0  ;;  %7793 = vmatpush3.bf16.msra.mxu1 %v7790_v62  ;;  %v1198_v7 = vsel %vm748_vm4, %v1195_v1, %v1197_v3  ;;  %v603_v58 = vunpack.c.0.s8 %v602_v55 }
  0xed   :  { %v8864_v34 = vpop.f32.mrb[9].mxu0 }
  0xee   :  { %v8982_v62 = vsub.s32 %v603_v58, %v8826_v59 }
  0xef   :  { %377 = vbcast.lane.b32.xlu0 %v375_v10, 256  ;;  %v7794_v10 = vpack.c.bf16 %v1198_v7, %v1196_v6 }
  0xf0   :  { %v8866_v35 = vpop.f32.mrb[10].mxu0  ;;  %11520 = vst [vmem:[#allocation13_spill] sm:$0xff] %v8982_v62 }
  0xf1   :  { %v8868_v36 = vpop.f32.mrb[11].mxu0  ;;  %7795 = vmatprep.subr.bf16.mxu1 %v7794_v10 }
  0xf2   :  { %7797 = vmatpush3.bf16.msra.mxu1 %v7794_v10  ;;  %v8995_v10 = vrot.slane %v8728_v14, %v8830_v2 }
  0xf3   :  { %384 = vbcast.lane.b32.xlu0 %v382_v13, 256  ;;  %v54_v13 = vld [vmem:[%s11408_s4] sm:$0xff] }
  0xf4   :  { %v8870_v37 = vpop.f32.mrb[12].mxu0 }
  0xf5   :  { %v8872_v38 = vpop.f32.mrb[13].mxu0 }
  0xf7   :  { %391 = vbcast.lane.b32.xlu0 %v389_v17, 256  ;;  %v56_v17 = vld [vmem:[%s11408_s4 + $0x10] sm:$0xff] }
  0xf8   :  { %v8876_v40 = vpop.f32.mrb[14].mxu0 }
  0xf9   :  { %v8882_v42 = vpop.f32.mrb[15].mxu0 }
  0xfb   :  { %405 = vbcast.lane.b32.xlu0 %v403_v21, 256  ;;  %v64_v21 = vld [vmem:[%s11408_s4 + $0x50] sm:$0xff] }
  0xfc   :  { %v8884_v43 = vpop.f32.mrb[16].mxu0 }
  0xfd   :  { %v8887_v45 = vpop.f32.mrb[17].mxu0 }
  0xff   :  { %419 = vbcast.lane.b32.xlu0 %v417_v23, 256  ;;  %v57_v23 = vld [vmem:[%s11408_s4 + $0x18] sm:$0xff] }
 0x100   :  { %v8889_v46 = vpop.f32.mrb[18].mxu0 }
 0x101   :  { %v8891_v47 = vpop.f32.mrb[19].mxu0 }
 0x103   :  { %426 = vbcast.lane.b32.xlu0 %v424_v26, 256  ;;  %v66_v26 = vld [vmem:[%s11408_s4 + $0x60] sm:$0xff] }
 0x104   :  { %v8893_v48 = vpop.f32.mrb[20].mxu0 }
 0x105   :  { %v8908_v61 = vpop.f32.mrb[21].mxu0 }
 0x107   :  { %440 = vbcast.lane.b32.xlu0 %v438_v27, 256 }
 0x10b   :  { %454 = vbcast.lane.b32.xlu0 %v452_v29, 256  ;;  %v59_v29 = vld [vmem:[%s11408_s4 + $0x28] sm:$0xff] }
 0x10f   :  { %468 = vbcast.lane.b32.xlu0 %v466_v30, 256  ;;  %v67_v30 = vld [vmem:[%s11408_s4 + $0x68] sm:$0xff] }
 0x113   :  { %1515 = vperm.xlu0 %7989, %v55_v16  }
 0x117   :  { %1555 = vperm.xlu0 %7989, %v63_v18   ;;  %v9006_v18 = vrot.slane %v8728_v14, %v8846_v15 }
 0x11b   :  { %1560 = vperm.xlu0 %7989, %v64_v21  }
 0x11f   :  { %1565 = vperm.xlu0 %7989, %v65_v24  }
 0x123   :  { %1570 = vperm.xlu0 %7989, %v66_v26  }
 0x127   :  { %1575 = vperm.xlu0 %7989, %v67_v30  }
 0x12b   :  { %1580 = vperm.xlu0 %7989, %v68_v50  }
 0x159   :  { %v8933_v19 = vpop.permute.xlu0 %363 }
 0x15a   :  { %11514 = vst [vmem:[#allocation7_spill] sm:$0xff] %v8933_v19 }
 0x15d   :  { %v8941_v22 = vpop.permute.xlu0 %370 }
 0x15e   :  { %11515 = vst [vmem:[#allocation8_spill] sm:$0xff] %v8941_v22 }
 0x161   :  { %v8955_v27 = vpop.permute.xlu0 %377 }
 0x162   :  { %11516 = vst [vmem:[#allocation9_spill] sm:$0xff] %v8955_v27 }
 0x1af   :  { %v8874_v39 = vpop.f32.mrb[0].mxu1 }
 0x1b0   :  { %v8878_v41 = vpop.f32.mrb[1].mxu1  ;;  %v649_v59 = vcombine.high %v8874_v39, %v8874_v39  ;;  %v656_v12 = vrot.slane %v8874_v39, %v8982_v62 }
 0x1b1   :  { %976 = vrot.lane.b32.xlu1 %v8878_v41, %s8629_s6  ;;  %v600_v63 = vcombine.high %v8878_v41, %v8878_v41  ;;  %v607_v3 = vrot.slane %v8878_v41, %v8982_v62 }
 0x1b2   :  { %v664_v21 = vcombine.high %v656_v12, %v656_v12  ;;  %v9012_v24 = vrot.slane %v656_v12, %v8982_v62 }
 0x1b3   :  { %v615_v6 = vcombine.high %v607_v3, %v607_v3  ;;  %v623_v16 = vrot.slane %v607_v3, %v8982_v62 }
 0x1b4   :  { %v9039_v3 = vrot.slane %v664_v21, %v8982_v62 }
 0x1b5   :  { %398 = vbcast.lane.b32.xlu1 %v396_v44, 256  ;;  %v8963_v44 = vpop.permute.xlu0 %384  ;;  %v637_v41 = vrot.slane %v615_v6, %v8982_v62  ;;  %v645_v14 = vcombine.high %v623_v16, %v623_v16  ;;  %v899_v8 = vrot.slane %v623_v16, %v8830_v2 }
 0x1b6   :  { %11517 = vst [vmem:[#allocation10_spill] sm:$0xff] %v8963_v44 }
 0x1b7   :  { %v647_v30 = vcombine.high %v637_v41, %v637_v41  ;;  %v907_v21 = vrot.slane %v645_v14, %v8830_v2 }
 0x1b9   :  { %412 = vbcast.lane.b32.xlu1 %v410_v25, 256  ;;  %v58_v25 = vld [vmem:[%s11408_s4 + $0x20] sm:$0xff]  ;;  %v8974_v56 = vpop.permute.xlu0 %391  ;;  %v911_v5 = vrot.slane %v647_v30, %v8830_v2 }
 0x1ba   :  { %11518 = vst [vmem:[#allocation11_spill] sm:$0xff] %v8974_v56  ;;  %v1006_v55 = vmul.f32 %v8995_v10, %v8974_v56 }
 0x1bd   :  { %978 = vrot.lane.b32.xlu1 %v8874_v39, %s8629_s6  ;;  %v8979_v60 = vpop.permute.xlu0 %405  ;;  %v1003_v39 = vmul.f32 %v8995_v10, %v8941_v22 }
 0x1be   :  { %11519 = vst [vmem:[#allocation12_spill] sm:$0xff] %v8979_v60 }
 0x1c1   :  { %433 = vbcast.lane.b32.xlu1 %v431_v49, 256  ;;  %v60_v49 = vld [vmem:[%s11408_s4 + $0x30] sm:$0xff]  ;;  %v8986_v1 = vpop.permute.xlu0 %419 }
 0x1c2   :  { %11521 = vst [vmem:[#allocation14_spill] sm:$0xff] %v8986_v1  ;;  %v9024_v50 = vmul.f32 %v8995_v10, %v8986_v1 }
 0x1c5   :  { %447 = vbcast.lane.b32.xlu1 %v445_v57, 256  ;;  %v69_v57 = vld [vmem:[%s11408_s4 + $0x78] sm:$0xff]  ;;  %v8991_v7 = vpop.permute.xlu0 %426 }
 0x1c6   :  { %11522 = vst [vmem:[#allocation15_spill] sm:$0xff] %v8991_v7  ;;  %v9029_v52 = vmul.f32 %v8995_v10, %v8991_v7 }
 0x1c9   :  { %461 = vbcast.lane.b32.xlu1 %v459_v4, 256  ;;  %v614_v4 = vrot.slane %v600_v63, %v8982_v62  ;;  %v9018_v26 = vpop.permute.xlu0 %440 }
 0x1ca   :  { %11523 = vst [vmem:[#allocation16_spill] sm:$0xff] %v9018_v26 }
 0x1cd   :  { %1510 = vperm.xlu1 %7988, %v54_v13   ;;  %v630_v13 = vrot.slane %v614_v4, %v8982_v62 }
 0x1cf   :  { %v915_v12 = vrot.slane %v630_v13, %v8830_v2 }
 0x1d1   :  { %1520 = vperm.xlu1 %7988, %v56_v17   ;;  %v616_v17 = vcombine.high %v614_v4, %v614_v4  ;;  %v9043_v4 = vmul.f32 %v8995_v10, %v9018_v26 }
 0x1d5   :  { %1550 = vperm.xlu1 %7988, %v62_v20   ;;  %v663_v20 = vrot.slane %v649_v59, %v8982_v62  ;;  %v903_v59 = vrot.slane %v637_v41, %v8830_v2 }
 0x1d7   :  { %v665_v58 = vcombine.high %v663_v20, %v663_v20  ;;  %v9036_v63 = vrot.slane %v663_v20, %v8982_v62 }
 0x1d9   :  { %1525 = vperm.xlu1 %7988, %v57_v23   ;;  %v1002_v23 = vmul.f32 %v8995_v10, %v8933_v19 }
 0x1dd   :  { %1530 = vperm.xlu1 %7988, %v58_v25   ;;  %v1004_v25 = vmul.f32 %v8995_v10, %v8955_v27 }
 0x1e1   :  { %1535 = vperm.xlu1 %7988, %v59_v29   ;;  %v646_v29 = vcombine.high %v630_v13, %v630_v13  ;;  %v693_v13 = vrot.slane %v665_v58, %v8982_v62 }
 0x1e5   :  { %1540 = vperm.xlu1 %7988, %v60_v49   ;;  %v1005_v49 = vmul.f32 %v8995_v10, %v8963_v44 }
 0x1e9   :  { %1545 = vperm.xlu1 %7988, %v61_v51   ;;  %v644_v51 = vrot.slane %v616_v17, %v8982_v62  ;;  %v923_v17 = vrot.slane %v646_v29, %v8830_v2 }
 0x1eb   :  { %v648_v26 = vcombine.high %v644_v51, %v644_v51  ;;  %v919_v20 = vrot.slane %v644_v51, %v8830_v2  ;;  %v697_v51 = vcombine.high %v693_v13, %v693_v13 }
 0x1ed   :  { %1585 = vperm.xlu1 %7988, %v69_v57   ;;  %v1008_v57 = vmul.f32 %v8995_v10, %v8979_v60  ;;  %v9055_v60 = vpop.permute.xlu0 %454 }
 0x1ee   :  { %11524 = vst [vmem:[#allocation17_spill] sm:$0xff] %v9055_v60  ;;  %v1015_v30 = vmul.f32 %v8995_v10, %v9055_v60 }
 0x223   :  { %v977_v15 = vpop.permute.xlu1 %976 }
 0x224   :  { %v983_v7 = vadd.f32 %v977_v15, %v903_v59  ;;  %v986_v1 = vadd.f32 %v977_v15, %v915_v12  ;;  %v988_v6 = vadd.f32 %v977_v15, %v923_v17  ;;  %v982_v41 = vadd.f32 %v977_v15, %v899_v8 }
 0x225   :  { %v984_v29 = vadd.f32 %v977_v15, %v907_v21  ;;  %v985_v56 = vadd.f32 %v977_v15, %v911_v5  ;;  %v987_v8 = vadd.f32 %v977_v15, %v919_v20 }
 0x226   :  { %v1022_v44 = vadd.f32 %v1006_v55, %v986_v1  ;;  %v1024_v16 = vadd.f32 %v1008_v57, %v988_v6  ;;  %v1019_v27 = vadd.f32 %v1003_v39, %v983_v7  ;;  %v1018_v59 = vadd.f32 %v1002_v23, %v982_v41 }
 0x227   :  { %v9059_v14 = vpop.permute.xlu1 %398  ;;  %v1020_v12 = vadd.f32 %v1004_v25, %v984_v29  ;;  %v1021_v17 = vadd.f32 %v1005_v49, %v985_v56  ;;  %v927_v1 = vrot.slane %v648_v26, %v8830_v2  ;;  %v951_v57 = vrot.slane %v693_v13, %v8830_v2 }
 0x228   :  { %v1038_v22 = vadd.f32 %v1022_v44, %v8868_v36  ;;  %v1040_v58 = vadd.f32 %v1024_v16, %v8872_v38  ;;  %v1007_v5 = vmul.f32 %v8995_v10, %v9059_v14  ;;  %v1034_v7 = vadd.f32 %v1018_v59, %v8860_v32  ;;  %v9076_v44 = vpop.permute.xlu0 %468 }
 0x229   :  { %v1035_v39 = vadd.f32 %v8858_v31, %v1019_v27  ;;  %11525 = vst [vmem:[#allocation18_spill] sm:$0xff] %v9076_v44  ;;  %v1036_v38 = vadd.f32 %v1020_v12, %v8864_v34  ;;  %v989_v25 = vadd.f32 %v977_v15, %v927_v1  ;;  %v1037_v31 = vadd.f32 %v8862_v33, %v1021_v17 }
 0x22a   :  { %v9071_v55 = vadd.f32 %v9006_v18, %v1038_v22  ;;  %v9074_v56 = vadd.f32 %v9006_v18, %v1040_v58  ;;  %v1023_v36 = vadd.f32 %v1007_v5, %v987_v8  ;;  %v9082_v26 = vadd.f32 %v9006_v18, %v1034_v7 }
 0x22b   :  { %v9079_v23 = vpop.permute.xlu1 %412  ;;  %v9085_v32 = vadd.f32 %v9006_v18, %v1035_v39  ;;  %v959_v15 = vrot.slane %v697_v51, %v8830_v2  ;;  %v1017_v6 = vmul.f32 %v8995_v10, %v9076_v44  ;;  %v9100_v41 = vadd.f32 %v9006_v18, %v1036_v38 }
 0x22c   :  { %v6690_v22 = vmul.f32 -1.442695, %v9071_v55  ;;  %v6692_v27 = vmul.f32 -1.442695, %v9074_v56  ;;  %v1039_v49 = vadd.f32 %v8866_v35, %v1023_v36  ;;  %v1009_v34 = vmul.f32 %v8995_v10, %v9079_v23 }
 0x22d   :  { %v6686_v20 = vmul.f32 -1.442695, %v9082_v26  ;;  %v6687_v21 = vmul.f32 -1.442695, %v9085_v32  ;;  %v696_v35 = vcombine.high %v9039_v3, %v9039_v3  ;;  %v935_v13 = vrot.slane %v9039_v3, %v8830_v2 }
 0x22e   :  { %8020 = vpow2.f32 %v6690_v22  ;;  %v1025_v33 = vadd.f32 %v1009_v34, %v989_v25  ;;  %v9107_v16 = vadd.f32 %v9006_v18, %v1037_v31  ;;  %v9110_v59 = vadd.f32 %v9006_v18, %v1039_v49 }
 0x22f   :  { %v979_v29 = vpop.permute.xlu1 %978  ;;  %8022 = vpow2.f32 %v6692_v27  ;;  %v11526_v8 = vcombine.high %v9012_v24, %v9012_v24  ;;  %v695_v3 = vcombine.high %v9036_v63, %v9036_v63  ;;  %v6688_v1 = vmul.f32 -1.442695, %v9100_v41 }
 0x230   :  { %v1041_v12 = vadd.f32 %v8870_v37, %v1025_v33  ;;  %v995_v17 = vadd.f32 %v979_v29, %v951_v57  ;;  %v997_v58 = vadd.f32 %v979_v29, %v959_v15  ;;  %8024 = vpow2.f32 %v6686_v20 }
 0x231   :  { %v939_v5 = vrot.slane %v11526_v8, %v8830_v2  ;;  %8026 = vpow2.f32 %v6687_v21  ;;  %v6689_v39 = vmul.f32 -1.442695, %v9107_v16  ;;  %v6691_v37 = vmul.f32 -1.442695, %v9110_v59 }
 0x232   :  { %v1031_v51 = vadd.f32 %v1015_v30, %v995_v17  ;;  %v1033_v7 = vadd.f32 %v1017_v6, %v997_v58  ;;  %8028 = vpow2.f32 %v6688_v1  ;;  %v9125_v38 = vadd.f32 %v9006_v18, %v1041_v12 }
 0x233   :  { %v9121_v36 = vpop.permute.xlu1 %433  ;;  %v11528_v25 = vrot.slane %v9012_v24, %v8830_v2  ;;  %v992_v27 = vadd.f32 %v979_v29, %v939_v5  ;;  %v943_v34 = vrot.slane %v696_v35, %v8830_v2  ;;  %v947_v57 = vrot.slane %v9036_v63, %v8830_v2 }
 0x234   :  { %11527 = vst [vmem:[#allocation19_spill] sm:$0xff] %v9121_v36  ;;  %v1047_v22 = vadd.f32 %v8889_v46, %v1031_v51  ;;  %v1049_v30 = vadd.f32 %v8893_v48, %v1033_v7  ;;  %v1012_v49 = vmul.f32 %v8995_v10, %v9121_v36  ;;  %8030 = vpow2.f32 %v6689_v39 }
 0x235   :  { %v990_v31 = vadd.f32 %v979_v29, %v11528_v25  ;;  %v6693_v15 = vmul.f32 -1.442695, %v9125_v38  ;;  %v955_v46 = vrot.slane %v695_v3, %v8830_v2  ;;  %8032 = vpow2.f32 %v6691_v37 }
 0x236   :  { %v9139_v6 = vadd.f32 %v9006_v18, %v1047_v22  ;;  %v1028_v24 = vadd.f32 %v1012_v49, %v992_v27  ;;  %v991_v33 = vadd.f32 %v979_v29, %v935_v13  ;;  %v993_v21 = vadd.f32 %v979_v29, %v943_v34 }
 0x237   :  { %v9142_v48 = vpop.permute.xlu1 %447  ;;  %8034 = vpow2.f32 %v6693_v15  ;;  %v1026_v20 = vadd.f32 %v9024_v50, %v990_v31  ;;  %v994_v17 = vadd.f32 %v979_v29, %v947_v57  ;;  %v996_v39 = vadd.f32 %v979_v29, %v955_v46 }
 0x238   :  { %11529 = vst [vmem:[#allocation20_spill] sm:$0xff] %v9142_v48  ;;  %v8021_v35 = vpop.eup %8020  ;;  %v6699_v63 = vmul.f32 -1.442695, %v9139_v6  ;;  %v1044_v12 = vadd.f32 %v1028_v24, %v8887_v45  ;;  %v1014_v58 = vmul.f32 %v8995_v10, %v9142_v48  ;;  %v1027_v3 = vadd.f32 %v9029_v52, %v991_v33 }
 0x239   :  { %v1122_v8 = vadd.f32 1.0, %v8021_v35  ;;  %v1042_v5 = vadd.f32 %v1026_v20, %v8882_v42  ;;  %v1029_v1 = vadd.f32 %v9043_v4, %v993_v21  ;;  %v8023_v51 = vpop.eup %8022  ;;  %v9175_v35 = vadd.f32 %v9006_v18, %v1049_v30 }
 0x23a   :  { %v1030_v50 = vadd.f32 %v1014_v58, %v994_v17  ;;  %v8025_v13 = vpop.eup %8024  ;;  %v1043_v45 = vadd.f32 %v8876_v40, %v1027_v3  ;;  %8036 = vpow2.f32 %v6699_v63  ;;  %v1124_v57 = vadd.f32 1.0, %v8023_v51 }
 0x23b   :  { %v9152_v7 = vpop.permute.xlu1 %461  ;;  %v9155_v37 = vadd.f32 %v9006_v18, %v1042_v5  ;;  %v1045_v25 = vadd.f32 %v8884_v43, %v1029_v1  ;;  %v8027_v31 = vpop.eup %8026  ;;  %v1118_v4 = vadd.f32 1.0, %v8025_v13  ;;  %8038 = vrcp.f32 %v1122_v8 }
 0x23c   :  { %11530 = vst [vmem:[#allocation21_spill] sm:$0xff] %v9152_v7  ;;  %v1046_v42 = vadd.f32 %v1030_v50, %v8891_v47  ;;  %v1016_v52 = vmul.f32 %v8995_v10, %v9152_v7  ;;  %v8029_v22 = vpop.eup %8028  ;;  %v1119_v27 = vadd.f32 1.0, %v8027_v31  ;;  %v9164_v49 = vadd.f32 %v9006_v18, %v1043_v45 }
 0x23d   :  { %v6694_v29 = vmul.f32 -1.442695, %v9155_v37  ;;  %8040 = vrcp.f32 %v1118_v4  ;;  %v1120_v40 = vadd.f32 1.0, %v8029_v22  ;;  %v9168_v24 = vadd.f32 %v9006_v18, %v1044_v12 }
 0x23e   :  { %v1032_v34 = vadd.f32 %v1016_v52, %v996_v39  ;;  %v8031_v43 = vpop.eup %8030  ;;  %8042 = vrcp.f32 %v1119_v27  ;;  %v6695_v33 = vmul.f32 -1.442695, %v9164_v49  ;;  %v9172_v21 = vadd.f32 %v9006_v18, %v1045_v25 }
 0x23f   :  { %v8033_v15 = vpop.eup %8032  ;;  %8044 = vrcp.f32 %v1120_v40  ;;  %v1121_v10 = vadd.f32 1.0, %v8031_v43  ;;  %v9181_v12 = vadd.f32 %v9006_v18, %v1046_v42  ;;  %v6696_v58 = vmul.f32 -1.442695, %v9168_v24 }
 0x240   :  { %v1048_v47 = vadd.f32 %v1032_v34, %v8908_v61  ;;  %v1123_v20 = vadd.f32 1.0, %v8033_v15  ;;  %8046 = vpow2.f32 %v6694_v29  ;;  %v6697_v8 = vmul.f32 -1.442695, %v9172_v21 }
 0x241   :  { %v8035_v46 = vpop.eup %8034  ;;  %8048 = vrcp.f32 %v1121_v10  ;;  %v6701_v30 = vmul.f32 -1.442695, %v9175_v35  ;;  %v6698_v1 = vmul.f32 -1.442695, %v9181_v12 }
 0x242   :  { %v9178_v63 = vadd.f32 %v9006_v18, %v1048_v47  ;;  %v1125_v61 = vadd.f32 1.0, %v8035_v46  ;;  %8050 = vrcp.f32 %v1124_v57 }
 0x243   :  { %8052 = vrcp.f32 %v1123_v20 }
 0x244   :  { %v6700_v17 = vmul.f32 -1.442695, %v9178_v63  ;;  %8054 = vpow2.f32 %v6695_v33  ;;  %v8037_v5 = vpop.eup %8036 }
 0x245   :  { %8056 = vrcp.f32 %v1125_v61  ;;  %v8039_v3 = vpop.eup %8038  ;;  %v1131_v15 = vadd.f32 1.0, %v8037_v5 }
 0x246   :  { %8058 = vpow2.f32 %v6700_v17 }
 0x247   :  { %v8041_v51 = vpop.eup %8040  ;;  %8060 = vpow2.f32 %v6696_v58 }
 0x248   :  { %v8043_v18 = vpop.eup %8042  ;;  %v1166_v50 = vmul.f32 %v8041_v51, %v9082_v26  ;;  %8062 = vpow2.f32 %v6697_v8 }
 0x249   :  { %v8045_v13 = vpop.eup %8044  ;;  %8064 = vpow2.f32 %v6701_v30  ;;  %v1167_v39 = vmul.f32 %v8043_v18, %v9085_v32  ;;  %v1170_v32 = vmul.f32 %v8039_v3, %v9071_v55 }
 0x24a   :  { %v8047_v45 = vpop.eup %8046  ;;  %7379 = vmatprep.mubr.msk.f32.mxu1 %vm512_vm5, %v1166_v50  ;;  %v1168_v25 = vmul.f32 %v8045_v13, %v9100_v41  ;;  %8066 = vpow2.f32 %v6698_v1 }
 0x24b   :  { %v8049_v31 = vpop.eup %8048  ;;  %7380 = vmatmul.mubr.msk.f32.vlgmr.msra.gmra.mrb[2].mxu1 %vm512_vm5, %v1167_v39  ;;  %v1126_v42 = vadd.f32 1.0, %v8047_v45 }
 0x24c   :  { %v8051_v52 = vpop.eup %8050  ;;  %7382 = vmatprep.mubr.msk.f32.mxu1 %vm512_vm5, %v1168_v25  ;;  %v1169_v26 = vmul.f32 %v8049_v31, %v9107_v16 }
 0x24d   :  { %v8053_v4 = vpop.eup %8052  ;;  %8068 = vrcp.f32 %v1126_v42  ;;  %v1172_v57 = vmul.f32 %v8051_v52, %v9074_v56 }
 0x24e   :  { %v8055_v22 = vpop.eup %8054  ;;  %v1171_v40 = vmul.f32 %v8053_v4, %v9110_v59 }
 0x24f   :  { %v8057_v27 = vpop.eup %8056  ;;  %7383 = vmatmul.mubr.msk.f32.gmra.mrb[4].mxu1 %vm512_vm5, %v1169_v26  ;;  %v1127_v29 = vadd.f32 1.0, %v8055_v22 }
 0x250   :  { %v8059_v41 = vpop.eup %8058  ;;  %7385 = vmatprep.mubr.msk.f32.mxu1 %vm512_vm5, %v1170_v32  ;;  %v1173_v20 = vmul.f32 %v8057_v27, %v9125_v38  ;;  %v9244_v32 = vrot.slane %v8916_v0, %v8855_v28 }
 0x251   :  { %v8061_v34 = vpop.eup %8060  ;;  %8070 = vrcp.f32 %v1127_v29  ;;  %v1132_v46 = vadd.f32 1.0, %v8059_v41 }
 0x252   :  { %v8063_v43 = vpop.eup %8062  ;;  %v1128_v16 = vadd.f32 1.0, %v8061_v34 }
 0x253   :  { %v8065_v47 = vpop.eup %8064  ;;  %7386 = vmatmul.mubr.msk.f32.gmra.mrb[6].mxu1 %vm512_vm5, %v1171_v40  ;;  %v1129_v55 = vadd.f32 1.0, %v8063_v43  ;;  %v9252_v40 = vpop.permute.xlu1 %1510 }
 0x254   :  { %v8067_v10 = vpop.eup %8066  ;;  %7388 = vmatprep.mubr.msk.f32.mxu1 %vm512_vm5, %v1172_v57  ;;  %8072 = vrcp.f32 %v1128_v16  ;;  %v1133_v61 = vadd.f32 1.0, %v8065_v47  ;;  %11531 = vst [vmem:[#allocation22_spill] sm:$0xff] %v9252_v40 }
 0x255   :  { %8074 = vrcp.f32 %v1129_v55  ;;  %v1130_v33 = vadd.f32 1.0, %v8067_v10 }
 0x256   :  { %8076 = vrcp.f32 %v1131_v15 }
 0x257   :  { %v8069_v59 = vpop.eup %8068  ;;  %7389 = vmatmul.mubr.msk.f32.gmra.mrb[8].mxu1 %vm512_vm5, %v1173_v20  ;;  %8078 = vrcp.f32 %v1130_v33  ;;  %v9264_v20 = vpop.permute.xlu1 %1520 }
 0x258   :  { %8080 = vrcp.f32 %v1132_v46  ;;  %v1174_v56 = vmul.f32 %v8069_v59, %v9155_v37  ;;  %11532 = vst [vmem:[#allocation23_spill] sm:$0xff] %v9264_v20 }
 0x259   :  { %8082 = vrcp.f32 %v1133_v61 }
 0x25a   :  { %7391 = vmatprep.mubr.msk.f32.mxu1 %vm512_vm5, %v1174_v56 }
 0x25b   :  { %v8071_v17 = vpop.eup %8070 }
 0x25c   :  { %v1175_v58 = vmul.f32 %v8071_v17, %v9164_v49 }
 0x25e   :  { %v8073_v8 = vpop.eup %8072  ;;  %7392 = vmatmul.mubr.msk.f32.gmra.mrb[10].mxu1 %vm512_vm5, %v1175_v58 }
 0x25f   :  { %v8075_v38 = vpop.eup %8074  ;;  %v1176_v5 = vmul.f32 %v8073_v8, %v9168_v24 }
 0x260   :  { %v8077_v30 = vpop.eup %8076  ;;  %v1177_v3 = vmul.f32 %v8075_v38, %v9172_v21  ;;  %v483_v21 = vld [vmem:[%s11404_s7 + $0x68] sm:$0xff] }
 0x261   :  { %v8079_v1 = vpop.eup %8078  ;;  %7394 = vmatprep.mubr.msk.f32.mxu1 %vm512_vm5, %v1176_v5  ;;  %v1179_v18 = vmul.f32 %v8077_v30, %v9139_v6  ;;  %v484_v6 = vld [vmem:[%s11404_s7 + $0x70] sm:$0xff]  ;;  %v1778_v13 = vrot.slane %v483_v21, 6 }
 0x262   :  { %v8081_v51 = vpop.eup %8080  ;;  %7395 = vmatmul.mubr.msk.f32.gmra.mrb[12].mxu1 %vm512_vm5, %v1177_v3  ;;  %v1178_v37 = vmul.f32 %v8079_v1, %v9181_v12  ;;  %v1777_v12 = vrot.slane %v8916_v0, 6  ;;  %v1780_v39 = vrot.slane %v484_v6, 6  ;;  %v9280_v3 = vpop.permute.xlu1 %1550 }
 0x263   :  { %v8083_v49 = vpop.eup %8082  ;;  %v1180_v50 = vmul.f32 %v8081_v51, %v9178_v63  ;;  %v485_v63 = vld [vmem:[%s11404_s7 + $0x78] sm:$0xff]  ;;  %11533 = vst [vmem:[#allocation24_spill] sm:$0xff] %v9280_v3 }
 0x264   :  { %7397 = vmatprep.mubr.msk.f32.mxu1 %vm512_vm5, %v1178_v37  ;;  %v1181_v24 = vmul.f32 %v8083_v49, %v9175_v35  ;;  %v9233_v35 = vld [vmem:[%s11404_s7 + $0x80] sm:$0xff]  ;;  %v1782_v45 = vrot.slane %v485_v63, 6  ;;  %v1779_v31 = vsel %vm1776_vm6, %v1777_v12, %v1778_v13  ;;  %v1781_v42 = vsel %vm1776_vm6, %v1778_v13, %v1780_v39 }
 0x265   :  { %v11433_v25 = vrot.slane %v9233_v35, 6  ;;  %v7798_v4 = vpack.c.bf16 %v1781_v42, %v1779_v31 }
 0x266   :  { %7398 = vmatmul.mubr.msk.f32.gmra.mrb[14].mxu1 %vm512_vm5, %v1179_v18  ;;  %v1783_v52 = vsel %vm1776_vm6, %v1780_v39, %v1782_v45  ;;  %v9287_v39 = vpop.permute.xlu1 %1525 }
 0x267   :  { %7400 = vmatprep.mubr.msk.f32.mxu1 %vm512_vm5, %v1180_v50  ;;  %v1785_v26 = vsel %vm1776_vm6, %v1782_v45, %v11433_v25  ;;  %7799 = vmatprep.subr.bf16.mxu0 %v7798_v4  ;;  %11534 = vst [vmem:[#allocation25_spill] sm:$0xff] %v9287_v39 }
 0x268   :  { %v7802_v22 = vpack.c.bf16 %v1785_v26, %v1783_v52  ;;  %7801 = vmatpush3.bf16.msra.mxu0 %v7798_v4 }
 0x26a   :  { %7401 = vmatmul.mubr.msk.f32.gmra.mrb[16].mxu1 %vm512_vm5, %v1181_v24  ;;  %7803 = vmatprep.subr.bf16.mxu0 %v7802_v22 }
 0x26c   :  { %7805 = vmatpush3.bf16.msra.mxu0 %v7802_v22 }
 0x31e   :  { %v7381_v27 = vpop.f32.mrb[2].mxu1 }
 0x31f   :  { %v9247_v29 = vadd.f32 %v7381_v27, %v9244_v32  ;;  %v1317_v41 = vpop.f32.mrb[3].mxu1 }
 0x320   :  { %v9250_v34 = vadd.f32 %v1317_v41, %v9244_v32 }
 0x321   :  { %v6719_v43 = vmul.f32 -1.442695, %v9247_v29 }
 0x322   :  { %v6718_v57 = vmul.f32 -1.442695, %v9250_v34  ;;  %v7384_v15 = vpop.f32.mrb[4].mxu1 }
 0x323   :  { %8084 = vpow2.f32 %v6719_v43  ;;  %v9257_v16 = vadd.f32 %v7384_v15, %v9244_v32  ;;  %v1327_v0 = vpop.f32.mrb[5].mxu1 }
 0x324   :  { %8086 = vpow2.f32 %v6718_v57  ;;  %v9260_v47 = vadd.f32 %v1327_v0, %v9244_v32 }
 0x325   :  { %v6721_v55 = vmul.f32 -1.442695, %v9257_v16 }
 0x326   :  { %v6720_v10 = vmul.f32 -1.442695, %v9260_v47  ;;  %v7387_v46 = vpop.f32.mrb[6].mxu1 }
 0x327   :  { %8088 = vpow2.f32 %v6721_v55  ;;  %v9267_v33 = vadd.f32 %v7387_v46, %v9244_v32  ;;  %v1337_v59 = vpop.f32.mrb[7].mxu1  ;;  %v9301_v55 = vpop.permute.xlu1 %1530 }
 0x328   :  { %8090 = vpow2.f32 %v6720_v10  ;;  %v9270_v61 = vadd.f32 %v1337_v59, %v9244_v32  ;;  %11535 = vst [vmem:[#allocation26_spill] sm:$0xff] %v9301_v55 }
 0x329   :  { %v6723_v56 = vmul.f32 -1.442695, %v9267_v33 }
 0x32a   :  { %v6722_v17 = vmul.f32 -1.442695, %v9270_v61  ;;  %v7390_v58 = vpop.f32.mrb[8].mxu1 }
 0x32b   :  { %8092 = vpow2.f32 %v6723_v56  ;;  %v9275_v8 = vadd.f32 %v7390_v58, %v9244_v32  ;;  %v1347_v38 = vpop.f32.mrb[9].mxu1 }
 0x32c   :  { %8094 = vpow2.f32 %v6722_v17  ;;  %v9278_v5 = vadd.f32 %v1347_v38, %v9244_v32 }
 0x32d   :  { %v8085_v30 = vpop.eup %8084  ;;  %v6725_v1 = vmul.f32 -1.442695, %v9275_v8 }
 0x32e   :  { %v8087_v51 = vpop.eup %8086  ;;  %v1445_v37 = vadd.f32 1.0, %v8085_v30  ;;  %v6724_v18 = vmul.f32 -1.442695, %v9278_v5 }
 0x32f   :  { %v1444_v49 = vadd.f32 1.0, %v8087_v51  ;;  %8096 = vpow2.f32 %v6725_v1 }
 0x330   :  { %8098 = vrcp.f32 %v1445_v37 }
 0x331   :  { %v8089_v50 = vpop.eup %8088  ;;  %8100 = vrcp.f32 %v1444_v49  ;;  %v7393_v24 = vpop.f32.mrb[10].mxu1 }
 0x332   :  { %v8091_v21 = vpop.eup %8090  ;;  %v1447_v6 = vadd.f32 1.0, %v8089_v50  ;;  %8102 = vpow2.f32 %v6724_v18  ;;  %v9285_v12 = vadd.f32 %v7393_v24, %v9244_v32  ;;  %v1357_v63 = vpop.f32.mrb[11].mxu1 }
 0x333   :  { %v1446_v13 = vadd.f32 1.0, %v8091_v21  ;;  %v9290_v45 = vadd.f32 %v1357_v63, %v9244_v32  ;;  %v9312_v18 = vpop.permute.xlu0 %1515 }
 0x334   :  { %8104 = vrcp.f32 %v1447_v6  ;;  %v6727_v31 = vmul.f32 -1.442695, %v9285_v12  ;;  %11536 = vst [vmem:[#allocation27_spill] sm:$0xff] %v9312_v18 }
 0x335   :  { %v8093_v42 = vpop.eup %8092  ;;  %8106 = vrcp.f32 %v1446_v13  ;;  %v6726_v52 = vmul.f32 -1.442695, %v9290_v45  ;;  %v7396_v4 = vpop.f32.mrb[12].mxu1 }
 0x336   :  { %v8095_v26 = vpop.eup %8094  ;;  %v1449_v22 = vadd.f32 1.0, %v8093_v42  ;;  %8108 = vpow2.f32 %v6727_v31  ;;  %v9295_v27 = vadd.f32 %v7396_v4, %v9244_v32  ;;  %v1367_v41 = vpop.f32.mrb[13].mxu1 }
 0x337   :  { %v1448_v43 = vadd.f32 1.0, %v8095_v26  ;;  %8110 = vpow2.f32 %v6726_v52  ;;  %v9298_v57 = vadd.f32 %v1367_v41, %v9244_v32  ;;  %v9323_v4 = vpop.permute.xlu1 %1535 }
 0x338   :  { %8112 = vrcp.f32 %v1449_v22  ;;  %v6729_v15 = vmul.f32 -1.442695, %v9295_v27  ;;  %11537 = vst [vmem:[#allocation28_spill] sm:$0xff] %v9323_v4 }
 0x339   :  { %v8097_v0 = vpop.eup %8096  ;;  %8114 = vrcp.f32 %v1448_v43  ;;  %v6728_v10 = vmul.f32 -1.442695, %v9298_v57  ;;  %v7399_v46 = vpop.f32.mrb[14].mxu1 }
 0x33a   :  { %v8099_v59 = vpop.eup %8098  ;;  %v1451_v56 = vadd.f32 1.0, %v8097_v0  ;;  %8116 = vpow2.f32 %v6729_v15  ;;  %v9305_v17 = vadd.f32 %v7399_v46, %v9244_v32  ;;  %v1377_v58 = vpop.f32.mrb[15].mxu1 }
 0x33b   :  { %v8101_v38 = vpop.eup %8100  ;;  %v1493_v30 = vmul.f32 %v8099_v59, %v9247_v29  ;;  %v9309_v1 = vadd.f32 %v1377_v58, %v9244_v32 }
 0x33c   :  { %v8103_v51 = vpop.eup %8102  ;;  %v1492_v37 = vmul.f32 %v8101_v38, %v9250_v34  ;;  %8118 = vrcp.f32 %v1451_v56  ;;  %v6731_v49 = vmul.f32 -1.442695, %v9305_v17 }
 0x33d   :  { %v1589_v50 = vmul.f32 %v9312_v18, %v1493_v30  ;;  %v1450_v24 = vadd.f32 1.0, %v8103_v51  ;;  %8120 = vpow2.f32 %v6728_v10  ;;  %v6730_v21 = vmul.f32 -1.442695, %v9309_v1  ;;  %v7402_v6 = vpop.f32.mrb[16].mxu1 }
 0x33e   :  { %v8105_v63 = vpop.eup %8104  ;;  %v1588_v29 = vmul.f32 %v9252_v40, %v1492_v37  ;;  %8122 = vpow2.f32 %v6731_v49  ;;  %v9319_v13 = vadd.f32 %v7402_v6, %v9244_v32  ;;  %v1387_v34 = vpop.f32.mrb[17].mxu1 }
 0x33f   :  { %v8107_v31 = vpop.eup %8106  ;;  %v1495_v42 = vmul.f32 %v8105_v63, %v9257_v16  ;;  %v1611_v52 = vsel %vm512_vm5, %v1589_v50, 0.0  ;;  %8124 = vrcp.f32 %v1450_v24  ;;  %v9326_v26 = vadd.f32 %v1387_v34, %v9244_v32 }
 0x340   :  { %v8109_v22 = vpop.eup %8108  ;;  %v1604_v41 = vsel %vm512_vm5, %v1588_v29, 0.0  ;;  %v1494_v43 = vmul.f32 %v8107_v31, %v9260_v47  ;;  %v1612_v15 = vrot.slane %v1611_v52, 4  ;;  %8126 = vpow2.f32 %v6730_v21  ;;  %v9342_v31 = vpop.permute.xlu0 %1555 }
 0x341   :  { %v8111_v0 = vpop.eup %8110  ;;  %v1605_v10 = vrot.slane %v1604_v41, 4  ;;  %v1591_v46 = vmul.f32 %v9287_v39, %v1495_v42  ;;  %v1453_v16 = vadd.f32 1.0, %v8109_v22  ;;  %v9332_v59 = vmul.f32 -1.442695, %v9319_v13  ;;  %11538 = vst [vmem:[#allocation29_spill] sm:$0xff] %v9342_v31 }
 0x342   :  { %v8113_v56 = vpop.eup %8112  ;;  %v1590_v58 = vmul.f32 %v9264_v20, %v1494_v43  ;;  %v1613_v32 = vadd.f32 %v1612_v15, %v1611_v52  ;;  %v1452_v38 = vadd.f32 1.0, %v8111_v0  ;;  %v9336_v30 = vmul.f32 -1.442695, %v9326_v26  ;;  %v9345_v52 = vpop.permute.xlu1 %1540 }
 0x343   :  { %v8115_v51 = vpop.eup %8114  ;;  %v1606_v47 = vadd.f32 %v1605_v10, %v1604_v41  ;;  %v1625_v37 = vsel %vm512_vm5, %v1591_v46, 0.0  ;;  %v1497_v49 = vmul.f32 %v8113_v56, %v9267_v33  ;;  %8128 = vrcp.f32 %v1453_v16  ;;  %11539 = vst [vmem:[#allocation30_spill] sm:$0xff] %v9345_v52 }
 0x344   :  { %v8117_v50 = vpop.eup %8116  ;;  %v1618_v24 = vsel %vm512_vm5, %v1590_v58, 0.0  ;;  %v1626_v21 = vrot.slane %v1625_v37, 4  ;;  %v1496_v6 = vmul.f32 %v8115_v51, %v9270_v61  ;;  %v1614_v63 = vrot.slane %v1613_v32, 2 }
 0x345   :  { %v1607_v29 = vrot.slane %v1606_v47, 2  ;;  %v1619_v34 = vrot.slane %v1618_v24, 4  ;;  %v1593_v42 = vmul.f32 %v9323_v4, %v1497_v49  ;;  %8130 = vrcp.f32 %v1452_v38 }
 0x346   :  { %v8119_v22 = vpop.eup %8118  ;;  %v1627_v41 = vadd.f32 %v1626_v21, %v1625_v37  ;;  %v1615_v33 = vadd.f32 %v1614_v63, %v1613_v32  ;;  %v1592_v43 = vmul.f32 %v9301_v55, %v1496_v6  ;;  %v1455_v15 = vadd.f32 1.0, %v8117_v50 }
 0x347   :  { %v8121_v0 = vpop.eup %8120  ;;  %v1608_v10 = vadd.f32 %v1607_v29, %v1606_v47  ;;  %v1620_v46 = vadd.f32 %v1619_v34, %v1618_v24  ;;  %v1499_v61 = vmul.f32 %v8119_v22, %v9275_v8  ;;  %v1639_v16 = vsel %vm512_vm5, %v1593_v42, 0.0  ;;  %v9352_v34 = vpop.permute.xlu0 %1560 }
 0x348   :  { %v8123_v56 = vpop.eup %8122  ;;  %v1628_v58 = vrot.slane %v1627_v41, 2  ;;  %v1616_v51 = vrot.slane %v1615_v33, 1  ;;  %v1632_v38 = vsel %vm512_vm5, %v1592_v43, 0.0  ;;  %v1640_v49 = vrot.slane %v1639_v16, 4  ;;  %11540 = vst [vmem:[#allocation31_spill] sm:$0xff] %v9352_v34  ;;  %v9354_v22 = vpop.permute.xlu1 %1545 }
 0x349   :  { %v8125_v25 = vpop.eup %8124  ;;  %v1609_v4 = vrot.slane %v1608_v10, 1  ;;  %v1621_v37 = vrot.slane %v1620_v46, 2  ;;  %v1633_v32 = vrot.slane %v1632_v38, 4  ;;  %8132 = vrcp.f32 %v1455_v15  ;;  %11541 = vst [vmem:[#allocation32_spill] sm:$0xff] %v9354_v22 }
 0x34a   :  { %v8127_v21 = vpop.eup %8126  ;;  %v1629_v50 = vadd.f32 %v1628_v58, %v1627_v41  ;;  %v1617_v6 = vadd.f32 %v1616_v51, %v1615_v33  ;;  %v1498_v47 = vmul.f32 %v8125_v25, %v9278_v5  ;;  %v1641_v24 = vadd.f32 %v1640_v49, %v1639_v16 }
 0x34b   :  { %v1610_v8 = vadd.f32 %v1609_v4, %v1608_v10  ;;  %v1622_v63 = vadd.f32 %v1621_v37, %v1620_v46  ;;  %v1634_v29 = vadd.f32 %v1633_v32, %v1632_v38  ;;  %v1454_v42 = vadd.f32 1.0, %v8121_v0 }
 0x34c   :  { %v1630_v43 = vrot.slane %v1629_v50, 1  ;;  %v1642_v55 = vrot.slane %v1641_v24, 2  ;;  %v1594_v15 = vmul.f32 %v9345_v52, %v1498_v47  ;;  %v1595_v41 = vmul.f32 %v9354_v22, %v1499_v61 }
 0x34d   :  { %v8129_v33 = vpop.eup %8128  ;;  %v1623_v25 = vrot.slane %v1622_v63, 1  ;;  %v1635_v5 = vrot.slane %v1634_v29, 2  ;;  %8134 = vrcp.f32 %v1454_v42  ;;  %v1457_v4 = vadd.f32 1.0, %v8123_v56 }
 0x34e   :  { %v1631_v10 = vadd.f32 %v1630_v43, %v1629_v50  ;;  %v1643_v46 = vadd.f32 %v1642_v55, %v1641_v24  ;;  %v1501_v0 = vmul.f32 %v8129_v33, %v9285_v12  ;;  %v1646_v16 = vsel %vm512_vm5, %v1594_v15, 0.0  ;;  %v9363_v55 = vpop.permute.xlu0 %1565 }
 0x34f   :  { %v8131_v58 = vpop.eup %8130  ;;  %v1624_v51 = vadd.f32 %v1623_v25, %v1622_v63  ;;  %v1636_v38 = vadd.f32 %v1635_v5, %v1634_v29  ;;  %v1647_v49 = vrot.slane %v1646_v16, 4  ;;  %v1653_v37 = vsel %vm512_vm5, %v1595_v41, 0.0  ;;  %11542 = vst [vmem:[#allocation33_spill] sm:$0xff] %v9363_v55 }
 0x350   :  { %v1597_v61 = vmul.f32 %v9342_v31, %v1501_v0  ;;  %v1500_v32 = vmul.f32 %v8131_v58, %v9290_v45  ;;  %v1654_v47 = vrot.slane %v1653_v37, 4  ;;  %8136 = vrcp.f32 %v1457_v4 }
 0x351   :  { %v1637_v56 = vrot.slane %v1636_v38, 1  ;;  %v1648_v50 = vadd.f32 %v1647_v49, %v1646_v16  ;;  %v1456_v12 = vadd.f32 1.0, %v8127_v21  ;;  %8138 = vpow2.f32 %v9332_v59 }
 0x352   :  { %v1667_v24 = vsel %vm512_vm5, %v1597_v61, 0.0  ;;  %v1596_v63 = vmul.f32 %v9280_v3, %v1500_v32  ;;  %v1655_v29 = vadd.f32 %v1654_v47, %v1653_v37  ;;  %8140 = vpow2.f32 %v9336_v30  ;;  %v9374_v32 = vpop.permute.xlu0 %1570 }
 0x353   :  { %v8133_v42 = vpop.eup %8132  ;;  %v1638_v43 = vadd.f32 %v1637_v56, %v1636_v38  ;;  %v1668_v45 = vrot.slane %v1667_v24, 4  ;;  %v1649_v15 = vrot.slane %v1648_v50, 2  ;;  %8142 = vrcp.f32 %v1456_v12  ;;  %11543 = vst [vmem:[#allocation34_spill] sm:$0xff] %v9374_v32 }
 0x354   :  { %v1660_v41 = vsel %vm512_vm5, %v1596_v63, 0.0  ;;  %v1503_v33 = vmul.f32 %v8133_v42, %v9295_v27  ;;  %v1644_v21 = vrot.slane %v1643_v46, 1  ;;  %v1656_v25 = vrot.slane %v1655_v29, 2 }
 0x355   :  { %v1669_v59 = vadd.f32 %v1668_v45, %v1667_v24  ;;  %v1661_v5 = vrot.slane %v1660_v41, 4  ;;  %v1650_v4 = vadd.f32 %v1649_v15, %v1648_v50  ;;  %v1732_v0 = vsel %vm331_vm7, %v1617_v6, %v1610_v8 }
 0x356   :  { %v1599_v16 = vmul.f32 %v9363_v55, %v1503_v33  ;;  %v1645_v58 = vadd.f32 %v1644_v21, %v1643_v46  ;;  %v1657_v30 = vadd.f32 %v1656_v25, %v1655_v29  ;;  %v1733_v38 = vsel %vm332_vm8, %v1624_v51, %v1732_v0  ;;  %v487_v51 = vld [vmem:[%s11404_s7 + $0x88] sm:$0xff]  ;;  %v11564_v55 = vld [vmem:[#allocation5_spill] sm:$0xff] }
 0x357   :  { %v8135_v49 = vpop.eup %8134  ;;  %v1670_v37 = vrot.slane %v1669_v59, 2  ;;  %v1662_v61 = vadd.f32 %v1661_v5, %v1660_v41  ;;  %v1651_v47 = vrot.slane %v1650_v4, 1  ;;  %v1734_v27 = vsel %vm334_vm9, %v1631_v10, %v1733_v38 }
 0x358   :  { %v1502_v56 = vmul.f32 %v8135_v49, %v9298_v57  ;;  %v1681_v50 = vsel %vm512_vm5, %v1599_v16, 0.0  ;;  %v1658_v12 = vrot.slane %v1657_v30, 1  ;;  %v1735_v6 = vsel %vm336_vm10, %v1638_v43, %v1734_v27 }
 0x359   :  { %v1671_v8 = vadd.f32 %v1670_v37, %v1669_v59  ;;  %v1663_v46 = vrot.slane %v1662_v61, 2  ;;  %v1682_v24 = vrot.slane %v1681_v50, 4  ;;  %v1652_v63 = vadd.f32 %v1651_v47, %v1650_v4  ;;  %v9388_v37 = vpop.permute.xlu0 %1575 }
 0x35a   :  { %v8137_v29 = vpop.eup %8136  ;;  %v1598_v42 = vmul.f32 %v9352_v34, %v1502_v56  ;;  %v1659_v10 = vadd.f32 %v1658_v12, %v1657_v30  ;;  %v1736_v57 = vsel %vm338_vm11, %v1645_v58, %v1735_v6  ;;  %v1786_v4 = vrot.slane %v487_v51, 6  ;;  %11544 = vst [vmem:[#allocation35_spill] sm:$0xff] %v9388_v37  ;;  %v488_v58 = vld [vmem:[%s11404_s7 + $0x90] sm:$0xff] }
 0x35b   :  { %v8139_v45 = vpop.eup %8138  ;;  %v1672_v15 = vrot.slane %v1671_v8, 1  ;;  %v1664_v41 = vadd.f32 %v1663_v46, %v1662_v61  ;;  %v1683_v33 = vadd.f32 %v1682_v24, %v1681_v50  ;;  %v1505_v43 = vmul.f32 %v8137_v29, %v9305_v17 }
 0x35c   :  { %v8141_v21 = vpop.eup %8140  ;;  %v1674_v25 = vsel %vm512_vm5, %v1598_v42, 0.0  ;;  %v1459_v59 = vadd.f32 1.0, %v8139_v45  ;;  %v1737_v5 = vsel %vm340_vm12, %v1652_v63, %v1736_v57  ;;  %v1788_v46 = vrot.slane %v488_v58, 6  ;;  %v489_v42 = vld [vmem:[%s11404_s7 + $0x98] sm:$0xff] }
 0x35d   :  { %v8143_v0 = vpop.eup %8142  ;;  %v1673_v16 = vadd.f32 %v1672_v15, %v1671_v8  ;;  %v1665_v38 = vrot.slane %v1664_v41, 1  ;;  %v1675_v49 = vrot.slane %v1674_v25, 4  ;;  %v1684_v30 = vrot.slane %v1683_v33, 2  ;;  %v9414_v15 = vld [vmem:[%s11404_s7 + $0xa8] sm:$0xff] }
 0x35e   :  { %v1504_v17 = vmul.f32 %v8143_v0, %v9309_v1  ;;  %8144 = vrcp.f32 %v1459_v59  ;;  %v1458_v61 = vadd.f32 1.0, %v8141_v21  ;;  %v1601_v47 = vmul.f32 %v9388_v37, %v1505_v43  ;;  %v8576_v21 = vld [vmem:[%s11403_s0] sm:$0xff] }
 0x35f   :  { %v1666_v27 = vadd.f32 %v1665_v38, %v1664_v41  ;;  %v1676_v56 = vadd.f32 %v1675_v49, %v1674_v25  ;;  %v1685_v50 = vadd.f32 %v1684_v30, %v1683_v33  ;;  %v1738_v12 = vsel %vm342_vm13, %v1659_v10, %v1737_v5  ;;  %v490_v10 = vld [vmem:[%s11404_s7 + $0xa0] sm:$0xff] }
 0x360   :  { %v1600_v6 = vmul.f32 %v9374_v32, %v1504_v17  ;;  %8146 = vrcp.f32 %v1458_v61  ;;  %v1695_v8 = vsel %vm512_vm5, %v1601_v47, 0.0  ;;  %1746 = vrot.lane.b32.xlu0 %v1738_v12, %s8627_s22  ;;  %v11545_v51 = vrot.slane %v9233_v35, 6 }
 0x361   :  { %v1677_v24 = vrot.slane %v1676_v56, 2  ;;  %v1696_v63 = vrot.slane %v1695_v8, 4  ;;  %v1739_v1 = vsel %vm331_vm7, %v1673_v16, %v1666_v27  ;;  %v1789_v45 = vsel %vm1776_vm6, %v1786_v4, %v1788_v46 }
 0x362   :  { %v1787_v29 = vsel %vm1776_vm6, %v11545_v51, %v1786_v4  ;;  %v1688_v57 = vsel %vm512_vm5, %v1600_v6, 0.0  ;;  %v1686_v43 = vrot.slane %v1685_v50, 1  ;;  %v1790_v59 = vrot.slane %v489_v42, 6  ;;  %v9426_v51 = vpop.permute.xlu1 %1585 }
 0x363   :  { %v1678_v35 = vadd.f32 %v1677_v24, %v1676_v56  ;;  %v1689_v41 = vrot.slane %v1688_v57, 4  ;;  %v1697_v33 = vadd.f32 %v1696_v63, %v1695_v8  ;;  %v7806_v25 = vpack.c.bf16 %v1789_v45, %v1787_v29  ;;  %11546 = vst [vmem:[#allocation36_spill] sm:$0xff] %v9426_v51 }
 0x364   :  { %1752 = vrot.lane.b32.xlu0 %v8576_v21, %s8632_s19  ;;  %v1792_v5 = vrot.slane %v490_v10, 6  ;;  %v1794_v38 = vrot.slane %v9414_v15, 6  ;;  %v1791_v49 = vsel %vm1776_vm6, %v1788_v46, %v1790_v59  ;;  %v1687_v56 = vadd.f32 %v1686_v43, %v1685_v50  ;;  %v9431_v50 = vpop.permute.xlu0 %1580 }
 0x365   :  { %v1679_v4 = vrot.slane %v1678_v35, 1  ;;  %v1690_v0 = vadd.f32 %v1689_v41, %v1688_v57  ;;  %v1698_v16 = vrot.slane %v1697_v33, 2  ;;  %7807 = vmatprep.subr.bf16.mxu0 %v7806_v25  ;;  %11547 = vst [vmem:[#allocation37_spill] sm:$0xff] %v9431_v50 }
 0x366   :  { %v1793_v30 = vsel %vm1776_vm6, %v1790_v59, %v1792_v5  ;;  %7809 = vmatpush3.bf16.msra.mxu0 %v7806_v25  ;;  %v1795_v24 = vsel %vm1776_vm6, %v1792_v5, %v1794_v38 }
 0x367   :  { %v1680_v58 = vadd.f32 %v1679_v4, %v1678_v35  ;;  %v1691_v17 = vrot.slane %v1690_v0, 2  ;;  %v1699_v61 = vadd.f32 %v1698_v16, %v1697_v33  ;;  %v7810_v47 = vpack.c.bf16 %v1793_v30, %v1791_v49 }
 0x368   :  { %v8145_v27 = vpop.eup %8144 }
 0x369   :  { %v1692_v12 = vadd.f32 %v1691_v17, %v1690_v0  ;;  %v1507_v6 = vmul.f32 %v8145_v27, %v9319_v13  ;;  %v1740_v8 = vsel %vm332_vm8, %v1680_v58, %v1739_v1  ;;  %7811 = vmatprep.subr.bf16.mxu0 %v7810_v47  ;;  %v1700_v46 = vrot.slane %v1699_v61, 1 }
 0x36a   :  { %v8147_v63 = vpop.eup %8146  ;;  %v1741_v29 = vsel %vm334_vm9, %v1687_v56, %v1740_v8  ;;  %7813 = vmatpush3.bf16.msra.mxu0 %v7810_v47  ;;  %v8577_v47 = vld [vmem:[%s11403_s0 + $0x8] sm:$0xff] }
 0x36b   :  { %v1693_v42 = vrot.slane %v1692_v12, 1  ;;  %v1603_v10 = vmul.f32 %v9426_v51, %v1507_v6  ;;  %v1506_v57 = vmul.f32 %v8147_v63, %v9326_v26  ;;  %7419 = vmatprep.subr.msk.mxu0 %vm85_vm0, %v1795_v24  ;;  %v1701_v41 = vadd.f32 %v1700_v46, %v1699_v61 }
 0x36d   :  { %v1694_v13 = vadd.f32 %v1693_v42, %v1692_v12  ;;  %v1709_v1 = vsel %vm512_vm5, %v1603_v10, 0.0  ;;  %v1602_v45 = vmul.f32 %v9431_v50, %v1506_v57  ;;  %v493_v42 = vld [vmem:[%s11404_s7 + $0xb8] sm:$0xff]  ;;  %v1907_v10 = vrot.slane %v9414_v15, 3 }
 0x36e   :  { %v1710_v35 = vrot.slane %v1709_v1, 4  ;;  %7420 = vmatpush3.msk.msra.mxu0 %vm85_vm0, %v1795_v24 }
 0x36f   :  { %v1702_v33 = vsel %vm512_vm5, %v1602_v45, 0.0  ;;  %v1742_v43 = vsel %vm336_vm10, %v1694_v13, %v1741_v29  ;;  %v492_v29 = vld [vmem:[%s11404_s7 + $0xb0] sm:$0xff]  ;;  %v1910_v13 = vrot.slane %v493_v42, 3 }
 0x370   :  { %v1711_v21 = vadd.f32 %v1710_v35, %v1709_v1  ;;  %v1703_v26 = vrot.slane %v1702_v33, 4  ;;  %v1743_v25 = vsel %vm338_vm11, %v1701_v41, %v1742_v43  ;;  %v1908_v57 = vrot.slane %v492_v29, 3  ;;  %v494_v41 = vld [vmem:[%s11404_s7 + $0xc0] sm:$0xff]  ;;  %v6741_v42 = vld [vmem:[%s11404_s7 + $0xd0] sm:$0xff] }
 0x371   :  { %v1912_v43 = vrot.slane %v494_v41, 3 }
 0x372   :  { %v1712_v59 = vrot.slane %v1711_v21, 2  ;;  %v1704_v5 = vadd.f32 %v1703_v26, %v1702_v33  ;;  %v1909_v1 = vsel %vm1906_vm1, %v1907_v10, %v1908_v57  ;;  %v1911_v45 = vsel %vm1906_vm1, %v1908_v57, %v1910_v13  ;;  %v9476_v33 = vld [vmem:[%s11404_s7 + $0xc8] sm:$0xf] }
 0x373   :  { %v7814_v35 = vpack.c.bf16 %v1911_v45, %v1909_v1  ;;  %v1913_v26 = vsel %vm1906_vm1, %v1910_v13, %v1912_v43  ;;  %v6743_v1 = vld [vmem:[%s11404_s7 + $0xe0] sm:$0xff]  ;;  %v6744_v45 = vld [vmem:[%s11404_s7 + $0xe8] sm:$0xff] }
 0x374   :  { %v1705_v4 = vrot.slane %v1704_v5, 2  ;;  %v1713_v0 = vadd.f32 %v1712_v59, %v1711_v21  ;;  %v1914_v21 = vrot.slane %v9476_v33, 3 }
 0x375   :  { %7815 = vmatprep.subr.bf16.mxu0 %v7814_v35 }
 0x376   :  { %v1706_v16 = vadd.f32 %v1705_v4, %v1704_v5  ;;  %v1714_v38 = vrot.slane %v1713_v0, 1  ;;  %v6745_v5 = vld [vmem:[%s11404_s7 + $0xf0] sm:$0xff]  ;;  %v6746_v4 = vld [vmem:[%s11404_s7 + $0xf8] sm:$0xff] }
 0x378   :  { %v1707_v49 = vrot.slane %v1706_v16, 1  ;;  %v1715_v58 = vadd.f32 %v1714_v38, %v1713_v0  ;;  %v6747_v0 = vld [vmem:[%s11404_s7 + $0x100] sm:$0xff]  ;;  %v6748_v38 = vld [vmem:[%s11404_s7 + $0x108] sm:$0xff] }
 0x37a   :  { %v1708_v30 = vadd.f32 %v1707_v49, %v1706_v16  ;;  %v7990_v16 = vpack.i.bf16 %v6746_v4, %v6745_v5  ;;  %v7995_v49 = vpack.i.bf16 %v6748_v38, %v6747_v0 }
 0x37c   :  { %v1744_v17 = vsel %vm340_vm12, %v1708_v30, %v1743_v25  ;;  %v1915_v25 = vsel %vm1906_vm1, %v1912_v43, %v1914_v21  ;;  %7991 = vrot.lane.b32.xlu0 %v7990_v16, %s8627_s22  ;;  %v1766_v30 = vrot.slane %v9414_v15, %v8838_v9  ;;  %v6742_v15 = vld [vmem:[%s11404_s7 + $0xd8] sm:$0xff] }
 0x37d   :  { %v1745_v61 = vsel %vm342_vm13, %v1715_v58, %v1744_v17  ;;  %v7818_v59 = vpack.c.bf16 %v1915_v25, %v1913_v26 }
 0x37e   :  { %1748 = vrot.lane.b32.xlu1 %v1745_v61, %s8627_s22 }
 0x382   :  { %1754 = vrot.lane.b32.xlu1 %v8577_v47, %s8632_s19 }
 0x386   :  { %7996 = vrot.lane.b32.xlu1 %v7995_v49, %s8627_s22  ;;  %v8578_v49 = vld [vmem:[%s11406_s3] sm:$0xff] }
 0x3d2   :  { %v1747_v27 = vpop.permute.xlu0 %1746 }
 0x3d3   :  { %v1758_v56 = vsel %vm512_vm5, %v8818_v53, %v1747_v27 }
 0x3d6   :  { %v9449_v12 = vpop.permute.xlu0 %1752 }
 0x3d7   :  { %11548 = vst [vmem:[#allocation38_spill] sm:$0xff] %v9449_v12  ;;  %v1761_v6 = vsel %vm1760_vm14, %v1758_v56, %v9449_v12  ;;  %v11558_v12 = vld [vmem:[#allocation11_spill] sm:$0xff] }
 0x3d8   :  { %7421 = vmatprep.mubr.msk.f32.mxu0 %vm1804_vm15, %v1761_v6 }
 0x3ee   :  { %v7992_v29 = vpop.permute.xlu0 %7991 }
 0x3ef   :  { %v7994_v10 = vunpack.i.h.bf16 %v7992_v29  ;;  %v7993_v57 = vunpack.i.l.bf16 %v7992_v29  ;;  %v8588_v29 = vld [vmem:[%s11406_s3 + $0x50] sm:$0xff] }
 0x3f0   :  { %v1749_v8 = vpop.permute.xlu1 %1748 }
 0x3f1   :  { %v1759_v24 = vsel %vm512_vm5, %v8820_v54, %v1749_v8  ;;  %v2052_v43 = vsel %vm512_vm5, %v6741_v42, %v7993_v57  ;;  %v2053_v21 = vsel %vm512_vm5, %v6742_v15, %v7994_v10  ;;  %v8589_v42 = vld [vmem:[%s11406_s3 + $0x58] sm:$0xff]  ;;  %v8590_v15 = vld [vmem:[%s11406_s3 + $0x60] sm:$0xff]  ;;  %v8591_v10 = vld [vmem:[%s11406_s3 + $0x68] sm:$0xff] }
 0x3f2   :  { %v7822_v26 = vpack.c.bf16 %v2053_v21, %v2052_v43  ;;  %v8592_v57 = vld [vmem:[%s11406_s3 + $0x70] sm:$0xff] }
 0x3f4   :  { %v9456_v63 = vpop.permute.xlu1 %1754  ;;  %7823 = vmatprep.subr.bf16.mxu1 %v7822_v26 }
 0x3f5   :  { %11549 = vst [vmem:[#allocation39_spill] sm:$0xff] %v9456_v63  ;;  %v1762_v46 = vsel %vm1760_vm14, %v1759_v24, %v9456_v63  ;;  %7825 = vmatpush3.bf16.msra.mxu1 %v7822_v26  ;;  %v11556_v63 = vld [vmem:[#allocation9_spill] sm:$0xff] }
 0x3f6   :  { %7422 = vmatmul.mubr.msk.f32.vlgmr.msra.gmra.mrb[22].mxu0 %vm1804_vm15, %v1762_v46 }
 0x3f7   :  { %7817 = vmatpush3.bf16.msra.mxu0 %v7814_v35 }
 0x3f8   :  { %7819 = vmatprep.subr.bf16.mxu0 %v7818_v59  ;;  %v7997_v13 = vpop.permute.xlu1 %7996 }
 0x3f9   :  { %v7999_v35 = vunpack.i.h.bf16 %v7997_v13  ;;  %v7998_v41 = vunpack.i.l.bf16 %v7997_v13  ;;  %v8593_v13 = vld [vmem:[%s11406_s3 + $0x78] sm:$0xff] }
 0x3fb   :  { %7821 = vmatpush3.bf16.msra.mxu0 %v7818_v59  ;;  %v2054_v25 = vsel %vm512_vm5, %v6743_v1, %v7998_v41  ;;  %v2055_v59 = vsel %vm512_vm5, %v6744_v45, %v7999_v35  ;;  %v2006_v45 = vrot.slane %v9476_v33, %v8842_v11 }
 0x3fc   :  { %v7826_v5 = vpack.c.bf16 %v2055_v59, %v2054_v25 }
 0x3fe   :  { %7827 = vmatprep.subr.bf16.mxu1 %v7826_v5 }
 0x3ff   :  { %7829 = vmatpush3.bf16.msra.mxu1 %v7826_v5 }
 0x4c9   :  { %v7423_v58 = vpop.f32.mrb[22].mxu0 }
 0x4ca   :  { %v1885_v17 = vadd.f32 %v7423_v58, %v1766_v30  ;;  %v1879_v61 = vpop.f32.mrb[23].mxu0 }
 0x4cb   :  { %v1880_v47 = vadd.f32 %v1879_v61, %v1766_v30  ;;  %v9522_v30 = vld [vmem:[%s11404_s7 + $0x110] sm:$0xff] }
 0x4cc   :  { %v6738_v27 = vmul.f32 -1.442695, %v1885_v17  ;;  %v2238_v58 = vrot.slane %v9522_v30, 1  ;;  %v8580_v61 = vld [vmem:[%s11406_s3 + $0x10] sm:$0xff] }
 0x4cd   :  { %v6737_v56 = vmul.f32 -1.442695, %v1880_v47 }
 0x4ce   :  { %8148 = vpow2.f32 %v6738_v27  ;;  %7446 = vmatprep.subr.msk.mxu0 %vm748_vm4, %v2238_v58  ;;  %v8582_v27 = vld [vmem:[%s11406_s3 + $0x20] sm:$0xff] }
 0x4cf   :  { %8150 = vpow2.f32 %v6737_v56  ;;  %v8583_v56 = vld [vmem:[%s11406_s3 + $0x28] sm:$0xff] }
 0x4d8   :  { %v8149_v6 = vpop.eup %8148 }
 0x4d9   :  { %v8151_v8 = vpop.eup %8150  ;;  %v1895_v24 = vadd.f32 1.0, %v8149_v6  ;;  %v8584_v6 = vld [vmem:[%s11406_s3 + $0x30] sm:$0xff] }
 0x4da   :  { %v1894_v46 = vadd.f32 1.0, %v8151_v8  ;;  %v8585_v8 = vld [vmem:[%s11406_s3 + $0x38] sm:$0xff] }
 0x4db   :  { %8152 = vrcp.f32 %v1895_v24  ;;  %v8586_v24 = vld [vmem:[%s11406_s3 + $0x40] sm:$0xff] }
 0x4dc   :  { %8154 = vrcp.f32 %v1894_v46  ;;  %v8587_v46 = vld [vmem:[%s11406_s3 + $0x48] sm:$0xff] }
 0x4e5   :  { %v8153_v4 = vpop.eup %8152 }
 0x4e6   :  { %v8155_v0 = vpop.eup %8154  ;;  %v1901_v38 = vmul.f32 %v8153_v4, %v1885_v17  ;;  %v8579_v17 = vld [vmem:[%s11406_s3 + $0x8] sm:$0xff] }
 0x4e7   :  { %v1900_v16 = vmul.f32 %v8155_v0, %v1880_v47  ;;  %v8581_v47 = vld [vmem:[%s11406_s3 + $0x18] sm:$0xff] }
 0x4e9   :  { %7432 = vmatprep.mubr.msk.f32.mxu0 %vm512_vm5, %v1900_v16 }
 0x4ea   :  { %7433 = vmatmul.mubr.msk.f32.vlgmr.msra.gmra.mrb[24].mxu0 %vm512_vm5, %v1901_v38 }
 0x4eb   :  { %7448 = vmatprep.mubr.msk.f32.mxu0 %vm164_vm3, %v8578_v49  ;;  %7447 = vmatpush3.msk.msra.mxu0 %vm748_vm4, %v2238_v58 }
 0x4ee   :  { %7449 = vmatmul.mubr.msk.f32.vlgmr.msra.gmra.mrb[26].mxu0 %vm164_vm3, %v8579_v17 }
 0x4ef   :  { %7451 = vmatprep.mubr.msk.f32.mxu0 %vm164_vm3, %v8580_v61 }
 0x4f2   :  { %7452 = vmatmul.mubr.msk.f32.gmra.mrb[28].mxu0 %vm164_vm3, %v8581_v47 }
 0x4f3   :  { %7454 = vmatprep.mubr.msk.f32.mxu0 %vm164_vm3, %v8582_v27 }
 0x4f6   :  { %7455 = vmatmul.mubr.msk.f32.gmra.mrb[30].mxu0 %vm164_vm3, %v8583_v56 }
 0x4f7   :  { %7457 = vmatprep.mubr.msk.f32.mxu0 %vm164_vm3, %v8584_v6 }
 0x4fa   :  { %7458 = vmatmul.mubr.msk.f32.gmra.mrb[32].mxu0 %vm164_vm3, %v8585_v8  ;;  %v6750_v8 = vld [vmem:[%s11404_s7 + $0x118] sm:$0xff] }
 0x4fb   :  { %7460 = vmatprep.mubr.msk.f32.mxu0 %vm164_vm3, %v8586_v24  ;;  %v6751_v24 = vld [vmem:[%s11404_s7 + $0x120] sm:$0xff] }
 0x4fe   :  { %7461 = vmatmul.mubr.msk.f32.gmra.mrb[34].mxu0 %vm164_vm3, %v8587_v46  ;;  %v2680_v46 = vrot.slane %v9522_v30, 5 }
 0x4ff   :  { %7463 = vmatprep.mubr.msk.f32.mxu0 %vm164_vm3, %v8588_v29  ;;  %v2681_v29 = vrot.slane %v6750_v8, 5 }
 0x502   :  { %7464 = vmatmul.mubr.msk.f32.gmra.mrb[36].mxu0 %vm164_vm3, %v8589_v42  ;;  %v2683_v42 = vrot.slane %v6751_v24, 5 }
 0x503   :  { %7466 = vmatprep.mubr.msk.f32.mxu0 %vm164_vm3, %v8590_v15  ;;  %v2682_v15 = vsel %vm748_vm4, %v2680_v46, %v2681_v29 }
 0x506   :  { %7467 = vmatmul.mubr.msk.f32.gmra.mrb[38].mxu0 %vm164_vm3, %v8591_v10  ;;  %v2684_v10 = vsel %vm748_vm4, %v2681_v29, %v2683_v42 }
 0x507   :  { %7469 = vmatprep.mubr.msk.f32.mxu0 %vm164_vm3, %v8592_v57  ;;  %v7830_v57 = vpack.c.bf16 %v2684_v10, %v2682_v15  ;;  %v9657_v10 = vrot.slane %v9522_v30, %v8830_v2 }
 0x509   :  { %7831 = vmatprep.subr.bf16.mxu1 %v7830_v57  ;;  %v2506_v3 = vmul.f32 %v9657_v10, %v9152_v7 }
 0x50a   :  { %7470 = vmatmul.mubr.msk.f32.gmra.mrb[40].mxu0 %vm164_vm3, %v8593_v13  ;;  %v6752_v13 = vld [vmem:[%s11404_s7 + $0x128] sm:$0xff] }
 0x5bd   :  { %v7434_v1 = vpop.f32.mrb[24].mxu0 }
 0x5be   :  { %v2002_v35 = vadd.f32 %v7434_v1, %v8820_v54  ;;  %v1992_v41 = vpop.f32.mrb[25].mxu0  ;;  %v9648_v1 = vld [vmem:[%s11404_s7 + $0x130] sm:$0xff] }
 0x5bf   :  { %v2001_v43 = vadd.f32 %v1992_v41, %v8818_v53  ;;  %11554 = vst [vmem:[#allocation44_spill] sm:$0xff] %v9648_v1 }
 0x5c0   :  { %v9593_v26 = vadd.f32 %v2006_v45, %v2002_v35  ;;  %v2687_v35 = vrot.slane %v9648_v1, 5 }
 0x5c1   :  { %v9591_v21 = vadd.f32 %v2006_v45, %v2001_v43  ;;  %v9599_v25 = vpop.f32.mrb[26].mxu0  ;;  %v2685_v45 = vrot.slane %v6752_v13, 5 }
 0x5c2   :  { %11551 = vst [vmem:[#allocation41_spill] sm:$0xff] %v9593_v26  ;;  %v9601_v59 = vpop.f32.mrb[27].mxu0 }
 0x5c3   :  { %11550 = vst [vmem:[#allocation40_spill] sm:$0xff] %v9591_v21  ;;  %7443 = vmatprep.mubr.msk.f32.mxu1 %vm512_vm5, %v9591_v21  ;;  %v2686_v41 = vsel %vm748_vm4, %v2683_v42, %v2685_v45  ;;  %v2688_v43 = vsel %vm748_vm4, %v2685_v45, %v2687_v35  ;;  %v2492_v45 = vmul.f32 %v9657_v10, %v8933_v19 }
 0x5c4   :  { %7444 = vmatmul.mubr.msk.f32.vlgmr.msra.gmra.mrb[18].mxu1 %vm512_vm5, %v9593_v26  ;;  %v7834_v8 = vpack.c.bf16 %v2688_v43, %v2686_v41  ;;  %v11555_v43 = vld [vmem:[#allocation8_spill] sm:$0xff]  ;;  %v11557_v26 = vld [vmem:[#allocation10_spill] sm:$0xff]  ;;  %v9675_v19 = vmul.f32 %v9657_v10, %v11558_v12 }
 0x5c5   :  { %v9603_v33 = vpop.f32.mrb[28].mxu0  ;;  %7833 = vmatpush3.bf16.msra.mxu1 %v7830_v57  ;;  %v11562_v12 = vld [vmem:[#allocation16_spill] sm:$0xff] }
 0x5c6   :  { %v9605_v54 = vpop.f32.mrb[29].mxu0  ;;  %7835 = vmatprep.subr.bf16.mxu1 %v7834_v8  ;;  %v9697_v51 = vmul.f32 %v9657_v10, %v11562_v12  ;;  %v2507_v12 = vmul.f32 %v9657_v10, %v9076_v44 }
 0x5c8   :  { %11563 = vst [vmem:[#allocation45_spill] sm:$0xff] %v9697_v51 }
 0x5c9   :  { %v9607_v5 = vpop.f32.mrb[30].mxu0  ;;  %7837 = vmatpush3.bf16.msra.mxu1 %v7834_v8 }
 0x5ca   :  { %v9609_v53 = vpop.f32.mrb[31].mxu0 }
 0x5cd   :  { %v9611_v4 = vpop.f32.mrb[32].mxu0 }
 0x5ce   :  { %v9613_v0 = vpop.f32.mrb[33].mxu0 }
 0x5d1   :  { %v9615_v16 = vpop.f32.mrb[34].mxu0 }
 0x5d2   :  { %v9617_v38 = vpop.f32.mrb[35].mxu0 }
 0x5d5   :  { %v9619_v49 = vpop.f32.mrb[36].mxu0 }
 0x5d6   :  { %11552 = vst [vmem:[#allocation42_spill] sm:$0xff] %v9619_v49  ;;  %v9621_v58 = vpop.f32.mrb[37].mxu0 }
 0x5d7   :  { %11553 = vst [vmem:[#allocation43_spill] sm:$0xff] %v9621_v58 }
 0x5d9   :  { %v9623_v17 = vpop.f32.mrb[38].mxu0 }
 0x5da   :  { %v9625_v61 = vpop.f32.mrb[39].mxu0 }
 0x5dd   :  { %v9627_v47 = vpop.f32.mrb[40].mxu0 }
 0x5de   :  { %v9629_v27 = vpop.f32.mrb[41].mxu0 }
 0x697   :  { %v7445_v56 = vpop.f32.mrb[18].mxu1 }
 0x698   :  { %2468 = vrot.lane.b32.xlu1 %v7445_v56, %s8629_s6  ;;  %v2128_v6 = vpop.f32.mrb[19].mxu1  ;;  %v2188_v24 = vcombine.high %v7445_v56, %v7445_v56  ;;  %v2195_v42 = vrot.slane %v7445_v56, %v8982_v62  ;;  %v2495_v56 = vmul.f32 %v9657_v10, %v11557_v26  ;;  %v11561_v26 = vld [vmem:[#allocation15_spill] sm:$0xff] }
 0x699   :  { %2466 = vrot.lane.b32.xlu0 %v2128_v6, %s8629_s6  ;;  %v2139_v29 = vcombine.high %v2128_v6, %v2128_v6  ;;  %v2146_v15 = vrot.slane %v2128_v6, %v8982_v62  ;;  %v2493_v6 = vmul.f32 %v9657_v10, %v11555_v43  ;;  %v11560_v43 = vld [vmem:[#allocation14_spill] sm:$0xff]  ;;  %v9693_v50 = vmul.f32 %v9657_v10, %v11561_v26 }
 0x69a   :  { %v2202_v46 = vrot.slane %v2188_v24, %v8982_v62  ;;  %v9683_v21 = vmul.f32 %v9657_v10, %v11560_v43  ;;  %v2504_v26 = vmul.f32 %v9657_v10, %v9142_v48 }
 0x69b   :  { %v2153_v57 = vrot.slane %v2139_v29, %v8982_v62  ;;  %v2154_v11 = vcombine.high %v2146_v15, %v2146_v15  ;;  %v2162_v24 = vrot.slane %v2146_v15, %v8982_v62  ;;  %v2494_v29 = vmul.f32 %v9657_v10, %v11556_v63 }
 0x69c   :  { %v2204_v13 = vcombine.high %v2202_v46, %v2202_v46  ;;  %v2218_v35 = vrot.slane %v2202_v46, %v8982_v62  ;;  %v11559_v46 = vld [vmem:[#allocation12_spill] sm:$0xff]  ;;  %v2203_v15 = vcombine.high %v2195_v42, %v2195_v42 }
 0x69d   :  { %v2155_v8 = vcombine.high %v2153_v57, %v2153_v57  ;;  %v2176_v9 = vrot.slane %v2154_v11, %v8982_v62  ;;  %v9686_v11 = vrot.slane %v2195_v42, %v8982_v62  ;;  %v9689_v63 = vrot.slane %v2153_v57, %v8982_v62 }
 0x69e   :  { %v2232_v41 = vrot.slane %v2204_v13, %v8982_v62  ;;  %v9679_v13 = vmul.f32 %v9657_v10, %v11559_v46  ;;  %v2234_v32 = vcombine.high %v2218_v35, %v2218_v35  ;;  %v2184_v37 = vcombine.high %v2162_v24, %v2162_v24 }
 0x69f   :  { %v2183_v43 = vrot.slane %v2155_v8, %v8982_v62  ;;  %v2186_v34 = vcombine.high %v2176_v9, %v2176_v9  ;;  %v2505_v42 = vmul.f32 %v9657_v10, %v9055_v60  ;;  %v9704_v57 = vrot.slane %v9522_v30, %v11564_v55 }
 0x6a0   :  { %v2236_v46 = vcombine.high %v2232_v41, %v2232_v41  ;;  %v9713_v8 = vrot.slane %v2203_v15, %v8982_v62  ;;  %v2233_v31 = vcombine.high %v9686_v11, %v9686_v11  ;;  %v2185_v60 = vcombine.high %v9689_v63, %v9689_v63 }
 0x6a1   :  { %v2389_v30 = vrot.slane %v2162_v24, %v8830_v2  ;;  %v2441_v55 = vrot.slane %v2232_v41, %v8830_v2  ;;  %v2437_v48 = vrot.slane %v2218_v35, %v8830_v2  ;;  %v2445_v52 = vrot.slane %v2234_v32, %v8830_v2 }
 0x6a2   :  { %v2449_v44 = vrot.slane %v2236_v46, %v8830_v2  ;;  %v2187_v7 = vcombine.high %v2183_v43, %v2183_v43  ;;  %v2393_v15 = vrot.slane %v2176_v9, %v8830_v2  ;;  %v2397_v62 = vrot.slane %v2184_v37, %v8830_v2 }
 0x6a3   :  { %v2401_v22 = vrot.slane %v2186_v34, %v8830_v2 }
 0x70a   :  { %v9727_v20 = vpop.permute.xlu1 %2468 }
 0x70b   :  { %v2485_v39 = vadd.f32 %v9727_v20, %v2441_v55  ;;  %v2467_v24 = vpop.permute.xlu0 %2466  ;;  %v2484_v41 = vadd.f32 %v9727_v20, %v2437_v48  ;;  %v2487_v35 = vadd.f32 %v9727_v20, %v2449_v44  ;;  %v2486_v46 = vadd.f32 %v9727_v20, %v2445_v52 }
 0x70c   :  { %v2473_v40 = vadd.f32 %v2467_v24, %v2393_v15  ;;  %v2472_v32 = vadd.f32 %v2467_v24, %v2389_v30  ;;  %v2474_v18 = vadd.f32 %v2467_v24, %v2397_v62  ;;  %v2475_v28 = vadd.f32 %v2467_v24, %v2401_v22 }
 0x70d   :  { %v2521_v9 = vadd.f32 %v2505_v42, %v2485_v39  ;;  %v2520_v1 = vadd.f32 %v2504_v26, %v2484_v41  ;;  %v2523_v37 = vadd.f32 %v2507_v12, %v2487_v35  ;;  %v2522_v49 = vadd.f32 %v2506_v3, %v2486_v46 }
 0x70e   :  { %v2508_v34 = vadd.f32 %v2492_v45, %v2472_v32  ;;  %v2509_v58 = vadd.f32 %v2493_v6, %v2473_v40  ;;  %v2510_v51 = vadd.f32 %v2494_v29, %v2474_v18  ;;  %v2511_v36 = vadd.f32 %v2495_v56, %v2475_v28 }
 0x70f   :  { %v2537_v55 = vadd.f32 %v9623_v17, %v2521_v9  ;;  %v2536_v48 = vadd.f32 %v2520_v1, %v9625_v61  ;;  %v9736_v44 = vadd.f32 %v9627_v47, %v2523_v37  ;;  %v9739_v52 = vadd.f32 %v2522_v49, %v9629_v27  ;;  %v11565_v37 = vld [vmem:[#allocation19_spill] sm:$0xff] }
 0x710   :  { %v2524_v62 = vadd.f32 %v2508_v34, %v9601_v59  ;;  %v2525_v39 = vadd.f32 %v9599_v25, %v2509_v58  ;;  %v2526_v3 = vadd.f32 %v2510_v51, %v9605_v54  ;;  %v2527_v40 = vadd.f32 %v9603_v33, %v2511_v36 }
 0x711   :  { %v2497_v28 = vmul.f32 %v9657_v10, %v9059_v14  ;;  %v2499_v18 = vmul.f32 %v9657_v10, %v9079_v23  ;;  %v2235_v22 = vcombine.high %v9713_v8, %v9713_v8  ;;  %v2405_v12 = vrot.slane %v9689_v63, %v8830_v2 }
 0x712   :  { %v2421_v26 = vrot.slane %v9686_v11, %v8830_v2  ;;  %v2409_v25 = vrot.slane %v2183_v43, %v8830_v2  ;;  %v9757_v51 = vadd.f32 %v9704_v57, %v2524_v62  ;;  %v9760_v36 = vadd.f32 %v9704_v57, %v2525_v39 }
 0x713   :  { %v2425_v59 = vrot.slane %v9713_v8, %v8830_v2  ;;  %v2429_v33 = vrot.slane %v2233_v31, %v8830_v2  ;;  %v9766_v54 = vadd.f32 %v9704_v57, %v2526_v3  ;;  %v2476_v63 = vadd.f32 %v2467_v24, %v2405_v12  ;;  %v11566_v3 = vld [vmem:[#allocation45_spill] sm:$0xff] }
 0x714   :  { %v2413_v49 = vrot.slane %v2185_v60, %v8830_v2  ;;  %v2417_v58 = vrot.slane %v2187_v7, %v8830_v2  ;;  %v9771_v17 = vadd.f32 %v9704_v57, %v2527_v40  ;;  %v2477_v61 = vadd.f32 %v2467_v24, %v2409_v25 }
 0x715   :  { %v2433_v47 = vrot.slane %v2235_v22, %v8830_v2  ;;  %v9775_v27 = vadd.f32 %v9704_v57, %v2537_v55  ;;  %v6786_v1 = vmul.f32 -1.442695, %v9757_v51  ;;  %v2512_v31 = vadd.f32 %v9675_v19, %v2476_v63 }
 0x716   :  { %v6787_v45 = vmul.f32 -1.442695, %v9760_v36  ;;  %v2513_v43 = vadd.f32 %v2497_v28, %v2477_v61  ;;  %v2478_v6 = vadd.f32 %v2467_v24, %v2413_v49  ;;  %v2479_v60 = vadd.f32 %v2467_v24, %v2417_v58 }
 0x717   :  { %v6788_v7 = vmul.f32 -1.442695, %v9766_v54  ;;  %v2528_v29 = vadd.f32 %v2512_v31, %v9609_v53  ;;  %v2480_v56 = vadd.f32 %v9727_v20, %v2421_v26  ;;  %v2481_v11 = vadd.f32 %v9727_v20, %v2425_v59 }
 0x718   :  { %v6789_v42 = vmul.f32 -1.442695, %v9771_v17  ;;  %v2529_v8 = vadd.f32 %v9607_v5, %v2513_v43  ;;  %v2514_v30 = vadd.f32 %v9679_v13, %v2478_v6  ;;  %v2515_v19 = vadd.f32 %v2499_v18, %v2479_v60  ;;  %v11568_v18 = vld [vmem:[#allocation42_spill] sm:$0xff] }
 0x719   :  { %8156 = vpow2.f32 %v6786_v1  ;;  %v9788_v15 = vadd.f32 %v9704_v57, %v2528_v29  ;;  %v2516_v24 = vadd.f32 %v9683_v21, %v2480_v56  ;;  %v2517_v41 = vadd.f32 %v9693_v50, %v2481_v11 }
 0x71a   :  { %8158 = vpow2.f32 %v6787_v45  ;;  %v9793_v53 = vadd.f32 %v9704_v57, %v2529_v8  ;;  %v2530_v35 = vadd.f32 %v2514_v30, %v9613_v0  ;;  %v2531_v46 = vadd.f32 %v9611_v4, %v2515_v19 }
 0x71b   :  { %8160 = vpow2.f32 %v6788_v7  ;;  %v6790_v5 = vmul.f32 -1.442695, %v9788_v15  ;;  %v2532_v13 = vadd.f32 %v2516_v24, %v9617_v38  ;;  %v2533_v32 = vadd.f32 %v9615_v16, %v2517_v41 }
 0x71c   :  { %8162 = vpow2.f32 %v6789_v42  ;;  %v6791_v21 = vmul.f32 -1.442695, %v9793_v53  ;;  %v9802_v50 = vadd.f32 %v9704_v57, %v2530_v35  ;;  %v9805_v9 = vadd.f32 %v9704_v57, %v2531_v46 }
 0x71d   :  { %v2502_v0 = vmul.f32 %v9657_v10, %v11565_v37  ;;  %v9810_v4 = vadd.f32 %v9704_v57, %v2536_v48  ;;  %8164 = vpow2.f32 %v6790_v5  ;;  %v2482_v38 = vadd.f32 %v9727_v20, %v2429_v33  ;;  %v11567_v48 = vld [vmem:[#allocation43_spill] sm:$0xff] }
 0x71e   :  { %8166 = vpow2.f32 %v6791_v21  ;;  %v6792_v16 = vmul.f32 -1.442695, %v9802_v50  ;;  %v6793_v34 = vmul.f32 -1.442695, %v9805_v9  ;;  %v2483_v55 = vadd.f32 %v9727_v20, %v2433_v47 }
 0x71f   :  { %v2518_v62 = vadd.f32 %v2502_v0, %v2482_v38  ;;  %v6799_v39 = vmul.f32 -1.442695, %v9775_v27  ;;  %v6798_v10 = vmul.f32 -1.442695, %v9810_v4  ;;  %v9822_v59 = vadd.f32 %v9704_v57, %v2532_v13 }
 0x720   :  { %8168 = vpow2.f32 %v6792_v16  ;;  %v2519_v40 = vadd.f32 %v11566_v3, %v2483_v55  ;;  %v9825_v47 = vadd.f32 %v9704_v57, %v2533_v32  ;;  %v9836_v29 = vadd.f32 %v9704_v57, %v9739_v52 }
 0x721   :  { %8170 = vpow2.f32 %v6793_v34  ;;  %v2534_v28 = vadd.f32 %v2518_v62, %v11567_v48  ;;  %v6794_v45 = vmul.f32 -1.442695, %v9822_v59  ;;  %v9842_v19 = vadd.f32 %v9704_v57, %v9736_v44 }
 0x722   :  { %v2535_v22 = vadd.f32 %v11568_v18, %v2519_v40  ;;  %8172 = vpow2.f32 %v6799_v39  ;;  %v6795_v42 = vmul.f32 -1.442695, %v9825_v47  ;;  %v6800_v52 = vmul.f32 -1.442695, %v9836_v29 }
 0x723   :  { %v8157_v12 = vpop.eup %8156  ;;  %8174 = vpow2.f32 %v6798_v10  ;;  %v9829_v43 = vadd.f32 %v9704_v57, %v2534_v28  ;;  %v6801_v13 = vmul.f32 -1.442695, %v9842_v19 }
 0x724   :  { %v8159_v26 = vpop.eup %8158  ;;  %v2608_v25 = vadd.f32 1.0, %v8157_v12  ;;  %v9832_v60 = vadd.f32 %v9704_v57, %v2535_v22 }
 0x725   :  { %v8161_v20 = vpop.eup %8160  ;;  %v2609_v33 = vadd.f32 1.0, %v8159_v26  ;;  %v6796_v30 = vmul.f32 -1.442695, %v9829_v43 }
 0x726   :  { %v8163_v63 = vpop.eup %8162  ;;  %8176 = vrcp.f32 %v2608_v25  ;;  %v2610_v49 = vadd.f32 1.0, %v8161_v20  ;;  %v6797_v24 = vmul.f32 -1.442695, %v9832_v60 }
 0x727   :  { %v8165_v58 = vpop.eup %8164  ;;  %8178 = vrcp.f32 %v2609_v33  ;;  %v2611_v61 = vadd.f32 1.0, %v8163_v63 }
 0x728   :  { %v8167_v1 = vpop.eup %8166  ;;  %8180 = vrcp.f32 %v2610_v49  ;;  %v2612_v31 = vadd.f32 1.0, %v8165_v58 }
 0x729   :  { %8182 = vrcp.f32 %v2611_v61  ;;  %v2613_v6 = vadd.f32 1.0, %v8167_v1 }
 0x72a   :  { %v8169_v7 = vpop.eup %8168  ;;  %8184 = vrcp.f32 %v2612_v31 }
 0x72b   :  { %v8171_v56 = vpop.eup %8170  ;;  %8186 = vrcp.f32 %v2613_v6  ;;  %v2614_v11 = vadd.f32 1.0, %v8169_v7 }
 0x72c   :  { %v2615_v8 = vadd.f32 1.0, %v8171_v56  ;;  %8188 = vpow2.f32 %v6794_v45  ;;  %v8173_v41 = vpop.eup %8172 }
 0x72d   :  { %8190 = vrcp.f32 %v2614_v11  ;;  %v8175_v35 = vpop.eup %8174  ;;  %v2621_v12 = vadd.f32 1.0, %v8173_v41  ;;  %v9898_v41 = vld [vmem:[%s11404_s7 + $0x160] sm:$0xff] }
 0x72e   :  { %8192 = vrcp.f32 %v2615_v8  ;;  %v2620_v28 = vadd.f32 1.0, %v8175_v35 }
 0x72f   :  { %8194 = vpow2.f32 %v6795_v42 }
 0x730   :  { %v8177_v46 = vpop.eup %8176  ;;  %8196 = vpow2.f32 %v6796_v30  ;;  %v6757_v30 = vld [vmem:[%s11404_s7 + $0x150] sm:$0xff] }
 0x731   :  { %v8179_v5 = vpop.eup %8178  ;;  %v2656_v32 = vmul.f32 %v8177_v46, %v9757_v51  ;;  %8198 = vpow2.f32 %v6797_v24  ;;  %v6758_v24 = vld [vmem:[%s11404_s7 + $0x158] sm:$0xff]  ;;  %v3190_v46 = vrot.slane %v9898_v41, 6 }
 0x732   :  { %v8181_v21 = vpop.eup %8180  ;;  %8200 = vpow2.f32 %v6800_v52  ;;  %v2657_v57 = vmul.f32 %v8179_v5, %v9760_v36  ;;  %v3186_v52 = vrot.slane %v6757_v30, 6  ;;  %v3188_v35 = vrot.slane %v6758_v24, 6 }
 0x733   :  { %v8183_v44 = vpop.eup %8182  ;;  %7480 = vmatprep.mubr.msk.f32.mxu1 %vm512_vm5, %v2656_v32  ;;  %v2658_v0 = vmul.f32 %v8181_v21, %v9766_v54  ;;  %8202 = vpow2.f32 %v6801_v13 }
 0x734   :  { %v8185_v38 = vpop.eup %8184  ;;  %7481 = vmatmul.mubr.msk.f32.vlgmr.msra.gmra.mrb[20].mxu1 %vm512_vm5, %v2657_v57  ;;  %v2659_v51 = vmul.f32 %v8183_v44, %v9771_v17 }
 0x735   :  { %v8187_v16 = vpop.eup %8186  ;;  %7483 = vmatprep.mubr.msk.f32.mxu1 %vm512_vm5, %v2658_v0  ;;  %v2660_v62 = vmul.f32 %v8185_v38, %v9788_v15  ;;  %v3189_v0 = vsel %vm1776_vm6, %v3186_v52, %v3188_v35  ;;  %v3191_v38 = vsel %vm1776_vm6, %v3188_v35, %v3190_v46 }
 0x736   :  { %v8189_v34 = vpop.eup %8188  ;;  %v2661_v40 = vmul.f32 %v8187_v16, %v9793_v53  ;;  %v7846_v16 = vpack.c.bf16 %v3191_v38, %v3189_v0 }
 0x737   :  { %v8191_v55 = vpop.eup %8190  ;;  %v2616_v39 = vadd.f32 1.0, %v8189_v34  ;;  %v11570_v34 = vld [vmem:[#allocation6_spill] sm:$0xff] }
 0x738   :  { %v8193_v36 = vpop.eup %8192  ;;  %7484 = vmatmul.mubr.msk.f32.gmra.mrb[22].mxu1 %vm512_vm5, %v2659_v51  ;;  %v2662_v18 = vmul.f32 %v8191_v55, %v9802_v50 }
 0x739   :  { %v8195_v3 = vpop.eup %8194  ;;  %7486 = vmatprep.mubr.msk.f32.mxu1 %vm512_vm5, %v2660_v62  ;;  %8204 = vrcp.f32 %v2616_v39  ;;  %v2663_v26 = vmul.f32 %v8193_v36, %v9805_v9 }
 0x73a   :  { %v8197_v54 = vpop.eup %8196  ;;  %v2617_v10 = vadd.f32 1.0, %v8195_v3 }
 0x73b   :  { %v8199_v48 = vpop.eup %8198  ;;  %v2618_v17 = vadd.f32 1.0, %v8197_v54 }
 0x73c   :  { %v8201_v22 = vpop.eup %8200  ;;  %7487 = vmatmul.mubr.msk.f32.gmra.mrb[24].mxu1 %vm512_vm5, %v2661_v40  ;;  %8206 = vrcp.f32 %v2617_v10  ;;  %v2619_v15 = vadd.f32 1.0, %v8199_v48 }
 0x73d   :  { %7489 = vmatprep.mubr.msk.f32.mxu1 %vm512_vm5, %v2662_v18  ;;  %8208 = vrcp.f32 %v2618_v17  ;;  %v8203_v25 = vpop.eup %8202  ;;  %v2622_v53 = vadd.f32 1.0, %v8201_v22 }
 0x73e   :  { %8210 = vrcp.f32 %v2619_v15  ;;  %v2623_v50 = vadd.f32 1.0, %v8203_v25 }
 0x73f   :  { %8212 = vrcp.f32 %v2620_v28 }
 0x740   :  { %7490 = vmatmul.mubr.msk.f32.gmra.mrb[26].mxu1 %vm512_vm5, %v2663_v26  ;;  %8214 = vrcp.f32 %v2621_v12 }
 0x741   :  { %8216 = vrcp.f32 %v2622_v53 }
 0x742   :  { %8218 = vrcp.f32 %v2623_v50 }
 0x743   :  { %v8205_v20 = vpop.eup %8204 }
 0x744   :  { %v2664_v33 = vmul.f32 %v8205_v20, %v9822_v59 }
 0x746   :  { %v8207_v63 = vpop.eup %8206  ;;  %7492 = vmatprep.mubr.msk.f32.mxu1 %vm512_vm5, %v2664_v33 }
 0x747   :  { %v8209_v49 = vpop.eup %8208  ;;  %v2665_v58 = vmul.f32 %v8207_v63, %v9825_v47 }
 0x748   :  { %v8211_v9 = vpop.eup %8210  ;;  %v2666_v61 = vmul.f32 %v8209_v49, %v9829_v43 }
 0x749   :  { %v8213_v1 = vpop.eup %8212  ;;  %7493 = vmatmul.mubr.msk.f32.gmra.mrb[28].mxu1 %vm512_vm5, %v2665_v58  ;;  %v2667_v31 = vmul.f32 %v8211_v9, %v9832_v60  ;;  %v6755_v60 = vld [vmem:[%s11404_s7 + $0x140] sm:$0xff] }
 0x74a   :  { %7495 = vmatprep.mubr.msk.f32.mxu1 %vm512_vm5, %v2666_v61  ;;  %v8215_v45 = vpop.eup %8214  ;;  %v2668_v59 = vmul.f32 %v8213_v1, %v9810_v4  ;;  %v6754_v4 = vld [vmem:[%s11404_s7 + $0x138] sm:$0xff]  ;;  %v3182_v8 = vrot.slane %v6755_v60, 6 }
 0x74b   :  { %v8217_v6 = vpop.eup %8216  ;;  %v2669_v47 = vmul.f32 %v8215_v45, %v9775_v27  ;;  %v11569_v27 = vld [vmem:[#allocation44_spill] sm:$0xff]  ;;  %v3180_v42 = vrot.slane %v6754_v4, 6 }
 0x74c   :  { %v8219_v7 = vpop.eup %8218  ;;  %v2670_v43 = vmul.f32 %v8217_v6, %v9836_v29  ;;  %v3179_v11 = vrot.slane %v11569_v27, 6  ;;  %v6756_v29 = vld [vmem:[%s11404_s7 + $0x148] sm:$0xff]  ;;  %v9911_v51 = vrot.slane %v11569_v27, %v11570_v34 }
 0x74d   :  { %7496 = vmatmul.mubr.msk.f32.gmra.mrb[30].mxu1 %vm512_vm5, %v2667_v31  ;;  %v2671_v56 = vmul.f32 %v8219_v7, %v9842_v19  ;;  %v3184_v19 = vrot.slane %v6756_v29, 6  ;;  %v3183_v13 = vsel %vm1776_vm6, %v3180_v42, %v3182_v8 }
 0x74e   :  { %7498 = vmatprep.mubr.msk.f32.mxu1 %vm512_vm5, %v2668_v59  ;;  %v3181_v5 = vsel %vm1776_vm6, %v3179_v11, %v3180_v42 }
 0x74f   :  { %v3185_v32 = vsel %vm1776_vm6, %v3182_v8, %v3184_v19  ;;  %v7838_v21 = vpack.c.bf16 %v3183_v13, %v3181_v5  ;;  %v3187_v57 = vsel %vm1776_vm6, %v3184_v19, %v3186_v52 }
 0x750   :  { %v7842_v44 = vpack.c.bf16 %v3187_v57, %v3185_v32 }
 0x751   :  { %7499 = vmatmul.mubr.msk.f32.gmra.mrb[32].mxu1 %vm512_vm5, %v2669_v47  ;;  %7839 = vmatprep.subr.bf16.mxu0 %v7838_v21 }
 0x752   :  { %7501 = vmatprep.mubr.msk.f32.mxu1 %vm512_vm5, %v2670_v43  ;;  %7841 = vmatpush3.bf16.msra.mxu0 %v7838_v21 }
 0x753   :  { %7843 = vmatprep.subr.bf16.mxu0 %v7842_v44 }
 0x755   :  { %7502 = vmatmul.mubr.msk.f32.gmra.mrb[34].mxu1 %vm512_vm5, %v2671_v56 }
 0x756   :  { %7845 = vmatpush3.bf16.msra.mxu0 %v7842_v44 }
 0x757   :  { %7847 = vmatprep.subr.bf16.mxu0 %v7846_v16 }
 0x75a   :  { %7849 = vmatpush3.bf16.msra.mxu0 %v7846_v16 }
 0x807   :  { %v7482_v55 = vpop.f32.mrb[20].mxu1 }
 0x808   :  { %v9914_v62 = vadd.f32 %v7482_v55, %v9911_v51  ;;  %v2807_v39 = vpop.f32.mrb[21].mxu1 }
 0x809   :  { %v9917_v36 = vadd.f32 %v2807_v39, %v9911_v51 }
 0x80a   :  { %v6819_v3 = vmul.f32 -1.442695, %v9914_v62 }
 0x80b   :  { %v6818_v54 = vmul.f32 -1.442695, %v9917_v36  ;;  %v7485_v40 = vpop.f32.mrb[22].mxu1 }
 0x80c   :  { %8220 = vpow2.f32 %v6819_v3  ;;  %v9922_v10 = vadd.f32 %v7485_v40, %v9911_v51  ;;  %v2817_v48 = vpop.f32.mrb[23].mxu1  ;;  %v11571_v3 = vld [vmem:[#allocation27_spill] sm:$0xff] }
 0x80d   :  { %8222 = vpow2.f32 %v6818_v54  ;;  %v9925_v28 = vadd.f32 %v2817_v48, %v9911_v51 }
 0x80e   :  { %v6821_v18 = vmul.f32 -1.442695, %v9922_v10 }
 0x80f   :  { %v6820_v17 = vmul.f32 -1.442695, %v9925_v28  ;;  %v7488_v22 = vpop.f32.mrb[24].mxu1 }
 0x810   :  { %8224 = vpow2.f32 %v6821_v18  ;;  %v9930_v15 = vadd.f32 %v7488_v22, %v9911_v51  ;;  %v2827_v12 = vpop.f32.mrb[25].mxu1 }
 0x811   :  { %8226 = vpow2.f32 %v6820_v17  ;;  %v9933_v26 = vadd.f32 %v2827_v12, %v9911_v51 }
 0x812   :  { %v6823_v25 = vmul.f32 -1.442695, %v9930_v15 }
 0x813   :  { %v6822_v53 = vmul.f32 -1.442695, %v9933_v26  ;;  %v7491_v50 = vpop.f32.mrb[26].mxu1 }
 0x814   :  { %8228 = vpow2.f32 %v6823_v25  ;;  %v9938_v20 = vadd.f32 %v7491_v50, %v9911_v51  ;;  %v2837_v33 = vpop.f32.mrb[27].mxu1 }
 0x815   :  { %8230 = vpow2.f32 %v6822_v53  ;;  %v9941_v63 = vadd.f32 %v2837_v33, %v9911_v51 }
 0x816   :  { %v8221_v49 = vpop.eup %8220  ;;  %v6825_v58 = vmul.f32 -1.442695, %v9938_v20 }
 0x817   :  { %v8223_v9 = vpop.eup %8222  ;;  %v2935_v61 = vadd.f32 1.0, %v8221_v49  ;;  %v6824_v1 = vmul.f32 -1.442695, %v9941_v63 }
 0x818   :  { %v2934_v31 = vadd.f32 1.0, %v8223_v9  ;;  %8232 = vpow2.f32 %v6825_v58 }
 0x819   :  { %8234 = vrcp.f32 %v2935_v61 }
 0x81a   :  { %v8225_v45 = vpop.eup %8224  ;;  %8236 = vrcp.f32 %v2934_v31 }
 0x81b   :  { %v8227_v59 = vpop.eup %8226  ;;  %v2937_v6 = vadd.f32 1.0, %v8225_v45  ;;  %8238 = vpow2.f32 %v6824_v1  ;;  %v11573_v1 = vld [vmem:[#allocation25_spill] sm:$0xff] }
 0x81c   :  { %v2936_v47 = vadd.f32 1.0, %v8227_v59  ;;  %v7494_v7 = vpop.f32.mrb[28].mxu1 }
 0x81d   :  { %8240 = vrcp.f32 %v2937_v6  ;;  %v9946_v43 = vadd.f32 %v7494_v7, %v9911_v51  ;;  %v2847_v56 = vpop.f32.mrb[29].mxu1  ;;  %v11574_v6 = vld [vmem:[#allocation23_spill] sm:$0xff] }
 0x81e   :  { %v8229_v4 = vpop.eup %8228  ;;  %8242 = vrcp.f32 %v2936_v47  ;;  %v9949_v60 = vadd.f32 %v2847_v56, %v9911_v51 }
 0x81f   :  { %v8231_v27 = vpop.eup %8230  ;;  %v2939_v11 = vadd.f32 1.0, %v8229_v4  ;;  %v6827_v29 = vmul.f32 -1.442695, %v9946_v43 }
 0x820   :  { %v2938_v42 = vadd.f32 1.0, %v8231_v27  ;;  %v7497_v8 = vpop.f32.mrb[30].mxu1  ;;  %v6826_v52 = vmul.f32 -1.442695, %v9949_v60 }
 0x821   :  { %8244 = vrcp.f32 %v2939_v11  ;;  %v9953_v30 = vadd.f32 %v7497_v8, %v9911_v51  ;;  %v2857_v19 = vpop.f32.mrb[31].mxu1 }
 0x822   :  { %v8233_v24 = vpop.eup %8232  ;;  %8246 = vrcp.f32 %v2938_v42  ;;  %v9957_v35 = vadd.f32 %v2857_v19, %v9911_v51 }
 0x823   :  { %v8235_v5 = vpop.eup %8234  ;;  %v2941_v13 = vadd.f32 1.0, %v8233_v24  ;;  %8248 = vpow2.f32 %v6827_v29  ;;  %v6829_v32 = vmul.f32 -1.442695, %v9953_v30 }
 0x824   :  { %v8237_v21 = vpop.eup %8236  ;;  %v2983_v57 = vmul.f32 %v8235_v5, %v9914_v62  ;;  %v7500_v44 = vpop.f32.mrb[32].mxu1  ;;  %v6828_v16 = vmul.f32 -1.442695, %v9957_v35  ;;  %v11572_v62 = vld [vmem:[#allocation22_spill] sm:$0xff]  ;;  %v11575_v5 = vld [vmem:[#allocation28_spill] sm:$0xff] }
 0x825   :  { %v8239_v0 = vpop.eup %8238  ;;  %v2982_v38 = vmul.f32 %v8237_v21, %v9917_v36  ;;  %8250 = vrcp.f32 %v2941_v13  ;;  %v9964_v55 = vadd.f32 %v7500_v44, %v9911_v51  ;;  %v2867_v39 = vpop.f32.mrb[33].mxu1  ;;  %v11576_v44 = vld [vmem:[#allocation26_spill] sm:$0xff] }
 0x826   :  { %v2999_v54 = vmul.f32 %v2983_v57, %v11571_v3  ;;  %v2940_v40 = vadd.f32 1.0, %v8239_v0  ;;  %8252 = vpow2.f32 %v6826_v52  ;;  %v9968_v48 = vadd.f32 %v2867_v39, %v9911_v51 }
 0x827   :  { %v8241_v18 = vpop.eup %8240  ;;  %v2998_v17 = vmul.f32 %v2982_v38, %v11572_v62  ;;  %8254 = vpow2.f32 %v6829_v32  ;;  %v6831_v36 = vmul.f32 -1.442695, %v9964_v55 }
 0x828   :  { %v8243_v22 = vpop.eup %8242  ;;  %v3021_v12 = vsel %vm512_vm5, %v2999_v54, 0.0  ;;  %v2985_v25 = vmul.f32 %v8241_v18, %v9922_v10  ;;  %8256 = vrcp.f32 %v2940_v40  ;;  %v6830_v53 = vmul.f32 -1.442695, %v9968_v48  ;;  %v7503_v50 = vpop.f32.mrb[34].mxu1 }
 0x829   :  { %v3022_v33 = vrot.slane %v3021_v12, 4  ;;  %v3014_v49 = vsel %vm512_vm5, %v2998_v17, 0.0  ;;  %v2984_v58 = vmul.f32 %v8243_v22, %v9925_v28  ;;  %8258 = vpow2.f32 %v6828_v16  ;;  %v2877_v9 = vpop.f32.mrb[35].mxu1 }
 0x82a   :  { %v3015_v61 = vrot.slane %v3014_v49, 4  ;;  %v3001_v31 = vmul.f32 %v2985_v25, %v11573_v1  ;;  %8260 = vpow2.f32 %v6831_v36  ;;  %v9979_v45 = vadd.f32 %v7503_v50, %v9911_v51 }
 0x82b   :  { %v8245_v59 = vpop.eup %8244  ;;  %v3023_v10 = vadd.f32 %v3022_v33, %v3021_v12  ;;  %v3000_v47 = vmul.f32 %v2984_v58, %v11574_v6  ;;  %8262 = vpow2.f32 %v6830_v53  ;;  %v9985_v27 = vadd.f32 %v2877_v9, %v9911_v51  ;;  %v11577_v33 = vld [vmem:[#allocation32_spill] sm:$0xff] }
 0x82c   :  { %v8247_v7 = vpop.eup %8246  ;;  %v3016_v56 = vadd.f32 %v3015_v61, %v3014_v49  ;;  %v3035_v4 = vsel %vm512_vm5, %v3001_v31, 0.0  ;;  %v2987_v28 = vmul.f32 %v8245_v59, %v9930_v15  ;;  %v9991_v32 = vmul.f32 -1.442695, %v9979_v45 }
 0x82d   :  { %v8249_v11 = vpop.eup %8248  ;;  %v3024_v29 = vrot.slane %v3023_v10, 2  ;;  %v3036_v42 = vrot.slane %v3035_v4, 4  ;;  %v3028_v8 = vsel %vm512_vm5, %v3000_v47, 0.0  ;;  %v2986_v19 = vmul.f32 %v8247_v7, %v9933_v26 }
 0x82e   :  { %v3017_v24 = vrot.slane %v3016_v56, 2  ;;  %v3029_v52 = vrot.slane %v3028_v8, 4  ;;  %v3003_v13 = vmul.f32 %v2987_v28, %v11575_v5  ;;  %v2943_v0 = vadd.f32 1.0, %v8249_v11 }
 0x82f   :  { %v8251_v21 = vpop.eup %8250  ;;  %v3025_v57 = vadd.f32 %v3024_v29, %v3023_v10  ;;  %v3037_v15 = vadd.f32 %v3036_v42, %v3035_v4  ;;  %v3002_v51 = vmul.f32 %v2986_v19, %v11576_v44  ;;  %v11578_v42 = vld [vmem:[#allocation30_spill] sm:$0xff] }
 0x830   :  { %v8253_v38 = vpop.eup %8252  ;;  %v3018_v16 = vadd.f32 %v3017_v24, %v3016_v56  ;;  %v3030_v39 = vadd.f32 %v3029_v52, %v3028_v8  ;;  %v3049_v54 = vsel %vm512_vm5, %v3003_v13, 0.0  ;;  %v2989_v26 = vmul.f32 %v8251_v21, %v9938_v20 }
 0x831   :  { %v8255_v40 = vpop.eup %8254  ;;  %v3026_v18 = vrot.slane %v3025_v57, 1  ;;  %v3038_v17 = vrot.slane %v3037_v15, 2  ;;  %v3050_v36 = vrot.slane %v3049_v54, 4  ;;  %v3042_v22 = vsel %vm512_vm5, %v3002_v51, 0.0 }
 0x832   :  { %v8257_v12 = vpop.eup %8256  ;;  %v3019_v25 = vrot.slane %v3018_v16, 1  ;;  %v3031_v53 = vrot.slane %v3030_v39, 2  ;;  %v3043_v50 = vrot.slane %v3042_v22, 4  ;;  %v3005_v49 = vmul.f32 %v2989_v26, %v11577_v33 }
 0x833   :  { %v8259_v58 = vpop.eup %8258  ;;  %v3039_v9 = vadd.f32 %v3038_v17, %v3037_v15  ;;  %v3051_v61 = vadd.f32 %v3050_v36, %v3049_v54  ;;  %v2988_v31 = vmul.f32 %v8257_v12, %v9941_v63  ;;  %v2942_v59 = vadd.f32 1.0, %v8253_v38  ;;  %v6760_v12 = vld [vmem:[%s11404_s7 + $0x168] sm:$0xff] }
 0x834   :  { %v8261_v10 = vpop.eup %8260  ;;  %v3027_v20 = vadd.f32 %v3026_v18, %v3025_v57  ;;  %v3032_v47 = vadd.f32 %v3031_v53, %v3030_v39  ;;  %v3044_v7 = vadd.f32 %v3043_v50, %v3042_v22  ;;  %v3063_v56 = vsel %vm512_vm5, %v3005_v49, 0.0 }
 0x835   :  { %v8263_v4 = vpop.eup %8262  ;;  %v3020_v28 = vadd.f32 %v3019_v25, %v3018_v16  ;;  %v3052_v11 = vrot.slane %v3051_v61, 2  ;;  %v3064_v29 = vrot.slane %v3063_v56, 4  ;;  %v3004_v8 = vmul.f32 %v2988_v31, %v11578_v42  ;;  %v6761_v25 = vld [vmem:[%s11404_s7 + $0x170] sm:$0xff]  ;;  %v10014_v31 = vld [vmem:[%s11404_s7 + $0x178] sm:$0xff] }
 0x836   :  { %v3033_v19 = vrot.slane %v3032_v47, 1  ;;  %v3045_v24 = vrot.slane %v3044_v7, 2  ;;  %8264 = vrcp.f32 %v2943_v0  ;;  %v2945_v52 = vadd.f32 1.0, %v8255_v40 }
 0x837   :  { %v3040_v13 = vrot.slane %v3039_v9, 1  ;;  %v3053_v21 = vadd.f32 %v3052_v11, %v3051_v61  ;;  %v3065_v63 = vadd.f32 %v3064_v29, %v3063_v56  ;;  %v3056_v15 = vsel %vm512_vm5, %v3004_v8, 0.0 }
 0x838   :  { %v3034_v57 = vadd.f32 %v3033_v19, %v3032_v47  ;;  %v3046_v51 = vadd.f32 %v3045_v24, %v3044_v7  ;;  %v3057_v38 = vrot.slane %v3056_v15, 4  ;;  %8266 = vrcp.f32 %v2942_v59 }
 0x839   :  { %v3054_v39 = vrot.slane %v3053_v21, 1  ;;  %v3066_v54 = vrot.slane %v3065_v63, 2  ;;  %8268 = vrcp.f32 %v2945_v52  ;;  %v2944_v16 = vadd.f32 1.0, %v8259_v58 }
 0x83a   :  { %v3047_v26 = vrot.slane %v3046_v51, 1  ;;  %v3058_v18 = vadd.f32 %v3057_v38, %v3056_v15  ;;  %v2947_v17 = vadd.f32 1.0, %v8261_v10  ;;  %v2946_v36 = vadd.f32 1.0, %v8263_v4 }
 0x83b   :  { %v3041_v22 = vadd.f32 %v3040_v13, %v3039_v9  ;;  %8270 = vrcp.f32 %v2944_v16  ;;  %v6832_v0 = vmul.f32 -1.442695, %v9985_v27  ;;  %v3067_v40 = vadd.f32 %v3066_v54, %v3065_v63  ;;  %v11579_v63 = vld [vmem:[#allocation29_spill] sm:$0xff] }
 0x83c   :  { %v3048_v53 = vadd.f32 %v3047_v26, %v3046_v51  ;;  %v3059_v50 = vrot.slane %v3058_v18, 2  ;;  %8272 = vrcp.f32 %v2947_v17  ;;  %v3142_v49 = vsel %vm331_vm7, %v3027_v20, %v3020_v28  ;;  %v11581_v17 = vld [vmem:[#allocation33_spill] sm:$0xff] }
 0x83d   :  { %8274 = vrcp.f32 %v2946_v36  ;;  %v3055_v58 = vadd.f32 %v3054_v39, %v3053_v21  ;;  %v3143_v9 = vsel %vm332_vm8, %v3034_v57, %v3142_v49  ;;  %v3192_v61 = vrot.slane %v6760_v12, 6  ;;  %v11580_v39 = vld [vmem:[#allocation24_spill] sm:$0xff] }
 0x83e   :  { %v3060_v59 = vadd.f32 %v3059_v50, %v3058_v18  ;;  %8276 = vpow2.f32 %v9991_v32  ;;  %v3144_v10 = vsel %vm334_vm9, %v3041_v22, %v3143_v9  ;;  %v3194_v47 = vrot.slane %v6761_v25, 6  ;;  %v11582_v50 = vld [vmem:[#allocation31_spill] sm:$0xff] }
 0x83f   :  { %8278 = vpow2.f32 %v6832_v0  ;;  %v3068_v7 = vrot.slane %v3067_v40, 1  ;;  %v3145_v20 = vsel %vm336_vm10, %v3048_v53, %v3144_v10  ;;  %v3193_v56 = vsel %vm1776_vm6, %v3190_v46, %v3192_v61 }
 0x840   :  { %v8265_v4 = vpop.eup %8264  ;;  %v3061_v28 = vrot.slane %v3060_v59, 1  ;;  %v3146_v11 = vsel %vm338_vm11, %v3055_v58, %v3145_v20  ;;  %v3195_v29 = vsel %vm1776_vm6, %v3192_v61, %v3194_v47  ;;  %v3196_v8 = vrot.slane %v10014_v31, 6  ;;  %v11583_v61 = vld [vmem:[#allocation35_spill] sm:$0xff] }
 0x841   :  { %v2991_v32 = vmul.f32 %v8265_v4, %v9946_v43  ;;  %v7850_v19 = vpack.c.bf16 %v3195_v29, %v3193_v56  ;;  %v3069_v15 = vadd.f32 %v3068_v7, %v3067_v40 }
 0x842   :  { %v8267_v24 = vpop.eup %8266  ;;  %v3062_v52 = vadd.f32 %v3061_v28, %v3060_v59  ;;  %v3197_v13 = vsel %vm1776_vm6, %v3194_v47, %v3196_v8 }
 0x843   :  { %v8269_v21 = vpop.eup %8268  ;;  %v3007_v41 = vmul.f32 %v2991_v32, %v11579_v63  ;;  %v2990_v46 = vmul.f32 %v8267_v24, %v9949_v60  ;;  %7851 = vmatprep.subr.bf16.mxu0 %v7850_v19  ;;  %v11613_v63 = vld [vmem:[#allocation21_spill] sm:$0xff] }
 0x844   :  { %v2993_v57 = vmul.f32 %v8269_v21, %v9953_v30  ;;  %v3147_v51 = vsel %vm340_vm12, %v3062_v52, %v3146_v11  ;;  %7853 = vmatpush3.bf16.msra.mxu0 %v7850_v19  ;;  %v11584_v11 = vld [vmem:[#allocation34_spill] sm:$0xff] }
 0x845   :  { %v8271_v38 = vpop.eup %8270  ;;  %v3077_v43 = vsel %vm512_vm5, %v3007_v41, 0.0  ;;  %v3006_v54 = vmul.f32 %v2990_v46, %v11580_v39  ;;  %v3148_v16 = vsel %vm342_vm13, %v3069_v15, %v3147_v51  ;;  %7520 = vmatprep.subr.msk.mxu0 %vm85_vm0, %v3197_v13  ;;  %v11612_v39 = vld [vmem:[#allocation18_spill] sm:$0xff] }
 0x846   :  { %v8273_v26 = vpop.eup %8272  ;;  %v3078_v18 = vrot.slane %v3077_v43, 4  ;;  %v3009_v60 = vmul.f32 %v2993_v57, %v11581_v17  ;;  %v2992_v36 = vmul.f32 %v8271_v38, %v9957_v35  ;;  %3156 = vrot.lane.b32.xlu0 %v3148_v16, %s8627_s22  ;;  %v11611_v17 = vld [vmem:[#allocation20_spill] sm:$0xff] }
 0x847   :  { %v8275_v30 = vpop.eup %8274  ;;  %v3070_v22 = vsel %vm512_vm5, %v3006_v54, 0.0  ;;  %v2995_v0 = vmul.f32 %v8273_v26, %v9964_v55 }
 0x848   :  { %v8277_v40 = vpop.eup %8276  ;;  %v3079_v12 = vadd.f32 %v3078_v18, %v3077_v43  ;;  %v3071_v25 = vrot.slane %v3070_v22, 4  ;;  %v3091_v53 = vsel %vm512_vm5, %v3009_v60, 0.0  ;;  %v3008_v49 = vmul.f32 %v2992_v36, %v11582_v50  ;;  %7521 = vmatpush3.msk.msra.mxu0 %vm85_vm0, %v3197_v13  ;;  %v11610_v50 = vld [vmem:[#allocation5_spill] sm:$0xff] }
 0x849   :  { %v8279_v58 = vpop.eup %8278  ;;  %v3092_v9 = vrot.slane %v3091_v53, 4  ;;  %v3011_v35 = vmul.f32 %v2995_v0, %v11583_v61  ;;  %v2994_v59 = vmul.f32 %v8275_v30, %v9968_v48  ;;  %v2949_v10 = vadd.f32 1.0, %v8277_v40  ;;  %v11609_v61 = vld [vmem:[#allocation17_spill] sm:$0xff] }
 0x84a   :  { %v3080_v47 = vrot.slane %v3079_v12, 2  ;;  %v3072_v7 = vadd.f32 %v3071_v25, %v3070_v22  ;;  %v3084_v55 = vsel %vm512_vm5, %v3008_v49, 0.0  ;;  %v2948_v20 = vadd.f32 1.0, %v8279_v58 }
 0x84b   :  { %v3093_v56 = vadd.f32 %v3092_v9, %v3091_v53  ;;  %v3085_v4 = vrot.slane %v3084_v55, 4  ;;  %v3105_v28 = vsel %vm512_vm5, %v3011_v35, 0.0  ;;  %v3010_v29 = vmul.f32 %v2994_v59, %v11584_v11 }
 0x84c   :  { %v3081_v8 = vadd.f32 %v3080_v47, %v3079_v12  ;;  %v3073_v32 = vrot.slane %v3072_v7, 2  ;;  %v3106_v19 = vrot.slane %v3105_v28, 4  ;;  %8280 = vrcp.f32 %v2949_v10 }
 0x84d   :  { %v3094_v24 = vrot.slane %v3093_v56, 2  ;;  %v3086_v52 = vadd.f32 %v3085_v4, %v3084_v55  ;;  %v3098_v48 = vsel %vm512_vm5, %v3010_v29, 0.0  ;;  %8282 = vrcp.f32 %v2948_v20 }
 0x84e   :  { %v3082_v13 = vrot.slane %v3081_v8, 1  ;;  %v3074_v21 = vadd.f32 %v3073_v32, %v3072_v7  ;;  %v3107_v41 = vadd.f32 %v3106_v19, %v3105_v28  ;;  %v3099_v46 = vrot.slane %v3098_v48, 4  ;;  %v11585_v7 = vld [vmem:[#allocation36_spill] sm:$0xff] }
 0x84f   :  { %v3095_v15 = vadd.f32 %v3094_v24, %v3093_v56  ;;  %v3087_v57 = vrot.slane %v3086_v52, 2  ;;  %v11586_v56 = vld [vmem:[#allocation37_spill] sm:$0xff] }
 0x850   :  { %v3083_v51 = vadd.f32 %v3082_v13, %v3081_v8  ;;  %v3075_v38 = vrot.slane %v3074_v21, 1  ;;  %v3108_v43 = vrot.slane %v3107_v41, 2  ;;  %v3100_v54 = vadd.f32 %v3099_v46, %v3098_v48 }
 0x851   :  { %v3088_v16 = vadd.f32 %v3087_v57, %v3086_v52  ;;  %v3096_v18 = vrot.slane %v3095_v15, 1 }
 0x852   :  { %v3076_v26 = vadd.f32 %v3075_v38, %v3074_v21  ;;  %v3109_v60 = vadd.f32 %v3108_v43, %v3107_v41  ;;  %v3101_v36 = vrot.slane %v3100_v54, 2 }
 0x853   :  { %v3089_v30 = vrot.slane %v3088_v16, 1  ;;  %v3097_v53 = vadd.f32 %v3096_v18, %v3095_v15 }
 0x854   :  { %v3102_v22 = vadd.f32 %v3101_v36, %v3100_v54  ;;  %v3149_v0 = vsel %vm331_vm7, %v3083_v51, %v3076_v26  ;;  %v3110_v12 = vrot.slane %v3109_v60, 1  ;;  %v11587_v54 = vld [vmem:[#allocation40_spill] sm:$0xff]  ;;  %v11588_v26 = vld [vmem:[#allocation38_spill] sm:$0xff]  ;;  %v11589_v36 = vld [vmem:[#allocation41_spill] sm:$0xff] }
 0x855   :  { %v3090_v40 = vadd.f32 %v3089_v30, %v3088_v16 }
 0x856   :  { %v8281_v25 = vpop.eup %8280  ;;  %v3103_v49 = vrot.slane %v3102_v22, 1  ;;  %v3111_v20 = vadd.f32 %v3110_v12, %v3109_v60  ;;  %v6764_v12 = vld [vmem:[%s11404_s7 + $0x188] sm:$0xff] }
 0x857   :  { %v8283_v58 = vpop.eup %8282  ;;  %v2997_v9 = vmul.f32 %v8281_v25, %v9979_v45  ;;  %v3150_v35 = vsel %vm332_vm8, %v3090_v40, %v3149_v0  ;;  %v6763_v40 = vld [vmem:[%s11404_s7 + $0x180] sm:$0xff]  ;;  %v3307_v25 = vrot.slane %v10014_v31, 3 }
 0x858   :  { %v3104_v59 = vadd.f32 %v3103_v49, %v3102_v22  ;;  %v2996_v10 = vmul.f32 %v8283_v58, %v9985_v27  ;;  %v3151_v47 = vsel %vm334_vm9, %v3097_v53, %v3150_v35  ;;  %v11590_v22 = vld [vmem:[#allocation39_spill] sm:$0xff]  ;;  %v3308_v53 = vrot.slane %v6763_v40, 3 }
 0x859   :  { %v3013_v55 = vmul.f32 %v2997_v9, %v11585_v7  ;;  %v3310_v49 = vrot.slane %v6764_v12, 3 }
 0x85a   :  { %v3012_v4 = vmul.f32 %v2996_v10, %v11586_v56  ;;  %v3152_v28 = vsel %vm336_vm10, %v3104_v59, %v3151_v47  ;;  %v3309_v58 = vsel %vm1906_vm1, %v3307_v25, %v3308_v53  ;;  %v6765_v59 = vld [vmem:[%s11404_s7 + $0x190] sm:$0xff]  ;;  %v10088_v10 = vld [vmem:[%s11404_s7 + $0x198] sm:$0xf] }
 0x85b   :  { %v3119_v29 = vsel %vm512_vm5, %v3013_v55, 0.0  ;;  %v3153_v8 = vsel %vm338_vm11, %v3111_v20, %v3152_v28  ;;  %v3311_v9 = vsel %vm1906_vm1, %v3308_v53, %v3310_v49  ;;  %v3312_v47 = vrot.slane %v6765_v59, 3 }
 0x85c   :  { %v3120_v32 = vrot.slane %v3119_v29, 4  ;;  %v3112_v45 = vsel %vm512_vm5, %v3012_v4, 0.0  ;;  %v7854_v35 = vpack.c.bf16 %v3311_v9, %v3309_v58  ;;  %v3314_v55 = vrot.slane %v10088_v10, 3  ;;  %v8594_v9 = vld [vmem:[%s11406_s3] sm:$0xff] }
 0x85d   :  { %v3113_v19 = vrot.slane %v3112_v45, 4  ;;  %v3313_v20 = vsel %vm1906_vm1, %v3310_v49, %v3312_v47 }
 0x85e   :  { %v3121_v24 = vadd.f32 %v3120_v32, %v3119_v29  ;;  %7855 = vmatprep.subr.bf16.mxu1 %v7854_v35  ;;  %v3315_v4 = vsel %vm1906_vm1, %v3312_v47, %v3314_v55  ;;  %v6845_v29 = vld [vmem:[%s11404_s7 + $0x1c0] sm:$0xff]  ;;  %v6847_v32 = vld [vmem:[%s11404_s7 + $0x1d0] sm:$0xff] }
 0x85f   :  { %v3114_v52 = vadd.f32 %v3113_v19, %v3112_v45  ;;  %7857 = vmatpush3.bf16.msra.mxu1 %v7854_v35  ;;  %v7858_v28 = vpack.c.bf16 %v3315_v4, %v3313_v20  ;;  %v6848_v19 = vld [vmem:[%s11404_s7 + $0x1d8] sm:$0xff]  ;;  %v6843_v55 = vld [vmem:[%s11404_s7 + $0x1b0] sm:$0xff] }
 0x860   :  { %v3122_v27 = vrot.slane %v3121_v24, 2  ;;  %v6844_v20 = vld [vmem:[%s11404_s7 + $0x1b8] sm:$0xff] }
 0x861   :  { %v3115_v48 = vrot.slane %v3114_v52, 2  ;;  %7859 = vmatprep.subr.bf16.mxu1 %v7858_v28 }
 0x862   :  { %v3123_v13 = vadd.f32 %v3122_v27, %v3121_v24  ;;  %v8005_v24 = vpack.i.bf16 %v6848_v19, %v6847_v32  ;;  %v8596_v19 = vld [vmem:[%s11406_s3 + $0x10] sm:$0xff] }
 0x863   :  { %v3116_v21 = vadd.f32 %v3115_v48, %v3114_v52  ;;  %7861 = vmatpush3.bf16.msra.mxu1 %v7858_v28  ;;  %v11591_v52 = vld [vmem:[#allocation3_spill] sm:$0xff] }
 0x864   :  { %v3124_v41 = vrot.slane %v3123_v13, 1  ;;  %v3169_v27 = vrot.slane %v10014_v31, %v11591_v52  ;;  %v6842_v31 = vld [vmem:[%s11404_s7 + $0x1a8] sm:$0xff]  ;;  %v11602_v52 = vld [vmem:[#allocation10_spill] sm:$0xff] }
 0x865   :  { %v3117_v46 = vrot.slane %v3116_v21, 1 }
 0x866   :  { %v3125_v57 = vadd.f32 %v3124_v41, %v3123_v13 }
 0x867   :  { %v3118_v15 = vadd.f32 %v3117_v46, %v3116_v21 }
 0x869   :  { %v3154_v51 = vsel %vm340_vm12, %v3118_v15, %v3153_v8  ;;  %v6846_v8 = vld [vmem:[%s11404_s7 + $0x1c8] sm:$0xff] }
 0x86a   :  { %v3155_v38 = vsel %vm342_vm13, %v3125_v57, %v3154_v51  ;;  %v8000_v45 = vpack.i.bf16 %v6846_v8, %v6845_v29  ;;  %v10134_v8 = vld [vmem:[%s11404_s7 + $0x1e0] sm:$0xff] }
 0x86b   :  { %3158 = vrot.lane.b32.xlu1 %v3155_v38, %s8627_s22  ;;  %v3638_v32 = vrot.slane %v10134_v8, 1 }
 0x86c   :  { %8001 = vrot.lane.b32.xlu0 %v8000_v45, %s8627_s22  ;;  %v8595_v45 = vld [vmem:[%s11406_s3 + $0x8] sm:$0xff] }
 0x86d   :  { %7547 = vmatprep.subr.msk.mxu1 %vm748_vm4, %v3638_v32 }
 0x86f   :  { %8006 = vrot.lane.b32.xlu1 %v8005_v24, %s8627_s22  ;;  %v8597_v24 = vld [vmem:[%s11406_s3 + $0x18] sm:$0xff] }
 0x8b8   :  { %v3157_v43 = vpop.permute.xlu0 %3156 }
 0x8b9   :  { %v3162_v16 = vsel %vm512_vm5, %v11587_v54, %v3157_v43 }
 0x8ba   :  { %v3164_v18 = vsel %vm1760_vm14, %v3162_v16, %v11588_v26 }
 0x8bb   :  { %7522 = vmatprep.mubr.msk.f32.mxu0 %vm1804_vm15, %v3164_v18  ;;  %v6841_v18 = vld [vmem:[%s11404_s7 + $0x1a0] sm:$0xff] }
 0x8dd   :  { %v3159_v60 = vpop.permute.xlu1 %3158 }
 0x8de   :  { %v3163_v30 = vsel %vm512_vm5, %v11589_v36, %v3159_v60  ;;  %v8002_v16 = vpop.permute.xlu0 %8001 }
 0x8df   :  { %v3165_v0 = vsel %vm1760_vm14, %v3163_v30, %v11590_v22  ;;  %v8004_v60 = vunpack.i.h.bf16 %v8002_v16  ;;  %v8003_v30 = vunpack.i.l.bf16 %v8002_v16  ;;  %v8609_v16 = vld [vmem:[%s11406_s3 + $0x78] sm:$0xff]  ;;  %v11603_v22 = vld [vmem:[#allocation11_spill] sm:$0xff] }
 0x8e0   :  { %7523 = vmatmul.mubr.msk.f32.vlgmr.msra.gmra.mrb[42].mxu0 %vm1804_vm15, %v3165_v0 }
 0x8e1   :  { %v3452_v0 = vsel %vm512_vm5, %v6841_v18, %v8003_v30  ;;  %v3453_v40 = vsel %vm512_vm5, %v6842_v31, %v8004_v60  ;;  %v8007_v35 = vpop.permute.xlu1 %8006  ;;  %v11592_v31 = vld [vmem:[#allocation4_spill] sm:$0xff] }
 0x8e2   :  { %v7862_v12 = vpack.c.bf16 %v3453_v40, %v3452_v0  ;;  %v8009_v59 = vunpack.i.h.bf16 %v8007_v35  ;;  %v8008_v47 = vunpack.i.l.bf16 %v8007_v35  ;;  %v3406_v60 = vrot.slane %v10088_v10, %v11592_v31  ;;  %v11601_v31 = vld [vmem:[#allocation9_spill] sm:$0xff] }
 0x8e4   :  { %7863 = vmatprep.subr.bf16.mxu0 %v7862_v12  ;;  %v3454_v4 = vsel %vm512_vm5, %v6843_v55, %v8008_v47  ;;  %v3455_v28 = vsel %vm512_vm5, %v6844_v20, %v8009_v59 }
 0x8e5   :  { %7865 = vmatpush3.bf16.msra.mxu0 %v7862_v12  ;;  %v7866_v29 = vpack.c.bf16 %v3455_v28, %v3454_v4 }
 0x8e7   :  { %7867 = vmatprep.subr.bf16.mxu0 %v7866_v29 }
 0x8e9   :  { %7869 = vmatpush3.bf16.msra.mxu0 %v7866_v29 }
 0x9b3   :  { %v7524_v48 = vpop.f32.mrb[42].mxu0 }
 0x9b4   :  { %v3286_v13 = vadd.f32 %v7524_v48, %v3169_v27  ;;  %v3280_v21 = vpop.f32.mrb[43].mxu0  ;;  %v8599_v48 = vld [vmem:[%s11406_s3 + $0x28] sm:$0xff] }
 0x9b5   :  { %v3281_v41 = vadd.f32 %v3280_v21, %v3169_v27  ;;  %v8598_v27 = vld [vmem:[%s11406_s3 + $0x20] sm:$0xff]  ;;  %v8601_v21 = vld [vmem:[%s11406_s3 + $0x38] sm:$0xff] }
 0x9b6   :  { %v6838_v46 = vmul.f32 -1.442695, %v3286_v13 }
 0x9b7   :  { %v6837_v15 = vmul.f32 -1.442695, %v3281_v41 }
 0x9b8   :  { %8284 = vpow2.f32 %v6838_v46  ;;  %v8603_v46 = vld [vmem:[%s11406_s3 + $0x48] sm:$0xff] }
 0x9b9   :  { %8286 = vpow2.f32 %v6837_v15  ;;  %v8604_v15 = vld [vmem:[%s11406_s3 + $0x50] sm:$0xff] }
 0x9c2   :  { %v8285_v57 = vpop.eup %8284 }
 0x9c3   :  { %v8287_v51 = vpop.eup %8286  ;;  %v3296_v38 = vadd.f32 1.0, %v8285_v57  ;;  %v8605_v57 = vld [vmem:[%s11406_s3 + $0x58] sm:$0xff] }
 0x9c4   :  { %v3295_v43 = vadd.f32 1.0, %v8287_v51  ;;  %v8606_v51 = vld [vmem:[%s11406_s3 + $0x60] sm:$0xff] }
 0x9c5   :  { %8288 = vrcp.f32 %v3296_v38  ;;  %v8607_v38 = vld [vmem:[%s11406_s3 + $0x68] sm:$0xff] }
 0x9c6   :  { %8290 = vrcp.f32 %v3295_v43  ;;  %v8608_v43 = vld [vmem:[%s11406_s3 + $0x70] sm:$0xff] }
 0x9cf   :  { %v8289_v25 = vpop.eup %8288 }
 0x9d0   :  { %v8291_v53 = vpop.eup %8290  ;;  %v3302_v58 = vmul.f32 %v8289_v25, %v3286_v13  ;;  %v8600_v13 = vld [vmem:[%s11406_s3 + $0x30] sm:$0xff] }
 0x9d1   :  { %v3301_v49 = vmul.f32 %v8291_v53, %v3281_v41  ;;  %v8602_v41 = vld [vmem:[%s11406_s3 + $0x40] sm:$0xff] }
 0x9d3   :  { %7533 = vmatprep.mubr.msk.f32.mxu1 %vm512_vm5, %v3301_v49 }
 0x9d4   :  { %7534 = vmatmul.mubr.msk.f32.vlgmr.msra.gmra.mrb[36].mxu1 %vm512_vm5, %v3302_v58 }
 0x9d5   :  { %7549 = vmatprep.mubr.msk.f32.mxu1 %vm164_vm3, %v8594_v9  ;;  %7548 = vmatpush3.msk.msra.mxu1 %vm748_vm4, %v3638_v32 }
 0x9d8   :  { %7550 = vmatmul.mubr.msk.f32.vlgmr.msra.gmra.mrb[38].mxu1 %vm164_vm3, %v8595_v45 }
 0x9d9   :  { %7552 = vmatprep.mubr.msk.f32.mxu1 %vm164_vm3, %v8596_v19 }
 0x9dc   :  { %7553 = vmatmul.mubr.msk.f32.gmra.mrb[40].mxu1 %vm164_vm3, %v8597_v24  ;;  %v6850_v24 = vld [vmem:[%s11404_s7 + $0x1e8] sm:$0xff] }
 0x9dd   :  { %7555 = vmatprep.mubr.msk.f32.mxu1 %vm164_vm3, %v8598_v27  ;;  %v6851_v27 = vld [vmem:[%s11404_s7 + $0x1f0] sm:$0xff] }
 0x9e0   :  { %7556 = vmatmul.mubr.msk.f32.gmra.mrb[42].mxu1 %vm164_vm3, %v8599_v48  ;;  %v4080_v48 = vrot.slane %v10134_v8, 5 }
 0x9e1   :  { %7558 = vmatprep.mubr.msk.f32.mxu1 %vm164_vm3, %v8600_v13  ;;  %v4081_v13 = vrot.slane %v6850_v24, 5 }
 0x9e4   :  { %7559 = vmatmul.mubr.msk.f32.gmra.mrb[44].mxu1 %vm164_vm3, %v8601_v21  ;;  %v4083_v21 = vrot.slane %v6851_v27, 5 }
 0x9e5   :  { %7561 = vmatprep.mubr.msk.f32.mxu1 %vm164_vm3, %v8602_v41  ;;  %v4082_v41 = vsel %vm748_vm4, %v4080_v48, %v4081_v13  ;;  %v10269_v48 = vrot.slane %v10134_v8, %v8830_v2 }
 0x9e7   :  { %v3906_v42 = vmul.f32 %v10269_v48, %v11613_v63 }
 0x9e8   :  { %7562 = vmatmul.mubr.msk.f32.gmra.mrb[46].mxu1 %vm164_vm3, %v8603_v46  ;;  %v4084_v46 = vsel %vm748_vm4, %v4081_v13, %v4083_v21 }
 0x9e9   :  { %7564 = vmatprep.mubr.msk.f32.mxu1 %vm164_vm3, %v8604_v15  ;;  %v7870_v15 = vpack.c.bf16 %v4084_v46, %v4082_v41 }
 0x9eb   :  { %7871 = vmatprep.subr.bf16.mxu0 %v7870_v15 }
 0x9ec   :  { %7565 = vmatmul.mubr.msk.f32.gmra.mrb[48].mxu1 %vm164_vm3, %v8605_v57  ;;  %v6852_v57 = vld [vmem:[%s11404_s7 + $0x1f8] sm:$0xff] }
 0x9ed   :  { %7567 = vmatprep.mubr.msk.f32.mxu1 %vm164_vm3, %v8606_v51  ;;  %v10260_v51 = vld [vmem:[%s11404_s7 + $0x200] sm:$0xff] }
 0x9ee   :  { %11597 = vst [vmem:[#allocation40_spill] sm:$0xff] %v10260_v51 }
 0x9f0   :  { %7568 = vmatmul.mubr.msk.f32.gmra.mrb[50].mxu1 %vm164_vm3, %v8607_v38  ;;  %v4085_v38 = vrot.slane %v6852_v57, 5 }
 0x9f1   :  { %7570 = vmatprep.mubr.msk.f32.mxu1 %vm164_vm3, %v8608_v43  ;;  %v4087_v43 = vrot.slane %v10260_v51, 5 }
 0x9f4   :  { %7571 = vmatmul.mubr.msk.f32.gmra.mrb[52].mxu1 %vm164_vm3, %v8609_v16  ;;  %v4086_v16 = vsel %vm748_vm4, %v4083_v21, %v4085_v38 }
 0xaa7   :  { %v7535_v18 = vpop.f32.mrb[36].mxu1 }
 0xaa8   :  { %v3402_v30 = vadd.f32 %v7535_v18, %v11589_v36  ;;  %v3392_v0 = vpop.f32.mrb[37].mxu1  ;;  %v4088_v18 = vsel %vm748_vm4, %v4085_v38, %v4087_v43 }
 0xaa9   :  { %v3401_v40 = vadd.f32 %v3392_v0, %v11587_v54  ;;  %v11598_v0 = vld [vmem:[#allocation13_spill] sm:$0xff] }
 0xaaa   :  { %v10205_v25 = vadd.f32 %v3406_v60, %v3402_v30 }
 0xaab   :  { %v10203_v12 = vadd.f32 %v3406_v60, %v3401_v40  ;;  %v10211_v53 = vpop.f32.mrb[38].mxu1  ;;  %v7874_v60 = vpack.c.bf16 %v4088_v18, %v4086_v16  ;;  %v11600_v16 = vld [vmem:[#allocation8_spill] sm:$0xff] }
 0xaac   :  { %11594 = vst [vmem:[#allocation43_spill] sm:$0xff] %v10205_v25  ;;  %v10213_v49 = vpop.f32.mrb[39].mxu1 }
 0xaad   :  { %11593 = vst [vmem:[#allocation45_spill] sm:$0xff] %v10203_v12  ;;  %7544 = vmatprep.mubr.msk.f32.mxu0 %vm512_vm5, %v10203_v12 }
 0xaae   :  { %7545 = vmatmul.mubr.msk.f32.vlgmr.msra.gmra.mrb[44].mxu0 %vm512_vm5, %v10205_v25 }
 0xaaf   :  { %v10215_v10 = vpop.f32.mrb[40].mxu1  ;;  %7873 = vmatpush3.bf16.msra.mxu0 %v7870_v15  ;;  %v11599_v15 = vld [vmem:[#allocation7_spill] sm:$0xff] }
 0xab0   :  { %v10217_v36 = vpop.f32.mrb[41].mxu1  ;;  %7875 = vmatprep.subr.bf16.mxu0 %v7874_v60  ;;  %v3892_v57 = vmul.f32 %v10269_v48, %v11599_v15  ;;  %v10287_v15 = vmul.f32 %v10269_v48, %v11603_v22  ;;  %v11607_v22 = vld [vmem:[#allocation16_spill] sm:$0xff] }
 0xab1   :  { %v10309_v12 = vmul.f32 %v10269_v48, %v11607_v22  ;;  %v3907_v22 = vmul.f32 %v10269_v48, %v11612_v39 }
 0xab3   :  { %v10219_v58 = vpop.f32.mrb[42].mxu1  ;;  %7877 = vmatpush3.bf16.msra.mxu0 %v7874_v60  ;;  %11608 = vst [vmem:[#allocation41_spill] sm:$0xff] %v10309_v12 }
 0xab4   :  { %v10221_v54 = vpop.f32.mrb[43].mxu1 }
 0xab7   :  { %v10223_v9 = vpop.f32.mrb[44].mxu1 }
 0xab8   :  { %v10225_v35 = vpop.f32.mrb[45].mxu1 }
 0xabb   :  { %v10227_v59 = vpop.f32.mrb[46].mxu1 }
 0xabc   :  { %v10229_v47 = vpop.f32.mrb[47].mxu1 }
 0xabf   :  { %v10231_v55 = vpop.f32.mrb[48].mxu1 }
 0xac0   :  { %11595 = vst [vmem:[#allocation42_spill] sm:$0xff] %v10231_v55  ;;  %v10233_v20 = vpop.f32.mrb[49].mxu1 }
 0xac1   :  { %11596 = vst [vmem:[#allocation44_spill] sm:$0xff] %v10233_v20 }
 0xac3   :  { %v10235_v4 = vpop.f32.mrb[50].mxu1 }
 0xac4   :  { %v10237_v28 = vpop.f32.mrb[51].mxu1 }
 0xac7   :  { %v10239_v29 = vpop.f32.mrb[52].mxu1 }
 0xac8   :  { %v10241_v32 = vpop.f32.mrb[53].mxu1 }
 0xb81   :  { %v7546_v45 = vpop.f32.mrb[44].mxu0 }
 0xb82   :  { %3868 = vrot.lane.b32.xlu1 %v7546_v45, %s8629_s6  ;;  %v3528_v19 = vpop.f32.mrb[45].mxu0  ;;  %v3588_v30 = vcombine.high %v7546_v45, %v7546_v45  ;;  %v3595_v21 = vrot.slane %v7546_v45, %v11598_v0  ;;  %v3895_v45 = vmul.f32 %v10269_v48, %v11602_v52  ;;  %v11606_v52 = vld [vmem:[#allocation15_spill] sm:$0xff] }
 0xb83   :  { %3866 = vrot.lane.b32.xlu0 %v3528_v19, %s8629_s6  ;;  %v3539_v24 = vcombine.high %v3528_v19, %v3528_v19  ;;  %v3546_v27 = vrot.slane %v3528_v19, %v11598_v0  ;;  %v3893_v19 = vmul.f32 %v10269_v48, %v11600_v16  ;;  %v11605_v16 = vld [vmem:[#allocation14_spill] sm:$0xff]  ;;  %v10305_v26 = vmul.f32 %v10269_v48, %v11606_v52 }
 0xb84   :  { %v3602_v40 = vrot.slane %v3588_v30, %v11598_v0  ;;  %v10295_v25 = vmul.f32 %v10269_v48, %v11605_v16  ;;  %v3904_v52 = vmul.f32 %v10269_v48, %v11611_v17 }
 0xb85   :  { %v3553_v41 = vrot.slane %v3539_v24, %v11598_v0  ;;  %v3554_v46 = vcombine.high %v3546_v27, %v3546_v27  ;;  %v3562_v60 = vrot.slane %v3546_v27, %v11598_v0  ;;  %v3894_v24 = vmul.f32 %v10269_v48, %v11601_v31 }
 0xb86   :  { %v3604_v13 = vcombine.high %v3602_v40, %v3602_v40  ;;  %v3618_v38 = vrot.slane %v3602_v40, %v11598_v0  ;;  %v11604_v40 = vld [vmem:[#allocation12_spill] sm:$0xff]  ;;  %v3603_v27 = vcombine.high %v3595_v21, %v3595_v21 }
 0xb87   :  { %v3555_v18 = vcombine.high %v3553_v41, %v3553_v41  ;;  %v3576_v30 = vrot.slane %v3554_v46, %v11598_v0  ;;  %v10298_v46 = vrot.slane %v3595_v21, %v11598_v0  ;;  %v10301_v31 = vrot.slane %v3553_v41, %v11598_v0 }
 0xb88   :  { %v3632_v43 = vrot.slane %v3604_v13, %v11598_v0  ;;  %v10291_v13 = vmul.f32 %v10269_v48, %v11604_v40  ;;  %v3634_v56 = vcombine.high %v3618_v38, %v3618_v38  ;;  %v3584_v7 = vcombine.high %v3562_v60, %v3562_v60 }
 0xb89   :  { %v3583_v16 = vrot.slane %v3555_v18, %v11598_v0  ;;  %v3586_v11 = vcombine.high %v3576_v30, %v3576_v30  ;;  %v3905_v21 = vmul.f32 %v10269_v48, %v11609_v61  ;;  %v10316_v41 = vrot.slane %v10134_v8, %v11610_v50 }
 0xb8a   :  { %v3636_v40 = vcombine.high %v3632_v43, %v3632_v43  ;;  %v10325_v18 = vrot.slane %v3603_v27, %v11598_v0  ;;  %v3633_v33 = vcombine.high %v10298_v46, %v10298_v46  ;;  %v3585_v61 = vcombine.high %v10301_v31, %v10301_v31 }
 0xb8b   :  { %v3789_v8 = vrot.slane %v3562_v60, %v8830_v2  ;;  %v3841_v50 = vrot.slane %v3632_v43, %v8830_v2  ;;  %v3837_v17 = vrot.slane %v3618_v38, %v8830_v2  ;;  %v3845_v44 = vrot.slane %v3634_v56, %v8830_v2 }
 0xb8c   :  { %v3849_v39 = vrot.slane %v3636_v40, %v8830_v2  ;;  %v3587_v63 = vcombine.high %v3583_v16, %v3583_v16  ;;  %v3793_v27 = vrot.slane %v3576_v30, %v8830_v2  ;;  %v3797_v0 = vrot.slane %v3584_v7, %v8830_v2 }
 0xb8d   :  { %v3801_v5 = vrot.slane %v3586_v11, %v8830_v2 }
 0xbf4   :  { %v10339_v6 = vpop.permute.xlu1 %3868 }
 0xbf5   :  { %v3885_v1 = vadd.f32 %v10339_v6, %v3841_v50  ;;  %v3867_v60 = vpop.permute.xlu0 %3866  ;;  %v3884_v43 = vadd.f32 %v10339_v6, %v3837_v17  ;;  %v3887_v38 = vadd.f32 %v10339_v6, %v3849_v39  ;;  %v3886_v40 = vadd.f32 %v10339_v6, %v3845_v44 }
 0xbf6   :  { %v3873_v62 = vadd.f32 %v3867_v60, %v3793_v27  ;;  %v3872_v56 = vadd.f32 %v3867_v60, %v3789_v8  ;;  %v3874_v3 = vadd.f32 %v3867_v60, %v3797_v0  ;;  %v3875_v34 = vadd.f32 %v3867_v60, %v3801_v5 }
 0xbf7   :  { %v3921_v30 = vadd.f32 %v3905_v21, %v3885_v1  ;;  %v3920_v51 = vadd.f32 %v3904_v52, %v3884_v43  ;;  %v3923_v7 = vadd.f32 %v3907_v22, %v3887_v38  ;;  %v3922_v55 = vadd.f32 %v3906_v42, %v3886_v40 }
 0xbf8   :  { %v3908_v11 = vadd.f32 %v3892_v57, %v3872_v56  ;;  %v3909_v20 = vadd.f32 %v3893_v19, %v3873_v62  ;;  %v3910_v12 = vadd.f32 %v3894_v24, %v3874_v3  ;;  %v3911_v37 = vadd.f32 %v3895_v45, %v3875_v34 }
 0xbf9   :  { %v3937_v50 = vadd.f32 %v10235_v4, %v3921_v30  ;;  %v3936_v17 = vadd.f32 %v3920_v51, %v10237_v28  ;;  %v10348_v39 = vadd.f32 %v10239_v29, %v3923_v7  ;;  %v10351_v44 = vadd.f32 %v3922_v55, %v10241_v32  ;;  %v11614_v7 = vld [vmem:[#allocation19_spill] sm:$0xff] }
 0xbfa   :  { %v3924_v5 = vadd.f32 %v3908_v11, %v10213_v49  ;;  %v3925_v1 = vadd.f32 %v10211_v53, %v3909_v20  ;;  %v3926_v42 = vadd.f32 %v3910_v12, %v10217_v36  ;;  %v3927_v62 = vadd.f32 %v10215_v10, %v3911_v37 }
 0xbfb   :  { %v3897_v34 = vmul.f32 %v10269_v48, %v9059_v14  ;;  %v3899_v3 = vmul.f32 %v10269_v48, %v9079_v23  ;;  %v3635_v22 = vcombine.high %v10325_v18, %v10325_v18  ;;  %v3805_v52 = vrot.slane %v10301_v31, %v8830_v2 }
 0xbfc   :  { %v3821_v49 = vrot.slane %v10298_v46, %v8830_v2  ;;  %v3809_v53 = vrot.slane %v3583_v16, %v8830_v2  ;;  %v10369_v12 = vadd.f32 %v10316_v41, %v3924_v5  ;;  %v10372_v37 = vadd.f32 %v10316_v41, %v3925_v1 }
 0xbfd   :  { %v3825_v10 = vrot.slane %v10325_v18, %v8830_v2  ;;  %v3829_v36 = vrot.slane %v3633_v33, %v8830_v2  ;;  %v10378_v55 = vadd.f32 %v10316_v41, %v3926_v42  ;;  %v3876_v31 = vadd.f32 %v3867_v60, %v3805_v52  ;;  %v11615_v42 = vld [vmem:[#allocation41_spill] sm:$0xff] }
 0xbfe   :  { %v3813_v20 = vrot.slane %v3585_v61, %v8830_v2  ;;  %v3817_v4 = vrot.slane %v3587_v63, %v8830_v2  ;;  %v10383_v28 = vadd.f32 %v10316_v41, %v3927_v62  ;;  %v3877_v29 = vadd.f32 %v3867_v60, %v3809_v53 }
 0xbff   :  { %v3833_v32 = vrot.slane %v3635_v22, %v8830_v2  ;;  %v10387_v51 = vadd.f32 %v10316_v41, %v3937_v50  ;;  %v6886_v0 = vmul.f32 -1.442695, %v10369_v12  ;;  %v3912_v33 = vadd.f32 %v10287_v15, %v3876_v31 }
 0xc00   :  { %v6887_v57 = vmul.f32 -1.442695, %v10372_v37  ;;  %v3913_v16 = vadd.f32 %v3897_v34, %v3877_v29  ;;  %v3878_v19 = vadd.f32 %v3867_v60, %v3813_v20  ;;  %v3879_v61 = vadd.f32 %v3867_v60, %v3817_v4 }
 0xc01   :  { %v6888_v63 = vmul.f32 -1.442695, %v10378_v55  ;;  %v3928_v24 = vadd.f32 %v3912_v33, %v10221_v54  ;;  %v3880_v45 = vadd.f32 %v10339_v6, %v3821_v49  ;;  %v3881_v46 = vadd.f32 %v10339_v6, %v3825_v10 }
 0xc02   :  { %v6889_v21 = vmul.f32 -1.442695, %v10383_v28  ;;  %v3929_v18 = vadd.f32 %v10219_v58, %v3913_v16  ;;  %v3914_v8 = vadd.f32 %v10291_v13, %v3878_v19  ;;  %v3915_v15 = vadd.f32 %v3899_v3, %v3879_v61  ;;  %v11617_v3 = vld [vmem:[#allocation42_spill] sm:$0xff] }
 0xc03   :  { %8292 = vpow2.f32 %v6886_v0  ;;  %v10400_v27 = vadd.f32 %v10316_v41, %v3928_v24  ;;  %v3916_v60 = vadd.f32 %v10295_v25, %v3880_v45  ;;  %v3917_v43 = vadd.f32 %v10305_v26, %v3881_v46 }
 0xc04   :  { %8294 = vpow2.f32 %v6887_v57  ;;  %v10405_v54 = vadd.f32 %v10316_v41, %v3929_v18  ;;  %v3930_v38 = vadd.f32 %v3914_v8, %v10225_v35  ;;  %v3931_v40 = vadd.f32 %v10223_v9, %v3915_v15 }
 0xc05   :  { %8296 = vpow2.f32 %v6888_v63  ;;  %v6890_v58 = vmul.f32 -1.442695, %v10400_v27  ;;  %v3932_v13 = vadd.f32 %v3916_v60, %v10229_v47  ;;  %v3933_v56 = vadd.f32 %v10227_v59, %v3917_v43 }
 0xc06   :  { %8298 = vpow2.f32 %v6889_v21  ;;  %v6891_v25 = vmul.f32 -1.442695, %v10405_v54  ;;  %v10414_v26 = vadd.f32 %v10316_v41, %v3930_v38  ;;  %v10417_v30 = vadd.f32 %v10316_v41, %v3931_v40 }
 0xc07   :  { %v3902_v35 = vmul.f32 %v10269_v48, %v11614_v7  ;;  %v10422_v9 = vadd.f32 %v10316_v41, %v3936_v17  ;;  %8300 = vpow2.f32 %v6890_v58  ;;  %v3882_v47 = vadd.f32 %v10339_v6, %v3829_v36  ;;  %v11616_v17 = vld [vmem:[#allocation44_spill] sm:$0xff] }
 0xc08   :  { %8302 = vpow2.f32 %v6891_v25  ;;  %v6892_v59 = vmul.f32 -1.442695, %v10414_v26  ;;  %v6893_v11 = vmul.f32 -1.442695, %v10417_v30  ;;  %v3883_v50 = vadd.f32 %v10339_v6, %v3833_v32 }
 0xc09   :  { %v3918_v5 = vadd.f32 %v3902_v35, %v3882_v47  ;;  %v6899_v1 = vmul.f32 -1.442695, %v10387_v51  ;;  %v6898_v48 = vmul.f32 -1.442695, %v10422_v9  ;;  %v10434_v10 = vadd.f32 %v10316_v41, %v3932_v13 }
 0xc0a   :  { %8304 = vpow2.f32 %v6892_v59  ;;  %v3919_v62 = vadd.f32 %v11615_v42, %v3883_v50  ;;  %v10437_v32 = vadd.f32 %v10316_v41, %v3933_v56  ;;  %v10448_v24 = vadd.f32 %v10316_v41, %v10351_v44 }
 0xc0b   :  { %8306 = vpow2.f32 %v6893_v11  ;;  %v3934_v34 = vadd.f32 %v3918_v5, %v11616_v17  ;;  %v6894_v57 = vmul.f32 -1.442695, %v10434_v10  ;;  %v10454_v15 = vadd.f32 %v10316_v41, %v10348_v39 }
 0xc0c   :  { %v3935_v22 = vadd.f32 %v11617_v3, %v3919_v62  ;;  %8308 = vpow2.f32 %v6899_v1  ;;  %v6895_v21 = vmul.f32 -1.442695, %v10437_v32  ;;  %v6900_v44 = vmul.f32 -1.442695, %v10448_v24 }
 0xc0d   :  { %v8293_v52 = vpop.eup %8292  ;;  %8310 = vpow2.f32 %v6898_v48  ;;  %v10441_v16 = vadd.f32 %v10316_v41, %v3934_v34  ;;  %v6901_v13 = vmul.f32 -1.442695, %v10454_v15 }
 0xc0e   :  { %v8295_v49 = vpop.eup %8294  ;;  %v4008_v53 = vadd.f32 1.0, %v8293_v52  ;;  %v10444_v61 = vadd.f32 %v10316_v41, %v3935_v22 }
 0xc0f   :  { %v8297_v6 = vpop.eup %8296  ;;  %v4009_v36 = vadd.f32 1.0, %v8295_v49  ;;  %v6896_v8 = vmul.f32 -1.442695, %v10441_v16 }
 0xc10   :  { %v8299_v31 = vpop.eup %8298  ;;  %8312 = vrcp.f32 %v4008_v53  ;;  %v4010_v20 = vadd.f32 1.0, %v8297_v6  ;;  %v6897_v60 = vmul.f32 -1.442695, %v10444_v61 }
 0xc11   :  { %v8301_v4 = vpop.eup %8300  ;;  %8314 = vrcp.f32 %v4009_v36  ;;  %v4011_v29 = vadd.f32 1.0, %v8299_v31 }
 0xc12   :  { %v8303_v0 = vpop.eup %8302  ;;  %8316 = vrcp.f32 %v4010_v20  ;;  %v4012_v33 = vadd.f32 1.0, %v8301_v4 }
 0xc13   :  { %8318 = vrcp.f32 %v4011_v29  ;;  %v4013_v19 = vadd.f32 1.0, %v8303_v0 }
 0xc14   :  { %v8305_v63 = vpop.eup %8304  ;;  %8320 = vrcp.f32 %v4012_v33 }
 0xc15   :  { %v8307_v45 = vpop.eup %8306  ;;  %8322 = vrcp.f32 %v4013_v19  ;;  %v4014_v46 = vadd.f32 1.0, %v8305_v63 }
 0xc16   :  { %v4015_v18 = vadd.f32 1.0, %v8307_v45  ;;  %8324 = vpow2.f32 %v6894_v57  ;;  %v8309_v43 = vpop.eup %8308 }
 0xc17   :  { %8326 = vrcp.f32 %v4014_v46  ;;  %v8311_v38 = vpop.eup %8310  ;;  %v4021_v52 = vadd.f32 1.0, %v8309_v43  ;;  %v10510_v43 = vld [vmem:[%s11404_s7 + $0x230] sm:$0xff] }
 0xc18   :  { %8328 = vrcp.f32 %v4015_v18  ;;  %v4020_v34 = vadd.f32 1.0, %v8311_v38 }
 0xc19   :  { %8330 = vpow2.f32 %v6895_v21 }
 0xc1a   :  { %v8313_v40 = vpop.eup %8312  ;;  %8332 = vpow2.f32 %v6896_v8  ;;  %v6857_v8 = vld [vmem:[%s11404_s7 + $0x220] sm:$0xff] }
 0xc1b   :  { %v8315_v58 = vpop.eup %8314  ;;  %v4056_v56 = vmul.f32 %v8313_v40, %v10369_v12  ;;  %8334 = vpow2.f32 %v6897_v60  ;;  %v6858_v60 = vld [vmem:[%s11404_s7 + $0x228] sm:$0xff]  ;;  %v4590_v40 = vrot.slane %v10510_v43, 6 }
 0xc1c   :  { %v8317_v25 = vpop.eup %8316  ;;  %8336 = vpow2.f32 %v6900_v44  ;;  %v4057_v41 = vmul.f32 %v8315_v58, %v10372_v37  ;;  %v4586_v44 = vrot.slane %v6857_v8, 6  ;;  %v4588_v38 = vrot.slane %v6858_v60, 6 }
 0xc1d   :  { %v8319_v39 = vpop.eup %8318  ;;  %7581 = vmatprep.mubr.msk.f32.mxu0 %vm512_vm5, %v4056_v56  ;;  %v4058_v35 = vmul.f32 %v8317_v25, %v10378_v55  ;;  %8338 = vpow2.f32 %v6901_v13 }
 0xc1e   :  { %v8321_v47 = vpop.eup %8320  ;;  %7582 = vmatmul.mubr.msk.f32.vlgmr.msra.gmra.mrb[46].mxu0 %vm512_vm5, %v4057_v41  ;;  %v4059_v12 = vmul.f32 %v8319_v39, %v10383_v28 }
 0xc1f   :  { %v8323_v59 = vpop.eup %8322  ;;  %7584 = vmatprep.mubr.msk.f32.mxu0 %vm512_vm5, %v4058_v35  ;;  %v4060_v5 = vmul.f32 %v8321_v47, %v10400_v27  ;;  %v4589_v35 = vsel %vm1776_vm6, %v4586_v44, %v4588_v38  ;;  %v4591_v47 = vsel %vm1776_vm6, %v4588_v38, %v4590_v40 }
 0xc20   :  { %v8325_v11 = vpop.eup %8324  ;;  %v4061_v62 = vmul.f32 %v8323_v59, %v10405_v54  ;;  %v7886_v59 = vpack.c.bf16 %v4591_v47, %v4589_v35 }
 0xc21   :  { %v8327_v50 = vpop.eup %8326  ;;  %v4016_v1 = vadd.f32 1.0, %v8325_v11  ;;  %v11619_v11 = vld [vmem:[#allocation6_spill] sm:$0xff] }
 0xc22   :  { %v8329_v37 = vpop.eup %8328  ;;  %7585 = vmatmul.mubr.msk.f32.gmra.mrb[48].mxu0 %vm512_vm5, %v4059_v12  ;;  %v4062_v3 = vmul.f32 %v8327_v50, %v10414_v26 }
 0xc23   :  { %v8331_v42 = vpop.eup %8330  ;;  %7587 = vmatprep.mubr.msk.f32.mxu0 %vm512_vm5, %v4060_v5  ;;  %8340 = vrcp.f32 %v4016_v1  ;;  %v4063_v49 = vmul.f32 %v8329_v37, %v10417_v30 }
 0xc24   :  { %v8333_v55 = vpop.eup %8332  ;;  %v4017_v48 = vadd.f32 1.0, %v8331_v42 }
 0xc25   :  { %v8335_v17 = vpop.eup %8334  ;;  %v4018_v28 = vadd.f32 1.0, %v8333_v55 }
 0xc26   :  { %v8337_v22 = vpop.eup %8336  ;;  %7588 = vmatmul.mubr.msk.f32.gmra.mrb[50].mxu0 %vm512_vm5, %v4061_v62  ;;  %8342 = vrcp.f32 %v4017_v48  ;;  %v4019_v27 = vadd.f32 1.0, %v8335_v17 }
 0xc27   :  { %7590 = vmatprep.mubr.msk.f32.mxu0 %vm512_vm5, %v4062_v3  ;;  %8344 = vrcp.f32 %v4018_v28  ;;  %v8339_v53 = vpop.eup %8338  ;;  %v4022_v54 = vadd.f32 1.0, %v8337_v22 }
 0xc28   :  { %8346 = vrcp.f32 %v4019_v27  ;;  %v4023_v26 = vadd.f32 1.0, %v8339_v53 }
 0xc29   :  { %8348 = vrcp.f32 %v4020_v34 }
 0xc2a   :  { %7591 = vmatmul.mubr.msk.f32.gmra.mrb[52].mxu0 %vm512_vm5, %v4063_v49  ;;  %8350 = vrcp.f32 %v4021_v52 }
 0xc2b   :  { %8352 = vrcp.f32 %v4022_v54 }
 0xc2c   :  { %8354 = vrcp.f32 %v4023_v26 }
 0xc2d   :  { %v8341_v6 = vpop.eup %8340 }
 0xc2e   :  { %v4064_v36 = vmul.f32 %v8341_v6, %v10434_v10 }
 0xc30   :  { %v8343_v31 = vpop.eup %8342  ;;  %7593 = vmatprep.mubr.msk.f32.mxu0 %vm512_vm5, %v4064_v36 }
 0xc31   :  { %v8345_v20 = vpop.eup %8344  ;;  %v4065_v4 = vmul.f32 %v8343_v31, %v10437_v32 }
 0xc32   :  { %v8347_v30 = vpop.eup %8346  ;;  %v4066_v29 = vmul.f32 %v8345_v20, %v10441_v16 }
 0xc33   :  { %v8349_v0 = vpop.eup %8348  ;;  %7594 = vmatmul.mubr.msk.f32.gmra.mrb[54].mxu0 %vm512_vm5, %v4065_v4  ;;  %v4067_v33 = vmul.f32 %v8347_v30, %v10444_v61  ;;  %v6855_v61 = vld [vmem:[%s11404_s7 + $0x210] sm:$0xff] }
 0xc34   :  { %7596 = vmatprep.mubr.msk.f32.mxu0 %vm512_vm5, %v4066_v29  ;;  %v8351_v57 = vpop.eup %8350  ;;  %v4068_v10 = vmul.f32 %v8349_v0, %v10422_v9  ;;  %v6854_v9 = vld [vmem:[%s11404_s7 + $0x208] sm:$0xff]  ;;  %v4582_v18 = vrot.slane %v6855_v61, 6 }
 0xc35   :  { %v8353_v19 = vpop.eup %8352  ;;  %v4069_v32 = vmul.f32 %v8351_v57, %v10387_v51  ;;  %v11618_v51 = vld [vmem:[#allocation40_spill] sm:$0xff]  ;;  %v4580_v21 = vrot.slane %v6854_v9, 6 }
 0xc36   :  { %v8355_v63 = vpop.eup %8354  ;;  %v4070_v16 = vmul.f32 %v8353_v19, %v10448_v24  ;;  %v4579_v46 = vrot.slane %v11618_v51, 6  ;;  %v6856_v24 = vld [vmem:[%s11404_s7 + $0x218] sm:$0xff]  ;;  %v10523_v12 = vrot.slane %v11618_v51, %v11619_v11 }
 0xc37   :  { %7597 = vmatmul.mubr.msk.f32.gmra.mrb[56].mxu0 %vm512_vm5, %v4067_v33  ;;  %v4071_v45 = vmul.f32 %v8355_v63, %v10454_v15  ;;  %v4584_v15 = vrot.slane %v6856_v24, 6  ;;  %v4583_v13 = vsel %vm1776_vm6, %v4580_v21, %v4582_v18 }
 0xc38   :  { %7599 = vmatprep.mubr.msk.f32.mxu0 %vm512_vm5, %v4068_v10  ;;  %v4581_v58 = vsel %vm1776_vm6, %v4579_v46, %v4580_v21 }
 0xc39   :  { %v4585_v56 = vsel %vm1776_vm6, %v4582_v18, %v4584_v15  ;;  %v7878_v25 = vpack.c.bf16 %v4583_v13, %v4581_v58  ;;  %v4587_v41 = vsel %vm1776_vm6, %v4584_v15, %v4586_v44 }
 0xc3a   :  { %v7882_v39 = vpack.c.bf16 %v4587_v41, %v4585_v56 }
 0xc3b   :  { %7600 = vmatmul.mubr.msk.f32.gmra.mrb[58].mxu0 %vm512_vm5, %v4069_v32  ;;  %7879 = vmatprep.subr.bf16.mxu1 %v7878_v25 }
 0xc3c   :  { %7602 = vmatprep.mubr.msk.f32.mxu0 %vm512_vm5, %v4070_v16  ;;  %7881 = vmatpush3.bf16.msra.mxu1 %v7878_v25 }
 0xc3d   :  { %7883 = vmatprep.subr.bf16.mxu1 %v7882_v39 }
 0xc3f   :  { %7603 = vmatmul.mubr.msk.f32.gmra.mrb[60].mxu0 %vm512_vm5, %v4071_v45 }
 0xc40   :  { %7885 = vmatpush3.bf16.msra.mxu1 %v7882_v39 }
 0xc41   :  { %7887 = vmatprep.subr.bf16.mxu1 %v7886_v59 }
 0xc44   :  { %7889 = vmatpush3.bf16.msra.mxu1 %v7886_v59 }
 0xcf1   :  { %v7583_v50 = vpop.f32.mrb[46].mxu0 }
 0xcf2   :  { %v10526_v5 = vadd.f32 %v7583_v50, %v10523_v12  ;;  %v4207_v1 = vpop.f32.mrb[47].mxu0 }
 0xcf3   :  { %v10529_v37 = vadd.f32 %v4207_v1, %v10523_v12 }
 0xcf4   :  { %v6919_v42 = vmul.f32 -1.442695, %v10526_v5 }
 0xcf5   :  { %v6918_v55 = vmul.f32 -1.442695, %v10529_v37  ;;  %v7586_v62 = vpop.f32.mrb[48].mxu0 }
 0xcf6   :  { %8356 = vpow2.f32 %v6919_v42  ;;  %v10534_v48 = vadd.f32 %v7586_v62, %v10523_v12  ;;  %v4217_v17 = vpop.f32.mrb[49].mxu0  ;;  %v11620_v42 = vld [vmem:[#allocation27_spill] sm:$0xff] }
 0xcf7   :  { %8358 = vpow2.f32 %v6918_v55  ;;  %v10537_v34 = vadd.f32 %v4217_v17, %v10523_v12 }
 0xcf8   :  { %v6921_v3 = vmul.f32 -1.442695, %v10534_v48 }
 0xcf9   :  { %v6920_v28 = vmul.f32 -1.442695, %v10537_v34  ;;  %v7589_v22 = vpop.f32.mrb[50].mxu0 }
 0xcfa   :  { %8360 = vpow2.f32 %v6921_v3  ;;  %v10542_v27 = vadd.f32 %v7589_v22, %v10523_v12  ;;  %v4227_v52 = vpop.f32.mrb[51].mxu0 }
 0xcfb   :  { %8362 = vpow2.f32 %v6920_v28  ;;  %v10545_v49 = vadd.f32 %v4227_v52, %v10523_v12 }
 0xcfc   :  { %v6923_v53 = vmul.f32 -1.442695, %v10542_v27 }
 0xcfd   :  { %v6922_v54 = vmul.f32 -1.442695, %v10545_v49  ;;  %v7592_v26 = vpop.f32.mrb[52].mxu0 }
 0xcfe   :  { %8364 = vpow2.f32 %v6923_v53  ;;  %v10550_v6 = vadd.f32 %v7592_v26, %v10523_v12  ;;  %v4237_v36 = vpop.f32.mrb[53].mxu0 }
 0xcff   :  { %8366 = vpow2.f32 %v6922_v54  ;;  %v10553_v31 = vadd.f32 %v4237_v36, %v10523_v12 }
 0xd00   :  { %v8357_v20 = vpop.eup %8356  ;;  %v6925_v4 = vmul.f32 -1.442695, %v10550_v6 }
 0xd01   :  { %v8359_v30 = vpop.eup %8358  ;;  %v4335_v29 = vadd.f32 1.0, %v8357_v20  ;;  %v6924_v0 = vmul.f32 -1.442695, %v10553_v31 }
 0xd02   :  { %v4334_v33 = vadd.f32 1.0, %v8359_v30  ;;  %8368 = vpow2.f32 %v6925_v4 }
 0xd03   :  { %8370 = vrcp.f32 %v4335_v29 }
 0xd04   :  { %v8361_v57 = vpop.eup %8360  ;;  %8372 = vrcp.f32 %v4334_v33 }
 0xd05   :  { %v8363_v10 = vpop.eup %8362  ;;  %v4337_v19 = vadd.f32 1.0, %v8361_v57  ;;  %8374 = vpow2.f32 %v6924_v0  ;;  %v11622_v0 = vld [vmem:[#allocation25_spill] sm:$0xff] }
 0xd06   :  { %v4336_v32 = vadd.f32 1.0, %v8363_v10  ;;  %v7595_v63 = vpop.f32.mrb[54].mxu0 }
 0xd07   :  { %8376 = vrcp.f32 %v4337_v19  ;;  %v10558_v16 = vadd.f32 %v7595_v63, %v10523_v12  ;;  %v4247_v45 = vpop.f32.mrb[55].mxu0  ;;  %v11623_v19 = vld [vmem:[#allocation23_spill] sm:$0xff] }
 0xd08   :  { %v8365_v9 = vpop.eup %8364  ;;  %8378 = vrcp.f32 %v4336_v32  ;;  %v10561_v61 = vadd.f32 %v4247_v45, %v10523_v12 }
 0xd09   :  { %v8367_v51 = vpop.eup %8366  ;;  %v4339_v46 = vadd.f32 1.0, %v8365_v9  ;;  %v6927_v24 = vmul.f32 -1.442695, %v10558_v16 }
 0xd0a   :  { %v4338_v21 = vadd.f32 1.0, %v8367_v51  ;;  %v7598_v18 = vpop.f32.mrb[56].mxu0  ;;  %v6926_v44 = vmul.f32 -1.442695, %v10561_v61 }
 0xd0b   :  { %8380 = vrcp.f32 %v4339_v46  ;;  %v10565_v8 = vadd.f32 %v7598_v18, %v10523_v12  ;;  %v4257_v15 = vpop.f32.mrb[57].mxu0 }
 0xd0c   :  { %v8369_v60 = vpop.eup %8368  ;;  %8382 = vrcp.f32 %v4338_v21  ;;  %v10569_v38 = vadd.f32 %v4257_v15, %v10523_v12 }
 0xd0d   :  { %v8371_v58 = vpop.eup %8370  ;;  %v4341_v13 = vadd.f32 1.0, %v8369_v60  ;;  %8384 = vpow2.f32 %v6927_v24  ;;  %v6929_v56 = vmul.f32 -1.442695, %v10565_v8 }
 0xd0e   :  { %v8373_v25 = vpop.eup %8372  ;;  %v4383_v41 = vmul.f32 %v8371_v58, %v10526_v5  ;;  %v7601_v39 = vpop.f32.mrb[58].mxu0  ;;  %v6928_v59 = vmul.f32 -1.442695, %v10569_v38  ;;  %v11621_v5 = vld [vmem:[#allocation22_spill] sm:$0xff]  ;;  %v11624_v58 = vld [vmem:[#allocation28_spill] sm:$0xff] }
 0xd0f   :  { %v8375_v35 = vpop.eup %8374  ;;  %v4382_v47 = vmul.f32 %v8373_v25, %v10529_v37  ;;  %8386 = vrcp.f32 %v4341_v13  ;;  %v10576_v50 = vadd.f32 %v7601_v39, %v10523_v12  ;;  %v4267_v1 = vpop.f32.mrb[59].mxu0  ;;  %v11625_v39 = vld [vmem:[#allocation26_spill] sm:$0xff] }
 0xd10   :  { %v4399_v55 = vmul.f32 %v4383_v41, %v11620_v42  ;;  %v4340_v62 = vadd.f32 1.0, %v8375_v35  ;;  %8388 = vpow2.f32 %v6926_v44  ;;  %v10580_v17 = vadd.f32 %v4267_v1, %v10523_v12 }
 0xd11   :  { %v8377_v3 = vpop.eup %8376  ;;  %v4398_v28 = vmul.f32 %v4382_v47, %v11621_v5  ;;  %8390 = vpow2.f32 %v6929_v56  ;;  %v6931_v37 = vmul.f32 -1.442695, %v10576_v50 }
 0xd12   :  { %v8379_v22 = vpop.eup %8378  ;;  %v4421_v52 = vsel %vm512_vm5, %v4399_v55, 0.0  ;;  %v4385_v53 = vmul.f32 %v8377_v3, %v10534_v48  ;;  %8392 = vrcp.f32 %v4340_v62  ;;  %v6930_v54 = vmul.f32 -1.442695, %v10580_v17  ;;  %v7604_v26 = vpop.f32.mrb[60].mxu0 }
 0xd13   :  { %v4422_v36 = vrot.slane %v4421_v52, 4  ;;  %v4414_v20 = vsel %vm512_vm5, %v4398_v28, 0.0  ;;  %v4384_v4 = vmul.f32 %v8379_v22, %v10537_v34  ;;  %8394 = vpow2.f32 %v6928_v59  ;;  %v4277_v30 = vpop.f32.mrb[61].mxu0 }
 0xd14   :  { %v4415_v29 = vrot.slane %v4414_v20, 4  ;;  %v4401_v33 = vmul.f32 %v4385_v53, %v11622_v0  ;;  %8396 = vpow2.f32 %v6931_v37  ;;  %v10591_v57 = vadd.f32 %v7604_v26, %v10523_v12 }
 0xd15   :  { %v8381_v10 = vpop.eup %8380  ;;  %v4423_v48 = vadd.f32 %v4422_v36, %v4421_v52  ;;  %v4400_v32 = vmul.f32 %v4384_v4, %v11623_v19  ;;  %8398 = vpow2.f32 %v6930_v54  ;;  %v10597_v51 = vadd.f32 %v4277_v30, %v10523_v12  ;;  %v11626_v36 = vld [vmem:[#allocation32_spill] sm:$0xff] }
 0xd16   :  { %v8383_v63 = vpop.eup %8382  ;;  %v4416_v45 = vadd.f32 %v4415_v29, %v4414_v20  ;;  %v4435_v9 = vsel %vm512_vm5, %v4401_v33, 0.0  ;;  %v4387_v34 = vmul.f32 %v8381_v10, %v10542_v27  ;;  %v10603_v56 = vmul.f32 -1.442695, %v10591_v57 }
 0xd17   :  { %v8385_v46 = vpop.eup %8384  ;;  %v4424_v24 = vrot.slane %v4423_v48, 2  ;;  %v4436_v21 = vrot.slane %v4435_v9, 4  ;;  %v4428_v18 = vsel %vm512_vm5, %v4400_v32, 0.0  ;;  %v4386_v15 = vmul.f32 %v8383_v63, %v10545_v49 }
 0xd18   :  { %v4417_v60 = vrot.slane %v4416_v45, 2  ;;  %v4429_v44 = vrot.slane %v4428_v18, 4  ;;  %v4403_v13 = vmul.f32 %v4387_v34, %v11624_v58  ;;  %v4343_v35 = vadd.f32 1.0, %v8385_v46 }
 0xd19   :  { %v8387_v25 = vpop.eup %8386  ;;  %v4425_v41 = vadd.f32 %v4424_v24, %v4423_v48  ;;  %v4437_v27 = vadd.f32 %v4436_v21, %v4435_v9  ;;  %v4402_v12 = vmul.f32 %v4386_v15, %v11625_v39  ;;  %v11627_v21 = vld [vmem:[#allocation30_spill] sm:$0xff] }
 0xd1a   :  { %v8389_v47 = vpop.eup %8388  ;;  %v4418_v59 = vadd.f32 %v4417_v60, %v4416_v45  ;;  %v4430_v1 = vadd.f32 %v4429_v44, %v4428_v18  ;;  %v4449_v55 = vsel %vm512_vm5, %v4403_v13, 0.0  ;;  %v4389_v49 = vmul.f32 %v8387_v25, %v10550_v6 }
 0xd1b   :  { %v8391_v62 = vpop.eup %8390  ;;  %v4426_v3 = vrot.slane %v4425_v41, 1  ;;  %v4438_v28 = vrot.slane %v4437_v27, 2  ;;  %v4450_v37 = vrot.slane %v4449_v55, 4  ;;  %v4442_v22 = vsel %vm512_vm5, %v4402_v12, 0.0 }
 0xd1c   :  { %v8393_v52 = vpop.eup %8392  ;;  %v4419_v53 = vrot.slane %v4418_v59, 1  ;;  %v4431_v54 = vrot.slane %v4430_v1, 2  ;;  %v4443_v26 = vrot.slane %v4442_v22, 4  ;;  %v4405_v20 = vmul.f32 %v4389_v49, %v11626_v36 }
 0xd1d   :  { %v8395_v4 = vpop.eup %8394  ;;  %v4439_v30 = vadd.f32 %v4438_v28, %v4437_v27  ;;  %v4451_v29 = vadd.f32 %v4450_v37, %v4449_v55  ;;  %v4388_v33 = vmul.f32 %v8393_v52, %v10553_v31  ;;  %v4342_v10 = vadd.f32 1.0, %v8389_v47  ;;  %v6860_v52 = vld [vmem:[%s11404_s7 + $0x238] sm:$0xff] }
 0xd1e   :  { %v8397_v48 = vpop.eup %8396  ;;  %v4427_v6 = vadd.f32 %v4426_v3, %v4425_v41  ;;  %v4432_v32 = vadd.f32 %v4431_v54, %v4430_v1  ;;  %v4444_v63 = vadd.f32 %v4443_v26, %v4442_v22  ;;  %v4463_v45 = vsel %vm512_vm5, %v4405_v20, 0.0 }
 0xd1f   :  { %v8399_v9 = vpop.eup %8398  ;;  %v4420_v34 = vadd.f32 %v4419_v53, %v4418_v59  ;;  %v4452_v46 = vrot.slane %v4451_v29, 2  ;;  %v4464_v24 = vrot.slane %v4463_v45, 4  ;;  %v4404_v18 = vmul.f32 %v4388_v33, %v11627_v21  ;;  %v6861_v53 = vld [vmem:[%s11404_s7 + $0x240] sm:$0xff]  ;;  %v10626_v33 = vld [vmem:[%s11404_s7 + $0x248] sm:$0xff] }
 0xd20   :  { %v4433_v15 = vrot.slane %v4432_v32, 1  ;;  %v4445_v60 = vrot.slane %v4444_v63, 2  ;;  %8400 = vrcp.f32 %v4343_v35  ;;  %v4345_v44 = vadd.f32 1.0, %v8391_v62 }
 0xd21   :  { %v4440_v13 = vrot.slane %v4439_v30, 1  ;;  %v4453_v25 = vadd.f32 %v4452_v46, %v4451_v29  ;;  %v4465_v31 = vadd.f32 %v4464_v24, %v4463_v45  ;;  %v4456_v27 = vsel %vm512_vm5, %v4404_v18, 0.0 }
 0xd22   :  { %v4434_v41 = vadd.f32 %v4433_v15, %v4432_v32  ;;  %v4446_v12 = vadd.f32 %v4445_v60, %v4444_v63  ;;  %v4457_v47 = vrot.slane %v4456_v27, 4  ;;  %8402 = vrcp.f32 %v4342_v10 }
 0xd23   :  { %v4454_v1 = vrot.slane %v4453_v25, 1  ;;  %v4466_v55 = vrot.slane %v4465_v31, 2  ;;  %8404 = vrcp.f32 %v4345_v44  ;;  %v4344_v59 = vadd.f32 1.0, %v8395_v4 }
 0xd24   :  { %v4447_v49 = vrot.slane %v4446_v12, 1  ;;  %v4458_v3 = vadd.f32 %v4457_v47, %v4456_v27  ;;  %v4347_v28 = vadd.f32 1.0, %v8397_v48  ;;  %v4346_v37 = vadd.f32 1.0, %v8399_v9 }
 0xd25   :  { %v4441_v22 = vadd.f32 %v4440_v13, %v4439_v30  ;;  %8406 = vrcp.f32 %v4344_v59  ;;  %v6932_v35 = vmul.f32 -1.442695, %v10597_v51  ;;  %v4467_v62 = vadd.f32 %v4466_v55, %v4465_v31  ;;  %v11628_v31 = vld [vmem:[#allocation29_spill] sm:$0xff] }
 0xd26   :  { %v4448_v54 = vadd.f32 %v4447_v49, %v4446_v12  ;;  %v4459_v26 = vrot.slane %v4458_v3, 2  ;;  %8408 = vrcp.f32 %v4347_v28  ;;  %v4542_v20 = vsel %vm331_vm7, %v4427_v6, %v4420_v34  ;;  %v11630_v28 = vld [vmem:[#allocation33_spill] sm:$0xff] }
 0xd27   :  { %8410 = vrcp.f32 %v4346_v37  ;;  %v4455_v4 = vadd.f32 %v4454_v1, %v4453_v25  ;;  %v4543_v30 = vsel %vm332_vm8, %v4434_v41, %v4542_v20  ;;  %v4592_v29 = vrot.slane %v6860_v52, 6  ;;  %v11629_v1 = vld [vmem:[#allocation24_spill] sm:$0xff] }
 0xd28   :  { %v4460_v10 = vadd.f32 %v4459_v26, %v4458_v3  ;;  %8412 = vpow2.f32 %v10603_v56  ;;  %v4544_v48 = vsel %vm334_vm9, %v4441_v22, %v4543_v30  ;;  %v4594_v32 = vrot.slane %v6861_v53, 6  ;;  %v11631_v26 = vld [vmem:[#allocation31_spill] sm:$0xff] }
 0xd29   :  { %8414 = vpow2.f32 %v6932_v35  ;;  %v4468_v63 = vrot.slane %v4467_v62, 1  ;;  %v4545_v6 = vsel %vm336_vm10, %v4448_v54, %v4544_v48  ;;  %v4593_v45 = vsel %vm1776_vm6, %v4590_v40, %v4592_v29 }
 0xd2a   :  { %v8401_v9 = vpop.eup %8400  ;;  %v4461_v34 = vrot.slane %v4460_v10, 1  ;;  %v4546_v46 = vsel %vm338_vm11, %v4455_v4, %v4545_v6  ;;  %v4595_v24 = vsel %vm1776_vm6, %v4592_v29, %v4594_v32  ;;  %v4596_v18 = vrot.slane %v10626_v33, 6  ;;  %v11632_v29 = vld [vmem:[#allocation35_spill] sm:$0xff] }
 0xd2b   :  { %v4391_v56 = vmul.f32 %v8401_v9, %v10558_v16  ;;  %v7890_v15 = vpack.c.bf16 %v4595_v24, %v4593_v45  ;;  %v4469_v27 = vadd.f32 %v4468_v63, %v4467_v62 }
 0xd2c   :  { %v8403_v60 = vpop.eup %8402  ;;  %v4462_v44 = vadd.f32 %v4461_v34, %v4460_v10  ;;  %v4597_v13 = vsel %vm1776_vm6, %v4594_v32, %v4596_v18 }
 0xd2d   :  { %v8405_v25 = vpop.eup %8404  ;;  %v4407_v43 = vmul.f32 %v4391_v56, %v11628_v31  ;;  %v4390_v40 = vmul.f32 %v8403_v60, %v10561_v61  ;;  %7891 = vmatprep.subr.bf16.mxu1 %v7890_v15  ;;  %v11662_v31 = vld [vmem:[#allocation21_spill] sm:$0xff] }
 0xd2e   :  { %v4393_v41 = vmul.f32 %v8405_v25, %v10565_v8  ;;  %v4547_v12 = vsel %vm340_vm12, %v4462_v44, %v4546_v46  ;;  %7893 = vmatpush3.bf16.msra.mxu1 %v7890_v15  ;;  %v11633_v46 = vld [vmem:[#allocation34_spill] sm:$0xff] }
 0xd2f   :  { %v8407_v47 = vpop.eup %8406  ;;  %v4477_v16 = vsel %vm512_vm5, %v4407_v43, 0.0  ;;  %v4406_v55 = vmul.f32 %v4390_v40, %v11629_v1  ;;  %v4548_v59 = vsel %vm342_vm13, %v4469_v27, %v4547_v12  ;;  %7621 = vmatprep.subr.msk.mxu1 %vm85_vm0, %v4597_v13  ;;  %v11661_v1 = vld [vmem:[#allocation18_spill] sm:$0xff] }
 0xd30   :  { %v8409_v49 = vpop.eup %8408  ;;  %v4478_v3 = vrot.slane %v4477_v16, 4  ;;  %v4409_v61 = vmul.f32 %v4393_v41, %v11630_v28  ;;  %v4392_v37 = vmul.f32 %v8407_v47, %v10569_v38  ;;  %4556 = vrot.lane.b32.xlu0 %v4548_v59, %s8627_s22  ;;  %v11660_v28 = vld [vmem:[#allocation20_spill] sm:$0xff] }
 0xd31   :  { %v8411_v8 = vpop.eup %8410  ;;  %v4470_v22 = vsel %vm512_vm5, %v4406_v55, 0.0  ;;  %v4395_v35 = vmul.f32 %v8409_v49, %v10576_v50 }
 0xd32   :  { %v8413_v62 = vpop.eup %8412  ;;  %v4479_v52 = vadd.f32 %v4478_v3, %v4477_v16  ;;  %v4471_v53 = vrot.slane %v4470_v22, 4  ;;  %v4491_v54 = vsel %vm512_vm5, %v4409_v61, 0.0  ;;  %v4408_v20 = vmul.f32 %v4392_v37, %v11631_v26  ;;  %7622 = vmatpush3.msk.msra.mxu1 %vm85_vm0, %v4597_v13  ;;  %v11659_v26 = vld [vmem:[#allocation5_spill] sm:$0xff] }
 0xd33   :  { %v8415_v4 = vpop.eup %8414  ;;  %v4492_v30 = vrot.slane %v4491_v54, 4  ;;  %v4411_v38 = vmul.f32 %v4395_v35, %v11632_v29  ;;  %v4394_v10 = vmul.f32 %v8411_v8, %v10580_v17  ;;  %v4349_v48 = vadd.f32 1.0, %v8413_v62  ;;  %v11658_v29 = vld [vmem:[#allocation17_spill] sm:$0xff] }
 0xd34   :  { %v4480_v32 = vrot.slane %v4479_v52, 2  ;;  %v4472_v63 = vadd.f32 %v4471_v53, %v4470_v22  ;;  %v4484_v50 = vsel %vm512_vm5, %v4408_v20, 0.0  ;;  %v4348_v6 = vadd.f32 1.0, %v8415_v4 }
 0xd35   :  { %v4493_v45 = vadd.f32 %v4492_v30, %v4491_v54  ;;  %v4485_v9 = vrot.slane %v4484_v50, 4  ;;  %v4505_v34 = vsel %vm512_vm5, %v4411_v38, 0.0  ;;  %v4410_v24 = vmul.f32 %v4394_v10, %v11633_v46 }
 0xd36   :  { %v4481_v18 = vadd.f32 %v4480_v32, %v4479_v52  ;;  %v4473_v56 = vrot.slane %v4472_v63, 2  ;;  %v4506_v15 = vrot.slane %v4505_v34, 4  ;;  %8416 = vrcp.f32 %v4349_v48 }
 0xd37   :  { %v4494_v60 = vrot.slane %v4493_v45, 2  ;;  %v4486_v44 = vadd.f32 %v4485_v9, %v4484_v50  ;;  %v4498_v17 = vsel %vm512_vm5, %v4410_v24, 0.0  ;;  %8418 = vrcp.f32 %v4348_v6 }
 0xd38   :  { %v4482_v13 = vrot.slane %v4481_v18, 1  ;;  %v4474_v25 = vadd.f32 %v4473_v56, %v4472_v63  ;;  %v4507_v43 = vadd.f32 %v4506_v15, %v4505_v34  ;;  %v4499_v40 = vrot.slane %v4498_v17, 4  ;;  %v11634_v63 = vld [vmem:[#allocation36_spill] sm:$0xff] }
 0xd39   :  { %v4495_v27 = vadd.f32 %v4494_v60, %v4493_v45  ;;  %v4487_v41 = vrot.slane %v4486_v44, 2  ;;  %v11635_v45 = vld [vmem:[#allocation37_spill] sm:$0xff] }
 0xd3a   :  { %v4483_v12 = vadd.f32 %v4482_v13, %v4481_v18  ;;  %v4475_v47 = vrot.slane %v4474_v25, 1  ;;  %v4508_v16 = vrot.slane %v4507_v43, 2  ;;  %v4500_v55 = vadd.f32 %v4499_v40, %v4498_v17 }
 0xd3b   :  { %v4488_v59 = vadd.f32 %v4487_v41, %v4486_v44  ;;  %v4496_v3 = vrot.slane %v4495_v27, 1 }
 0xd3c   :  { %v4476_v49 = vadd.f32 %v4475_v47, %v4474_v25  ;;  %v4509_v61 = vadd.f32 %v4508_v16, %v4507_v43  ;;  %v4501_v37 = vrot.slane %v4500_v55, 2 }
 0xd3d   :  { %v4489_v8 = vrot.slane %v4488_v59, 1  ;;  %v4497_v54 = vadd.f32 %v4496_v3, %v4495_v27 }
 0xd3e   :  { %v4502_v22 = vadd.f32 %v4501_v37, %v4500_v55  ;;  %v4549_v35 = vsel %vm331_vm7, %v4483_v12, %v4476_v49  ;;  %v4510_v52 = vrot.slane %v4509_v61, 1  ;;  %v11636_v55 = vld [vmem:[#allocation45_spill] sm:$0xff]  ;;  %v11637_v49 = vld [vmem:[#allocation38_spill] sm:$0xff]  ;;  %v11638_v37 = vld [vmem:[#allocation43_spill] sm:$0xff] }
 0xd3f   :  { %v4490_v62 = vadd.f32 %v4489_v8, %v4488_v59 }
 0xd40   :  { %v8417_v53 = vpop.eup %8416  ;;  %v4503_v20 = vrot.slane %v4502_v22, 1  ;;  %v4511_v6 = vadd.f32 %v4510_v52, %v4509_v61  ;;  %v6864_v52 = vld [vmem:[%s11404_s7 + $0x258] sm:$0xff] }
 0xd41   :  { %v8419_v4 = vpop.eup %8418  ;;  %v4397_v30 = vmul.f32 %v8417_v53, %v10591_v57  ;;  %v4550_v38 = vsel %vm332_vm8, %v4490_v62, %v4549_v35  ;;  %v6863_v62 = vld [vmem:[%s11404_s7 + $0x250] sm:$0xff]  ;;  %v4707_v53 = vrot.slane %v10626_v33, 3 }
 0xd42   :  { %v4504_v10 = vadd.f32 %v4503_v20, %v4502_v22  ;;  %v4396_v48 = vmul.f32 %v8419_v4, %v10597_v51  ;;  %v4551_v32 = vsel %vm334_vm9, %v4497_v54, %v4550_v38  ;;  %v11639_v22 = vld [vmem:[#allocation39_spill] sm:$0xff]  ;;  %v4708_v54 = vrot.slane %v6863_v62, 3 }
 0xd43   :  { %v4413_v50 = vmul.f32 %v4397_v30, %v11634_v63  ;;  %v4710_v20 = vrot.slane %v6864_v52, 3 }
 0xd44   :  { %v4412_v9 = vmul.f32 %v4396_v48, %v11635_v45  ;;  %v4552_v34 = vsel %vm336_vm10, %v4504_v10, %v4551_v32  ;;  %v4709_v4 = vsel %vm1906_vm1, %v4707_v53, %v4708_v54  ;;  %v6865_v10 = vld [vmem:[%s11404_s7 + $0x260] sm:$0xff]  ;;  %v10700_v48 = vld [vmem:[%s11404_s7 + $0x268] sm:$0xf] }
 0xd45   :  { %v4519_v24 = vsel %vm512_vm5, %v4413_v50, 0.0  ;;  %v4553_v18 = vsel %vm338_vm11, %v4511_v6, %v4552_v34  ;;  %v4711_v30 = vsel %vm1906_vm1, %v4708_v54, %v4710_v20  ;;  %v4712_v32 = vrot.slane %v6865_v10, 3 }
 0xd46   :  { %v4520_v56 = vrot.slane %v4519_v24, 4  ;;  %v4512_v57 = vsel %vm512_vm5, %v4412_v9, 0.0  ;;  %v7894_v38 = vpack.c.bf16 %v4711_v30, %v4709_v4  ;;  %v4714_v50 = vrot.slane %v10700_v48, 3  ;;  %v8610_v30 = vld [vmem:[%s11406_s3] sm:$0xff] }
 0xd47   :  { %v4513_v15 = vrot.slane %v4512_v57, 4  ;;  %v4713_v6 = vsel %vm1906_vm1, %v4710_v20, %v4712_v32 }
 0xd48   :  { %v4521_v60 = vadd.f32 %v4520_v56, %v4519_v24  ;;  %7895 = vmatprep.subr.bf16.mxu0 %v7894_v38  ;;  %v4715_v9 = vsel %vm1906_vm1, %v4712_v32, %v4714_v50  ;;  %v6945_v24 = vld [vmem:[%s11404_s7 + $0x290] sm:$0xff]  ;;  %v6947_v56 = vld [vmem:[%s11404_s7 + $0x2a0] sm:$0xff] }
 0xd49   :  { %v4514_v44 = vadd.f32 %v4513_v15, %v4512_v57  ;;  %7897 = vmatpush3.bf16.msra.mxu0 %v7894_v38  ;;  %v7898_v34 = vpack.c.bf16 %v4715_v9, %v4713_v6  ;;  %v6948_v15 = vld [vmem:[%s11404_s7 + $0x2a8] sm:$0xff]  ;;  %v6943_v50 = vld [vmem:[%s11404_s7 + $0x280] sm:$0xff] }
 0xd4a   :  { %v4522_v51 = vrot.slane %v4521_v60, 2  ;;  %v6944_v6 = vld [vmem:[%s11404_s7 + $0x288] sm:$0xff] }
 0xd4b   :  { %v4515_v17 = vrot.slane %v4514_v44, 2  ;;  %7899 = vmatprep.subr.bf16.mxu0 %v7898_v34 }
 0xd4c   :  { %v4523_v13 = vadd.f32 %v4522_v51, %v4521_v60  ;;  %v8015_v60 = vpack.i.bf16 %v6948_v15, %v6947_v56  ;;  %v8612_v15 = vld [vmem:[%s11406_s3 + $0x10] sm:$0xff] }
 0xd4d   :  { %v4516_v25 = vadd.f32 %v4515_v17, %v4514_v44  ;;  %7901 = vmatpush3.bf16.msra.mxu0 %v7898_v34  ;;  %v11640_v44 = vld [vmem:[#allocation3_spill] sm:$0xff] }
 0xd4e   :  { %v4524_v43 = vrot.slane %v4523_v13, 1  ;;  %v4569_v51 = vrot.slane %v10626_v33, %v11640_v44  ;;  %v6942_v33 = vld [vmem:[%s11404_s7 + $0x278] sm:$0xff]  ;;  %v11651_v44 = vld [vmem:[#allocation10_spill] sm:$0xff] }
 0xd4f   :  { %v4517_v40 = vrot.slane %v4516_v25, 1 }
 0xd50   :  { %v4525_v41 = vadd.f32 %v4524_v43, %v4523_v13 }
 0xd51   :  { %v4518_v27 = vadd.f32 %v4517_v40, %v4516_v25 }
 0xd53   :  { %v4554_v12 = vsel %vm340_vm12, %v4518_v27, %v4553_v18  ;;  %v6946_v18 = vld [vmem:[%s11404_s7 + $0x298] sm:$0xff] }
 0xd54   :  { %v4555_v47 = vsel %vm342_vm13, %v4525_v41, %v4554_v12  ;;  %v8010_v57 = vpack.i.bf16 %v6946_v18, %v6945_v24  ;;  %v10746_v18 = vld [vmem:[%s11404_s7 + $0x2b0] sm:$0xff] }
 0xd55   :  { %4558 = vrot.lane.b32.xlu1 %v4555_v47, %s8627_s22  ;;  %v5038_v56 = vrot.slane %v10746_v18, 1 }
 0xd56   :  { %8011 = vrot.lane.b32.xlu0 %v8010_v57, %s8627_s22  ;;  %v8611_v57 = vld [vmem:[%s11406_s3 + $0x8] sm:$0xff] }
 0xd57   :  { %7648 = vmatprep.subr.msk.mxu0 %vm748_vm4, %v5038_v56 }
 0xd59   :  { %8016 = vrot.lane.b32.xlu1 %v8015_v60, %s8627_s22  ;;  %v8613_v60 = vld [vmem:[%s11406_s3 + $0x18] sm:$0xff] }
 0xda2   :  { %v4557_v16 = vpop.permute.xlu0 %4556 }
 0xda3   :  { %v4562_v59 = vsel %vm512_vm5, %v11636_v55, %v4557_v16 }
 0xda4   :  { %v4564_v3 = vsel %vm1760_vm14, %v4562_v59, %v11637_v49 }
 0xda5   :  { %7623 = vmatprep.mubr.msk.f32.mxu1 %vm1804_vm15, %v4564_v3  ;;  %v6941_v3 = vld [vmem:[%s11404_s7 + $0x270] sm:$0xff] }
 0xdc7   :  { %v4559_v61 = vpop.permute.xlu1 %4558 }
 0xdc8   :  { %v4563_v8 = vsel %vm512_vm5, %v11638_v37, %v4559_v61  ;;  %v8012_v59 = vpop.permute.xlu0 %8011 }
 0xdc9   :  { %v4565_v35 = vsel %vm1760_vm14, %v4563_v8, %v11639_v22  ;;  %v8014_v61 = vunpack.i.h.bf16 %v8012_v59  ;;  %v8013_v8 = vunpack.i.l.bf16 %v8012_v59  ;;  %v8625_v59 = vld [vmem:[%s11406_s3 + $0x78] sm:$0xff]  ;;  %v11652_v22 = vld [vmem:[#allocation11_spill] sm:$0xff] }
 0xdca   :  { %7624 = vmatmul.mubr.msk.f32.vlgmr.msra.gmra.mrb[54].mxu1 %vm1804_vm15, %v4565_v35 }
 0xdcb   :  { %v4852_v35 = vsel %vm512_vm5, %v6941_v3, %v8013_v8  ;;  %v4853_v62 = vsel %vm512_vm5, %v6942_v33, %v8014_v61  ;;  %v8017_v38 = vpop.permute.xlu1 %8016  ;;  %v11641_v33 = vld [vmem:[#allocation4_spill] sm:$0xff] }
 0xdcc   :  { %v7902_v52 = vpack.c.bf16 %v4853_v62, %v4852_v35  ;;  %v8019_v10 = vunpack.i.h.bf16 %v8017_v38  ;;  %v8018_v32 = vunpack.i.l.bf16 %v8017_v38  ;;  %v4806_v61 = vrot.slane %v10700_v48, %v11641_v33  ;;  %v11650_v33 = vld [vmem:[#allocation9_spill] sm:$0xff] }
 0xdce   :  { %7903 = vmatprep.subr.bf16.mxu1 %v7902_v52  ;;  %v4854_v9 = vsel %vm512_vm5, %v6943_v50, %v8018_v32  ;;  %v4855_v34 = vsel %vm512_vm5, %v6944_v6, %v8019_v10 }
 0xdcf   :  { %7905 = vmatpush3.bf16.msra.mxu1 %v7902_v52  ;;  %v7906_v24 = vpack.c.bf16 %v4855_v34, %v4854_v9 }
 0xdd1   :  { %7907 = vmatprep.subr.bf16.mxu1 %v7906_v24 }
 0xdd3   :  { %7909 = vmatpush3.bf16.msra.mxu1 %v7906_v24 }
 0xe9d   :  { %v7625_v17 = vpop.f32.mrb[54].mxu1 }
 0xe9e   :  { %v4686_v13 = vadd.f32 %v7625_v17, %v4569_v51  ;;  %v4680_v25 = vpop.f32.mrb[55].mxu1  ;;  %v8615_v17 = vld [vmem:[%s11406_s3 + $0x28] sm:$0xff] }
 0xe9f   :  { %v4681_v43 = vadd.f32 %v4680_v25, %v4569_v51  ;;  %v8614_v51 = vld [vmem:[%s11406_s3 + $0x20] sm:$0xff]  ;;  %v8617_v25 = vld [vmem:[%s11406_s3 + $0x38] sm:$0xff] }
 0xea0   :  { %v6938_v40 = vmul.f32 -1.442695, %v4686_v13 }
 0xea1   :  { %v6937_v27 = vmul.f32 -1.442695, %v4681_v43 }
 0xea2   :  { %8420 = vpow2.f32 %v6938_v40  ;;  %v8619_v40 = vld [vmem:[%s11406_s3 + $0x48] sm:$0xff] }
 0xea3   :  { %8422 = vpow2.f32 %v6937_v27  ;;  %v8620_v27 = vld [vmem:[%s11406_s3 + $0x50] sm:$0xff] }
 0xeac   :  { %v8421_v41 = vpop.eup %8420 }
 0xead   :  { %v8423_v12 = vpop.eup %8422  ;;  %v4696_v47 = vadd.f32 1.0, %v8421_v41  ;;  %v8621_v41 = vld [vmem:[%s11406_s3 + $0x58] sm:$0xff] }
 0xeae   :  { %v4695_v16 = vadd.f32 1.0, %v8423_v12  ;;  %v8622_v12 = vld [vmem:[%s11406_s3 + $0x60] sm:$0xff] }
 0xeaf   :  { %8424 = vrcp.f32 %v4696_v47  ;;  %v8623_v47 = vld [vmem:[%s11406_s3 + $0x68] sm:$0xff] }
 0xeb0   :  { %8426 = vrcp.f32 %v4695_v16  ;;  %v8624_v16 = vld [vmem:[%s11406_s3 + $0x70] sm:$0xff] }
 0xeb9   :  { %v8425_v53 = vpop.eup %8424 }
 0xeba   :  { %v8427_v54 = vpop.eup %8426  ;;  %v4702_v4 = vmul.f32 %v8425_v53, %v4686_v13  ;;  %v8616_v13 = vld [vmem:[%s11406_s3 + $0x30] sm:$0xff] }
 0xebb   :  { %v4701_v20 = vmul.f32 %v8427_v54, %v4681_v43  ;;  %v8618_v43 = vld [vmem:[%s11406_s3 + $0x40] sm:$0xff] }
 0xebd   :  { %7634 = vmatprep.mubr.msk.f32.mxu0 %vm512_vm5, %v4701_v20 }
 0xebe   :  { %7635 = vmatmul.mubr.msk.f32.vlgmr.msra.gmra.mrb[62].mxu0 %vm512_vm5, %v4702_v4 }
 0xebf   :  { %7650 = vmatprep.mubr.msk.f32.mxu0 %vm164_vm3, %v8610_v30  ;;  %7649 = vmatpush3.msk.msra.mxu0 %vm748_vm4, %v5038_v56 }
 0xec2   :  { %7651 = vmatmul.mubr.msk.f32.vlgmr.msra.gmra.mrb[64].mxu0 %vm164_vm3, %v8611_v57 }
 0xec3   :  { %7653 = vmatprep.mubr.msk.f32.mxu0 %vm164_vm3, %v8612_v15 }
 0xec6   :  { %7654 = vmatmul.mubr.msk.f32.gmra.mrb[66].mxu0 %vm164_vm3, %v8613_v60  ;;  %v6950_v60 = vld [vmem:[%s11404_s7 + $0x2b8] sm:$0xff] }
 0xec7   :  { %7656 = vmatprep.mubr.msk.f32.mxu0 %vm164_vm3, %v8614_v51  ;;  %v6951_v51 = vld [vmem:[%s11404_s7 + $0x2c0] sm:$0xff] }
 0xeca   :  { %7657 = vmatmul.mubr.msk.f32.gmra.mrb[68].mxu0 %vm164_vm3, %v8615_v17  ;;  %v5480_v17 = vrot.slane %v10746_v18, 5 }
 0xecb   :  { %7659 = vmatprep.mubr.msk.f32.mxu0 %vm164_vm3, %v8616_v13  ;;  %v5481_v13 = vrot.slane %v6950_v60, 5 }
 0xece   :  { %7660 = vmatmul.mubr.msk.f32.gmra.mrb[70].mxu0 %vm164_vm3, %v8617_v25  ;;  %v5483_v25 = vrot.slane %v6951_v51, 5 }
 0xecf   :  { %7662 = vmatprep.mubr.msk.f32.mxu0 %vm164_vm3, %v8618_v43  ;;  %v5482_v43 = vsel %vm748_vm4, %v5480_v17, %v5481_v13  ;;  %v10881_v17 = vrot.slane %v10746_v18, %v8830_v2 }
 0xed1   :  { %v5306_v21 = vmul.f32 %v10881_v17, %v11662_v31 }
 0xed2   :  { %7663 = vmatmul.mubr.msk.f32.gmra.mrb[72].mxu0 %vm164_vm3, %v8619_v40  ;;  %v5484_v40 = vsel %vm748_vm4, %v5481_v13, %v5483_v25 }
 0xed3   :  { %7665 = vmatprep.mubr.msk.f32.mxu0 %vm164_vm3, %v8620_v27  ;;  %v7910_v27 = vpack.c.bf16 %v5484_v40, %v5482_v43 }
 0xed5   :  { %7911 = vmatprep.subr.bf16.mxu1 %v7910_v27 }
 0xed6   :  { %7666 = vmatmul.mubr.msk.f32.gmra.mrb[74].mxu0 %vm164_vm3, %v8621_v41  ;;  %v6952_v41 = vld [vmem:[%s11404_s7 + $0x2c8] sm:$0xff] }
 0xed7   :  { %7668 = vmatprep.mubr.msk.f32.mxu0 %vm164_vm3, %v8622_v12  ;;  %v10872_v12 = vld [vmem:[%s11404_s7 + $0x2d0] sm:$0xff] }
 0xed8   :  { %11646 = vst [vmem:[#allocation45_spill] sm:$0xff] %v10872_v12 }
 0xeda   :  { %7669 = vmatmul.mubr.msk.f32.gmra.mrb[76].mxu0 %vm164_vm3, %v8623_v47  ;;  %v5485_v47 = vrot.slane %v6952_v41, 5 }
 0xedb   :  { %7671 = vmatprep.mubr.msk.f32.mxu0 %vm164_vm3, %v8624_v16  ;;  %v5487_v16 = vrot.slane %v10872_v12, 5 }
 0xede   :  { %7672 = vmatmul.mubr.msk.f32.gmra.mrb[78].mxu0 %vm164_vm3, %v8625_v59  ;;  %v5486_v59 = vsel %vm748_vm4, %v5483_v25, %v5485_v47  ;;  %vm6466_vm3 = vcmask 1045504  }
 0xf91   :  { %v7636_v3 = vpop.f32.mrb[62].mxu0 }
 0xf92   :  { %v4802_v8 = vadd.f32 %v7636_v3, %v11638_v37  ;;  %v4792_v35 = vpop.f32.mrb[63].mxu0  ;;  %v5488_v3 = vsel %vm748_vm4, %v5485_v47, %v5487_v16 }
 0xf93   :  { %v4801_v62 = vadd.f32 %v4792_v35, %v11636_v55  ;;  %v11647_v35 = vld [vmem:[#allocation13_spill] sm:$0xff] }
 0xf94   :  { %v10817_v53 = vadd.f32 %v4806_v61, %v4802_v8 }
 0xf95   :  { %v10815_v52 = vadd.f32 %v4806_v61, %v4801_v62  ;;  %v10823_v54 = vpop.f32.mrb[64].mxu0  ;;  %v7914_v61 = vpack.c.bf16 %v5488_v3, %v5486_v59  ;;  %v11649_v59 = vld [vmem:[#allocation8_spill] sm:$0xff] }
 0xf96   :  { %11643 = vst [vmem:[#allocation44_spill] sm:$0xff] %v10817_v53  ;;  %v10825_v20 = vpop.f32.mrb[65].mxu0 }
 0xf97   :  { %11642 = vst [vmem:[#allocation41_spill] sm:$0xff] %v10815_v52  ;;  %7645 = vmatprep.mubr.msk.f32.mxu1 %vm512_vm5, %v10815_v52 }
 0xf98   :  { %7646 = vmatmul.mubr.msk.f32.vlgmr.msra.gmra.mrb[56].mxu1 %vm512_vm5, %v10817_v53 }
 0xf99   :  { %v10827_v48 = vpop.f32.mrb[66].mxu0  ;;  %7913 = vmatpush3.bf16.msra.mxu1 %v7910_v27  ;;  %v11648_v27 = vld [vmem:[#allocation7_spill] sm:$0xff] }
 0xf9a   :  { %v10829_v37 = vpop.f32.mrb[67].mxu0  ;;  %7915 = vmatprep.subr.bf16.mxu1 %v7914_v61  ;;  %v5292_v41 = vmul.f32 %v10881_v17, %v11648_v27  ;;  %v10899_v27 = vmul.f32 %v10881_v17, %v11652_v22  ;;  %v11656_v22 = vld [vmem:[#allocation16_spill] sm:$0xff] }
 0xf9b   :  { %v10921_v52 = vmul.f32 %v10881_v17, %v11656_v22  ;;  %v5307_v22 = vmul.f32 %v10881_v17, %v11661_v1 }
 0xf9d   :  { %v10831_v4 = vpop.f32.mrb[68].mxu0  ;;  %7917 = vmatpush3.bf16.msra.mxu1 %v7914_v61  ;;  %11657 = vst [vmem:[#allocation43_spill] sm:$0xff] %v10921_v52 }
 0xf9e   :  { %v10833_v55 = vpop.f32.mrb[69].mxu0 }
 0xfa1   :  { %v10835_v30 = vpop.f32.mrb[70].mxu0 }
 0xfa2   :  { %v10837_v38 = vpop.f32.mrb[71].mxu0 }
 0xfa5   :  { %v10839_v10 = vpop.f32.mrb[72].mxu0 }
 0xfa6   :  { %v10841_v32 = vpop.f32.mrb[73].mxu0 }
 0xfa9   :  { %v10843_v50 = vpop.f32.mrb[74].mxu0 }
 0xfaa   :  { %11644 = vst [vmem:[#allocation42_spill] sm:$0xff] %v10843_v50  ;;  %v10845_v6 = vpop.f32.mrb[75].mxu0 }
 0xfab   :  { %11645 = vst [vmem:[#allocation40_spill] sm:$0xff] %v10845_v6 }
 0xfad   :  { %v10847_v9 = vpop.f32.mrb[76].mxu0 }
 0xfae   :  { %v10849_v34 = vpop.f32.mrb[77].mxu0 }
 0xfb1   :  { %v10851_v24 = vpop.f32.mrb[78].mxu0 }
 0xfb2   :  { %v10853_v56 = vpop.f32.mrb[79].mxu0 }
0x106b   :  { %v7647_v57 = vpop.f32.mrb[56].mxu1 }
0x106c   :  { %5268 = vrot.lane.b32.xlu1 %v7647_v57, %s8629_s6  ;;  %v4928_v15 = vpop.f32.mrb[57].mxu1  ;;  %v4988_v8 = vcombine.high %v7647_v57, %v7647_v57  ;;  %v4995_v25 = vrot.slane %v7647_v57, %v11647_v35  ;;  %v5295_v57 = vmul.f32 %v10881_v17, %v11651_v44  ;;  %v11655_v44 = vld [vmem:[#allocation15_spill] sm:$0xff] }
0x106d   :  { %5266 = vrot.lane.b32.xlu0 %v4928_v15, %s8629_s6  ;;  %v4939_v60 = vcombine.high %v4928_v15, %v4928_v15  ;;  %v4946_v51 = vrot.slane %v4928_v15, %v11647_v35  ;;  %v5293_v15 = vmul.f32 %v10881_v17, %v11649_v59  ;;  %v11654_v59 = vld [vmem:[#allocation14_spill] sm:$0xff]  ;;  %v10917_v49 = vmul.f32 %v10881_v17, %v11655_v44 }
0x106e   :  { %v5002_v62 = vrot.slane %v4988_v8, %v11647_v35  ;;  %v10907_v53 = vmul.f32 %v10881_v17, %v11654_v59  ;;  %v5304_v44 = vmul.f32 %v10881_v17, %v11660_v28 }
0x106f   :  { %v4953_v43 = vrot.slane %v4939_v60, %v11647_v35  ;;  %v4954_v40 = vcombine.high %v4946_v51, %v4946_v51  ;;  %v4962_v61 = vrot.slane %v4946_v51, %v11647_v35  ;;  %v5294_v60 = vmul.f32 %v10881_v17, %v11650_v33 }
0x1070   :  { %v5004_v13 = vcombine.high %v5002_v62, %v5002_v62  ;;  %v5018_v47 = vrot.slane %v5002_v62, %v11647_v35  ;;  %v11653_v62 = vld [vmem:[#allocation12_spill] sm:$0xff]  ;;  %v5003_v51 = vcombine.high %v4995_v25, %v4995_v25 }
0x1071   :  { %v4955_v3 = vcombine.high %v4953_v43, %v4953_v43  ;;  %v4976_v8 = vrot.slane %v4954_v40, %v11647_v35  ;;  %v10910_v40 = vrot.slane %v4995_v25, %v11647_v35  ;;  %v10913_v33 = vrot.slane %v4953_v43, %v11647_v35 }
0x1072   :  { %v5032_v16 = vrot.slane %v5004_v13, %v11647_v35  ;;  %v10903_v13 = vmul.f32 %v10881_v17, %v11653_v62  ;;  %v5034_v45 = vcombine.high %v5018_v47, %v5018_v47  ;;  %v4984_v63 = vcombine.high %v4962_v61, %v4962_v61 }
0x1073   :  { %v4983_v59 = vrot.slane %v4955_v3, %v11647_v35  ;;  %v4986_v46 = vcombine.high %v4976_v8, %v4976_v8  ;;  %v5305_v25 = vmul.f32 %v10881_v17, %v11658_v29  ;;  %v10928_v43 = vrot.slane %v10746_v18, %v11659_v26 }
0x1074   :  { %v5036_v62 = vcombine.high %v5032_v16, %v5032_v16  ;;  %v10937_v3 = vrot.slane %v5003_v51, %v11647_v35  ;;  %v5033_v36 = vcombine.high %v10910_v40, %v10910_v40  ;;  %v4985_v29 = vcombine.high %v10913_v33, %v10913_v33 }
0x1075   :  { %v5189_v26 = vrot.slane %v4962_v61, %v8830_v2  ;;  %v5241_v18 = vrot.slane %v5032_v16, %v8830_v2  ;;  %v5237_v28 = vrot.slane %v5018_v47, %v8830_v2  ;;  %v5245_v39 = vrot.slane %v5034_v45, %v8830_v2 }
0x1076   :  { %v5249_v1 = vrot.slane %v5036_v62, %v8830_v2  ;;  %v4987_v31 = vcombine.high %v4983_v59, %v4983_v59  ;;  %v5193_v35 = vrot.slane %v4976_v8, %v8830_v2  ;;  %v5197_v51 = vrot.slane %v4984_v63, %v8830_v2 }
0x1077   :  { %v5201_v58 = vrot.slane %v4986_v46, %v8830_v2 }
0x10de   :  { %v10951_v19 = vpop.permute.xlu1 %5268 }
0x10df   :  { %v5285_v0 = vadd.f32 %v10951_v19, %v5241_v18  ;;  %v5267_v61 = vpop.permute.xlu0 %5266  ;;  %v5284_v16 = vadd.f32 %v10951_v19, %v5237_v28  ;;  %v5287_v47 = vadd.f32 %v10951_v19, %v5249_v1  ;;  %v5286_v62 = vadd.f32 %v10951_v19, %v5245_v39 }
0x10e0   :  { %v5273_v5 = vadd.f32 %v5267_v61, %v5193_v35  ;;  %v5272_v45 = vadd.f32 %v5267_v61, %v5189_v26  ;;  %v5274_v42 = vadd.f32 %v5267_v61, %v5197_v51  ;;  %v5275_v11 = vadd.f32 %v5267_v61, %v5201_v58 }
0x10e1   :  { %v5321_v8 = vadd.f32 %v5305_v25, %v5285_v0  ;;  %v5320_v12 = vadd.f32 %v5304_v44, %v5284_v16  ;;  %v5323_v63 = vadd.f32 %v5307_v22, %v5287_v47  ;;  %v5322_v50 = vadd.f32 %v5306_v21, %v5286_v62 }
0x10e2   :  { %v5308_v46 = vadd.f32 %v5292_v41, %v5272_v45  ;;  %v5309_v6 = vadd.f32 %v5293_v15, %v5273_v5  ;;  %v5310_v52 = vadd.f32 %v5294_v60, %v5274_v42  ;;  %v5311_v7 = vadd.f32 %v5295_v57, %v5275_v11  ;;  %v11663_v45 = vld [vmem:[#allocation19_spill] sm:$0xff] }
0x10e3   :  { %v5337_v18 = vadd.f32 %v10847_v9, %v5321_v8  ;;  %v5336_v28 = vadd.f32 %v5320_v12, %v10849_v34  ;;  %v10960_v1 = vadd.f32 %v10851_v24, %v5323_v63  ;;  %v10963_v39 = vadd.f32 %v5322_v50, %v10853_v56 }
0x10e4   :  { %v5324_v58 = vadd.f32 %v5308_v46, %v10825_v20  ;;  %v5325_v0 = vadd.f32 %v10823_v54, %v5309_v6  ;;  %v5326_v21 = vadd.f32 %v5310_v52, %v10829_v37  ;;  %v5327_v5 = vadd.f32 %v10827_v48, %v5311_v7 }
0x10e5   :  { %v5297_v11 = vmul.f32 %v10881_v17, %v9059_v14  ;;  %v5299_v42 = vmul.f32 %v10881_v17, %v9079_v23  ;;  %v5035_v9 = vcombine.high %v10937_v3, %v10937_v3  ;;  %v5205_v50 = vrot.slane %v10913_v33, %v8830_v2 }
0x10e6   :  { %v5221_v20 = vrot.slane %v10910_v40, %v8830_v2  ;;  %v5209_v54 = vrot.slane %v4983_v59, %v8830_v2  ;;  %v10981_v52 = vadd.f32 %v10928_v43, %v5324_v58  ;;  %v10984_v7 = vadd.f32 %v10928_v43, %v5325_v0  ;;  %v11664_v58 = vld [vmem:[#allocation43_spill] sm:$0xff] }
0x10e7   :  { %v5225_v14 = vrot.slane %v10937_v3, %v8830_v2  ;;  %v5229_v23 = vrot.slane %v5033_v36, %v8830_v2  ;;  %v10990_v48 = vadd.f32 %v10928_v43, %v5326_v21  ;;  %v5276_v37 = vadd.f32 %v5267_v61, %v5205_v50 }
0x10e8   :  { %v5213_v6 = vrot.slane %v4985_v29, %v8830_v2  ;;  %v5217_v34 = vrot.slane %v4987_v31, %v8830_v2  ;;  %v10995_v24 = vadd.f32 %v10928_v43, %v5327_v5  ;;  %v5277_v56 = vadd.f32 %v5267_v61, %v5209_v54  ;;  %v11666_v5 = vld [vmem:[#allocation42_spill] sm:$0xff] }
0x10e9   :  { %v5233_v12 = vrot.slane %v5035_v9, %v8830_v2  ;;  %v10999_v41 = vadd.f32 %v10928_v43, %v5337_v18  ;;  %v6986_v15 = vmul.f32 -1.442695, %v10981_v52  ;;  %v5312_v36 = vadd.f32 %v10899_v27, %v5276_v37 }
0x10ea   :  { %v6987_v60 = vmul.f32 -1.442695, %v10984_v7  ;;  %v5313_v57 = vadd.f32 %v5297_v11, %v5277_v56  ;;  %v5278_v40 = vadd.f32 %v5267_v61, %v5213_v6  ;;  %v5279_v33 = vadd.f32 %v5267_v61, %v5217_v34 }
0x10eb   :  { %v6988_v59 = vmul.f32 -1.442695, %v10990_v48  ;;  %v5328_v25 = vadd.f32 %v5312_v36, %v10833_v55  ;;  %v5280_v44 = vadd.f32 %v10951_v19, %v5221_v20  ;;  %v5281_v22 = vadd.f32 %v10951_v19, %v5225_v14 }
0x10ec   :  { %v6989_v3 = vmul.f32 -1.442695, %v10995_v24  ;;  %v5329_v29 = vadd.f32 %v10831_v4, %v5313_v57  ;;  %v5314_v26 = vadd.f32 %v10903_v13, %v5278_v40  ;;  %v5315_v27 = vadd.f32 %v5299_v42, %v5279_v33 }
0x10ed   :  { %8428 = vpow2.f32 %v6986_v15  ;;  %v11012_v31 = vadd.f32 %v10928_v43, %v5328_v25  ;;  %v5316_v35 = vadd.f32 %v10907_v53, %v5280_v44  ;;  %v5317_v51 = vadd.f32 %v10917_v49, %v5281_v22 }
0x10ee   :  { %8430 = vpow2.f32 %v6987_v60  ;;  %v11017_v55 = vadd.f32 %v10928_v43, %v5329_v29  ;;  %v5330_v61 = vadd.f32 %v5314_v26, %v10837_v38  ;;  %v5331_v16 = vadd.f32 %v10835_v30, %v5315_v27 }
0x10ef   :  { %8432 = vpow2.f32 %v6988_v59  ;;  %v6990_v4 = vmul.f32 -1.442695, %v11012_v31  ;;  %v5332_v13 = vadd.f32 %v5316_v35, %v10841_v32  ;;  %v5333_v47 = vadd.f32 %v10839_v10, %v5317_v51 }
0x10f0   :  { %8434 = vpow2.f32 %v6989_v3  ;;  %v6991_v53 = vmul.f32 -1.442695, %v11017_v55  ;;  %v11026_v49 = vadd.f32 %v10928_v43, %v5330_v61  ;;  %v11029_v62 = vadd.f32 %v10928_v43, %v5331_v16 }
0x10f1   :  { %v5302_v38 = vmul.f32 %v10881_v17, %v11663_v45  ;;  %v11034_v30 = vadd.f32 %v10928_v43, %v5336_v28  ;;  %8436 = vpow2.f32 %v6990_v4  ;;  %v5282_v32 = vadd.f32 %v10951_v19, %v5229_v23  ;;  %v11665_v28 = vld [vmem:[#allocation40_spill] sm:$0xff] }
0x10f2   :  { %8438 = vpow2.f32 %v6991_v53  ;;  %v6992_v10 = vmul.f32 -1.442695, %v11026_v49  ;;  %v6993_v8 = vmul.f32 -1.442695, %v11029_v62  ;;  %v5283_v63 = vadd.f32 %v10951_v19, %v5233_v12 }
0x10f3   :  { %v5318_v46 = vadd.f32 %v5302_v38, %v5282_v32  ;;  %v6999_v18 = vmul.f32 -1.442695, %v10999_v41  ;;  %v6998_v17 = vmul.f32 -1.442695, %v11034_v30  ;;  %v11046_v20 = vadd.f32 %v10928_v43, %v5332_v13 }
0x10f4   :  { %8440 = vpow2.f32 %v6992_v10  ;;  %v5319_v0 = vadd.f32 %v11664_v58, %v5283_v63  ;;  %v11049_v34 = vadd.f32 %v10928_v43, %v5333_v47  ;;  %v11060_v33 = vadd.f32 %v10928_v43, %v10963_v39 }
0x10f5   :  { %8442 = vpow2.f32 %v6993_v8  ;;  %v5334_v21 = vadd.f32 %v5318_v46, %v11665_v28  ;;  %v6994_v15 = vmul.f32 -1.442695, %v11046_v20  ;;  %v11066_v29 = vadd.f32 %v10928_v43, %v10960_v1 }
0x10f6   :  { %v5335_v11 = vadd.f32 %v11666_v5, %v5319_v0  ;;  %8444 = vpow2.f32 %v6999_v18  ;;  %v6995_v44 = vmul.f32 -1.442695, %v11049_v34  ;;  %v7000_v39 = vmul.f32 -1.442695, %v11060_v33 }
0x10f7   :  { %v8429_v42 = vpop.eup %8428  ;;  %8446 = vpow2.f32 %v6998_v17  ;;  %v11053_v36 = vadd.f32 %v10928_v43, %v5334_v21  ;;  %v7001_v16 = vmul.f32 -1.442695, %v11066_v29 }
0x10f8   :  { %v8431_v9 = vpop.eup %8430  ;;  %v5408_v50 = vadd.f32 1.0, %v8429_v42  ;;  %v11056_v57 = vadd.f32 %v10928_v43, %v5335_v11 }
0x10f9   :  { %v8433_v19 = vpop.eup %8432  ;;  %v5409_v54 = vadd.f32 1.0, %v8431_v9  ;;  %v6996_v3 = vmul.f32 -1.442695, %v11053_v36 }
0x10fa   :  { %v8435_v14 = vpop.eup %8434  ;;  %8448 = vrcp.f32 %v5408_v50  ;;  %v5410_v23 = vadd.f32 1.0, %v8433_v19  ;;  %v6997_v26 = vmul.f32 -1.442695, %v11056_v57 }
0x10fb   :  { %v8437_v37 = vpop.eup %8436  ;;  %8450 = vrcp.f32 %v5409_v54  ;;  %v5411_v6 = vadd.f32 1.0, %v8435_v14 }
0x10fc   :  { %v8439_v56 = vpop.eup %8438  ;;  %8452 = vrcp.f32 %v5410_v23  ;;  %v5412_v12 = vadd.f32 1.0, %v8437_v37 }
0x10fd   :  { %8454 = vrcp.f32 %v5411_v6  ;;  %v5413_v60 = vadd.f32 1.0, %v8439_v56 }
0x10fe   :  { %v8441_v40 = vpop.eup %8440  ;;  %8456 = vrcp.f32 %v5412_v12 }
0x10ff   :  { %v8443_v59 = vpop.eup %8442  ;;  %8458 = vrcp.f32 %v5413_v60  ;;  %v5414_v25 = vadd.f32 1.0, %v8441_v40  ;;  %v6955_v60 = vld [vmem:[%s11404_s7 + $0x2e0] sm:$0xff]  ;;  %v6956_v40 = vld [vmem:[%s11404_s7 + $0x2e8] sm:$0xff] }
0x1100   :  { %v5415_v22 = vadd.f32 1.0, %v8443_v59  ;;  %8460 = vpow2.f32 %v6994_v15  ;;  %v8445_v27 = vpop.eup %8444  ;;  %v5982_v59 = vrot.slane %v6955_v60, 6 }
0x1101   :  { %8462 = vrcp.f32 %v5414_v25  ;;  %v8447_v35 = vpop.eup %8446  ;;  %v5421_v21 = vadd.f32 1.0, %v8445_v27  ;;  %v6957_v25 = vld [vmem:[%s11404_s7 + $0x2f0] sm:$0xff] }
0x1102   :  { %8464 = vrcp.f32 %v5415_v22  ;;  %v5420_v0 = vadd.f32 1.0, %v8447_v35  ;;  %v6958_v22 = vld [vmem:[%s11404_s7 + $0x2f8] sm:$0xff] }
0x1103   :  { %8466 = vpow2.f32 %v6995_v44  ;;  %v5984_v44 = vrot.slane %v6956_v40, 6 }
0x1104   :  { %v8449_v51 = vpop.eup %8448  ;;  %8468 = vpow2.f32 %v6996_v3  ;;  %v11122_v3 = vld [vmem:[%s11404_s7 + $0x300] sm:$0xff] }
0x1105   :  { %v8451_v61 = vpop.eup %8450  ;;  %v5456_v4 = vmul.f32 %v8449_v51, %v10981_v52  ;;  %8470 = vpow2.f32 %v6997_v26  ;;  %v5988_v26 = vrot.slane %v6958_v22, 6  ;;  %v5990_v27 = vrot.slane %v11122_v3, 6 }
0x1106   :  { %v8453_v13 = vpop.eup %8452  ;;  %8472 = vpow2.f32 %v7000_v39  ;;  %v5457_v43 = vmul.f32 %v8451_v61, %v10984_v7  ;;  %v5985_v51 = vsel %vm1776_vm6, %v5982_v59, %v5984_v44 }
0x1107   :  { %v8455_v1 = vpop.eup %8454  ;;  %7682 = vmatprep.mubr.msk.f32.mxu1 %vm512_vm5, %v5456_v4  ;;  %v5458_v47 = vmul.f32 %v8453_v13, %v10990_v48  ;;  %8474 = vpow2.f32 %v7001_v16 }
0x1108   :  { %v8457_v53 = vpop.eup %8456  ;;  %7683 = vmatmul.mubr.msk.f32.vlgmr.msra.gmra.mrb[58].mxu1 %vm512_vm5, %v5457_v43  ;;  %v5459_v52 = vmul.f32 %v8455_v1, %v10995_v24  ;;  %v5991_v43 = vsel %vm1776_vm6, %v5988_v26, %v5990_v27 }
0x1109   :  { %v8459_v45 = vpop.eup %8458  ;;  %7685 = vmatprep.mubr.msk.f32.mxu1 %vm512_vm5, %v5458_v47  ;;  %v5460_v10 = vmul.f32 %v8457_v53, %v11012_v31  ;;  %v11668_v47 = vld [vmem:[#allocation6_spill] sm:$0xff] }
0x110a   :  { %v8461_v38 = vpop.eup %8460  ;;  %v5461_v46 = vmul.f32 %v8459_v45, %v11017_v55 }
0x110b   :  { %v8463_v32 = vpop.eup %8462  ;;  %v5416_v8 = vadd.f32 1.0, %v8461_v38 }
0x110c   :  { %v8465_v7 = vpop.eup %8464  ;;  %7686 = vmatmul.mubr.msk.f32.gmra.mrb[60].mxu1 %vm512_vm5, %v5459_v52  ;;  %v5462_v17 = vmul.f32 %v8463_v32, %v11026_v49 }
0x110d   :  { %v8467_v63 = vpop.eup %8466  ;;  %7688 = vmatprep.mubr.msk.f32.mxu1 %vm512_vm5, %v5460_v10  ;;  %8476 = vrcp.f32 %v5416_v8  ;;  %v5463_v5 = vmul.f32 %v8465_v7, %v11029_v62 }
0x110e   :  { %v8469_v48 = vpop.eup %8468  ;;  %v5417_v18 = vadd.f32 1.0, %v8467_v63 }
0x110f   :  { %v8471_v58 = vpop.eup %8470  ;;  %v5418_v24 = vadd.f32 1.0, %v8469_v48 }
0x1110   :  { %v8473_v28 = vpop.eup %8472  ;;  %7689 = vmatmul.mubr.msk.f32.gmra.mrb[62].mxu1 %vm512_vm5, %v5461_v46  ;;  %8478 = vrcp.f32 %v5417_v18  ;;  %v5419_v31 = vadd.f32 1.0, %v8471_v58 }
0x1111   :  { %7691 = vmatprep.mubr.msk.f32.mxu1 %vm512_vm5, %v5462_v17  ;;  %8480 = vrcp.f32 %v5418_v24  ;;  %v8475_v11 = vpop.eup %8474  ;;  %v5422_v55 = vadd.f32 1.0, %v8473_v28 }
0x1112   :  { %8482 = vrcp.f32 %v5419_v31  ;;  %v5423_v49 = vadd.f32 1.0, %v8475_v11 }
0x1113   :  { %8484 = vrcp.f32 %v5420_v0 }
0x1114   :  { %7692 = vmatmul.mubr.msk.f32.gmra.mrb[64].mxu1 %vm512_vm5, %v5463_v5  ;;  %8486 = vrcp.f32 %v5421_v21 }
0x1115   :  { %8488 = vrcp.f32 %v5422_v55 }
0x1116   :  { %8490 = vrcp.f32 %v5423_v49 }
0x1117   :  { %v8477_v42 = vpop.eup %8476 }
0x1118   :  { %v5464_v9 = vmul.f32 %v8477_v42, %v11046_v20 }
0x111a   :  { %v8479_v50 = vpop.eup %8478  ;;  %7694 = vmatprep.mubr.msk.f32.mxu1 %vm512_vm5, %v5464_v9 }
0x111b   :  { %v8481_v19 = vpop.eup %8480  ;;  %v5465_v54 = vmul.f32 %v8479_v50, %v11049_v34 }
0x111c   :  { %v8483_v62 = vpop.eup %8482  ;;  %v5466_v14 = vmul.f32 %v8481_v19, %v11053_v36 }
0x111d   :  { %v8485_v23 = vpop.eup %8484  ;;  %7695 = vmatmul.mubr.msk.f32.gmra.mrb[66].mxu1 %vm512_vm5, %v5465_v54  ;;  %v5467_v37 = vmul.f32 %v8483_v62, %v11056_v57 }
0x111e   :  { %7697 = vmatprep.mubr.msk.f32.mxu1 %vm512_vm5, %v5466_v14  ;;  %v8487_v6 = vpop.eup %8486  ;;  %v5468_v20 = vmul.f32 %v8485_v23, %v11034_v30  ;;  %v6954_v30 = vld [vmem:[%s11404_s7 + $0x2d8] sm:$0xff] }
0x111f   :  { %v8489_v56 = vpop.eup %8488  ;;  %v5469_v34 = vmul.f32 %v8487_v6, %v10999_v41  ;;  %v11667_v41 = vld [vmem:[#allocation45_spill] sm:$0xff] }
0x1120   :  { %v8491_v12 = vpop.eup %8490  ;;  %v5470_v15 = vmul.f32 %v8489_v56, %v11060_v33  ;;  %v5979_v57 = vrot.slane %v11667_v41, 6  ;;  %v5980_v33 = vrot.slane %v6954_v30, 6  ;;  %v11135_v53 = vrot.slane %v11667_v41, %v11668_v47 }
0x1121   :  { %7698 = vmatmul.mubr.msk.f32.gmra.mrb[68].mxu1 %vm512_vm5, %v5467_v37  ;;  %v5471_v36 = vmul.f32 %v8491_v12, %v11066_v29  ;;  %v5986_v29 = vrot.slane %v6957_v25, 6 }
0x1122   :  { %7700 = vmatprep.mubr.msk.f32.mxu1 %vm512_vm5, %v5468_v20  ;;  %v5981_v39 = vsel %vm1776_vm6, %v5979_v57, %v5980_v33  ;;  %v5983_v35 = vsel %vm1776_vm6, %v5980_v33, %v5982_v59 }
0x1123   :  { %v7918_v61 = vpack.c.bf16 %v5983_v35, %v5981_v39  ;;  %v5987_v16 = vsel %vm1776_vm6, %v5984_v44, %v5986_v29  ;;  %v5989_v13 = vsel %vm1776_vm6, %v5986_v29, %v5988_v26 }
0x1124   :  { %v7922_v4 = vpack.c.bf16 %v5987_v16, %v5985_v51  ;;  %v7926_v1 = vpack.c.bf16 %v5991_v43, %v5989_v13 }
0x1125   :  { %7701 = vmatmul.mubr.msk.f32.gmra.mrb[70].mxu1 %vm512_vm5, %v5469_v34  ;;  %7919 = vmatprep.subr.bf16.mxu0 %v7918_v61 }
0x1126   :  { %7703 = vmatprep.mubr.msk.f32.mxu1 %vm512_vm5, %v5470_v15  ;;  %7921 = vmatpush3.bf16.msra.mxu0 %v7918_v61 }
0x1127   :  { %7923 = vmatprep.subr.bf16.mxu0 %v7922_v4 }
0x1129   :  { %7704 = vmatmul.mubr.msk.f32.gmra.mrb[72].mxu1 %vm512_vm5, %v5471_v36 }
0x112a   :  { %7925 = vmatpush3.bf16.msra.mxu0 %v7922_v4 }
0x112b   :  { %7927 = vmatprep.subr.bf16.mxu0 %v7926_v1 }
0x112e   :  { %7929 = vmatpush3.bf16.msra.mxu0 %v7926_v1  ;;  %v11669_v1 = vld [vmem:[#allocation27_spill] sm:$0xff] }
0x11db   :  { %v7684_v45 = vpop.f32.mrb[58].mxu1 }
0x11dc   :  { %v11138_v38 = vadd.f32 %v7684_v45, %v11135_v53  ;;  %v5607_v52 = vpop.f32.mrb[59].mxu1 }
0x11dd   :  { %v11141_v32 = vadd.f32 %v5607_v52, %v11135_v53 }
0x11de   :  { %v7019_v10 = vmul.f32 -1.442695, %v11138_v38 }
0x11df   :  { %v7018_v8 = vmul.f32 -1.442695, %v11141_v32  ;;  %v7687_v7 = vpop.f32.mrb[60].mxu1 }
0x11e0   :  { %8492 = vpow2.f32 %v7019_v10  ;;  %v11146_v63 = vadd.f32 %v7687_v7, %v11135_v53  ;;  %v5617_v48 = vpop.f32.mrb[61].mxu1 }
0x11e1   :  { %8494 = vpow2.f32 %v7018_v8  ;;  %v11149_v46 = vadd.f32 %v5617_v48, %v11135_v53 }
0x11e2   :  { %v7021_v18 = vmul.f32 -1.442695, %v11146_v63 }
0x11e3   :  { %v7020_v58 = vmul.f32 -1.442695, %v11149_v46  ;;  %v7690_v0 = vpop.f32.mrb[62].mxu1 }
0x11e4   :  { %8496 = vpow2.f32 %v7021_v18  ;;  %v11154_v17 = vadd.f32 %v7690_v0, %v11135_v53  ;;  %v5627_v24 = vpop.f32.mrb[63].mxu1 }
0x11e5   :  { %8498 = vpow2.f32 %v7020_v58  ;;  %v11157_v28 = vadd.f32 %v5627_v24, %v11135_v53 }
0x11e6   :  { %v7023_v31 = vmul.f32 -1.442695, %v11154_v17 }
0x11e7   :  { %v7022_v21 = vmul.f32 -1.442695, %v11157_v28  ;;  %v7693_v5 = vpop.f32.mrb[64].mxu1 }
0x11e8   :  { %8500 = vpow2.f32 %v7023_v31  ;;  %v11162_v11 = vadd.f32 %v7693_v5, %v11135_v53  ;;  %v5637_v55 = vpop.f32.mrb[65].mxu1 }
0x11e9   :  { %8502 = vpow2.f32 %v7022_v21  ;;  %v11165_v49 = vadd.f32 %v5637_v55, %v11135_v53 }
0x11ea   :  { %v8493_v42 = vpop.eup %8492  ;;  %v7025_v9 = vmul.f32 -1.442695, %v11162_v11 }
0x11eb   :  { %v8495_v50 = vpop.eup %8494  ;;  %v5735_v19 = vadd.f32 1.0, %v8493_v42  ;;  %v7024_v54 = vmul.f32 -1.442695, %v11165_v49  ;;  %v11671_v42 = vld [vmem:[#allocation25_spill] sm:$0xff] }
0x11ec   :  { %v5734_v62 = vadd.f32 1.0, %v8495_v50  ;;  %8504 = vpow2.f32 %v7025_v9 }
0x11ed   :  { %8506 = vrcp.f32 %v5735_v19 }
0x11ee   :  { %v8497_v14 = vpop.eup %8496  ;;  %8508 = vrcp.f32 %v5734_v62 }
0x11ef   :  { %v8499_v23 = vpop.eup %8498  ;;  %v5737_v37 = vadd.f32 1.0, %v8497_v14  ;;  %8510 = vpow2.f32 %v7024_v54  ;;  %v11672_v54 = vld [vmem:[#allocation23_spill] sm:$0xff] }
0x11f0   :  { %v5736_v6 = vadd.f32 1.0, %v8499_v23  ;;  %v7696_v20 = vpop.f32.mrb[66].mxu1 }
0x11f1   :  { %8512 = vrcp.f32 %v5737_v37  ;;  %v11170_v56 = vadd.f32 %v7696_v20, %v11135_v53  ;;  %v5647_v34 = vpop.f32.mrb[67].mxu1 }
0x11f2   :  { %v8501_v12 = vpop.eup %8500  ;;  %8514 = vrcp.f32 %v5736_v6  ;;  %v11173_v15 = vadd.f32 %v5647_v34, %v11135_v53 }
0x11f3   :  { %v8503_v36 = vpop.eup %8502  ;;  %v5739_v30 = vadd.f32 1.0, %v8501_v12  ;;  %v7027_v60 = vmul.f32 -1.442695, %v11170_v56 }
0x11f4   :  { %v5738_v41 = vadd.f32 1.0, %v8503_v36  ;;  %v7699_v57 = vpop.f32.mrb[68].mxu1  ;;  %v7026_v25 = vmul.f32 -1.442695, %v11173_v15 }
0x11f5   :  { %8516 = vrcp.f32 %v5739_v30  ;;  %v11177_v40 = vadd.f32 %v7699_v57, %v11135_v53  ;;  %v5657_v33 = vpop.f32.mrb[69].mxu1  ;;  %v11673_v57 = vld [vmem:[#allocation28_spill] sm:$0xff] }
0x11f6   :  { %v8505_v59 = vpop.eup %8504  ;;  %8518 = vrcp.f32 %v5738_v41  ;;  %v11181_v44 = vadd.f32 %v5657_v33, %v11135_v53 }
0x11f7   :  { %v8507_v22 = vpop.eup %8506  ;;  %v5741_v29 = vadd.f32 1.0, %v8505_v59  ;;  %8520 = vpow2.f32 %v7027_v60  ;;  %v7029_v26 = vmul.f32 -1.442695, %v11177_v40 }
0x11f8   :  { %v8509_v39 = vpop.eup %8508  ;;  %v5783_v35 = vmul.f32 %v8507_v22, %v11138_v38  ;;  %v7702_v51 = vpop.f32.mrb[70].mxu1  ;;  %v7028_v4 = vmul.f32 -1.442695, %v11181_v44  ;;  %v11670_v38 = vld [vmem:[#allocation22_spill] sm:$0xff] }
0x11f9   :  { %v8511_v61 = vpop.eup %8510  ;;  %v5782_v16 = vmul.f32 %v8509_v39, %v11141_v32  ;;  %8522 = vrcp.f32 %v5741_v29  ;;  %v11188_v13 = vadd.f32 %v7702_v51, %v11135_v53  ;;  %v5667_v43 = vpop.f32.mrb[71].mxu1  ;;  %v11674_v29 = vld [vmem:[#allocation26_spill] sm:$0xff] }
0x11fa   :  { %v5799_v47 = vmul.f32 %v5783_v35, %v11669_v1  ;;  %v5740_v45 = vadd.f32 1.0, %v8511_v61  ;;  %8524 = vpow2.f32 %v7026_v25  ;;  %v11192_v52 = vadd.f32 %v5667_v43, %v11135_v53 }
0x11fb   :  { %v8513_v10 = vpop.eup %8512  ;;  %v5798_v8 = vmul.f32 %v5782_v16, %v11670_v38  ;;  %8526 = vpow2.f32 %v7029_v26  ;;  %v7031_v32 = vmul.f32 -1.442695, %v11188_v13 }
0x11fc   :  { %v8515_v7 = vpop.eup %8514  ;;  %v5821_v48 = vsel %vm512_vm5, %v5799_v47, 0.0  ;;  %v5785_v18 = vmul.f32 %v8513_v10, %v11146_v63  ;;  %8528 = vrcp.f32 %v5740_v45  ;;  %v7030_v58 = vmul.f32 -1.442695, %v11192_v52  ;;  %v7705_v0 = vpop.f32.mrb[72].mxu1 }
0x11fd   :  { %v5822_v24 = vrot.slane %v5821_v48, 4  ;;  %v5814_v31 = vsel %vm512_vm5, %v5798_v8, 0.0  ;;  %v5784_v21 = vmul.f32 %v8515_v7, %v11149_v46  ;;  %8530 = vpow2.f32 %v7028_v4  ;;  %v5677_v5 = vpop.f32.mrb[73].mxu1 }
0x11fe   :  { %v5815_v55 = vrot.slane %v5814_v31, 4  ;;  %v5801_v9 = vmul.f32 %v5785_v18, %v11671_v42  ;;  %8532 = vpow2.f32 %v7031_v32  ;;  %v11203_v50 = vadd.f32 %v7705_v0, %v11135_v53  ;;  %v11675_v32 = vld [vmem:[#allocation32_spill] sm:$0xff] }
0x11ff   :  { %v8517_v19 = vpop.eup %8516  ;;  %v5823_v63 = vadd.f32 %v5822_v24, %v5821_v48  ;;  %v5800_v62 = vmul.f32 %v5784_v21, %v11672_v54  ;;  %8534 = vpow2.f32 %v7030_v58  ;;  %v11209_v6 = vadd.f32 %v5677_v5, %v11135_v53  ;;  %v11676_v54 = vld [vmem:[#allocation30_spill] sm:$0xff] }
0x1200   :  { %v8519_v14 = vpop.eup %8518  ;;  %v5816_v23 = vadd.f32 %v5815_v55, %v5814_v31  ;;  %v5835_v37 = vsel %vm512_vm5, %v5801_v9, 0.0  ;;  %v5787_v46 = vmul.f32 %v8517_v19, %v11154_v17  ;;  %v11215_v59 = vmul.f32 -1.442695, %v11203_v50 }
0x1201   :  { %v8521_v20 = vpop.eup %8520  ;;  %v5824_v34 = vrot.slane %v5823_v63, 2  ;;  %v5836_v12 = vrot.slane %v5835_v37, 4  ;;  %v5828_v36 = vsel %vm512_vm5, %v5800_v62, 0.0  ;;  %v5786_v30 = vmul.f32 %v8519_v14, %v11157_v28 }
0x1202   :  { %v5817_v60 = vrot.slane %v5816_v23, 2  ;;  %v5829_v41 = vrot.slane %v5828_v36, 4  ;;  %v5803_v33 = vmul.f32 %v5787_v46, %v11673_v57  ;;  %v5743_v26 = vadd.f32 1.0, %v8521_v20 }
0x1203   :  { %v8523_v25 = vpop.eup %8522  ;;  %v5825_v22 = vadd.f32 %v5824_v34, %v5823_v63  ;;  %v5837_v17 = vadd.f32 %v5836_v12, %v5835_v37  ;;  %v5802_v53 = vmul.f32 %v5786_v30, %v11674_v29 }
0x1204   :  { %v8525_v39 = vpop.eup %8524  ;;  %v5818_v35 = vadd.f32 %v5817_v60, %v5816_v23  ;;  %v5830_v51 = vadd.f32 %v5829_v41, %v5828_v36  ;;  %v5849_v61 = vsel %vm512_vm5, %v5803_v33, 0.0  ;;  %v5789_v28 = vmul.f32 %v8523_v25, %v11162_v11 }
0x1205   :  { %v8527_v16 = vpop.eup %8526  ;;  %v5826_v4 = vrot.slane %v5825_v22, 1  ;;  %v5838_v43 = vrot.slane %v5837_v17, 2  ;;  %v5850_v1 = vrot.slane %v5849_v61, 4  ;;  %v5842_v47 = vsel %vm512_vm5, %v5802_v53, 0.0 }
0x1206   :  { %v8529_v45 = vpop.eup %8528  ;;  %v5819_v10 = vrot.slane %v5818_v35, 1  ;;  %v5831_v38 = vrot.slane %v5830_v51, 2  ;;  %v5843_v8 = vrot.slane %v5842_v47, 4  ;;  %v5805_v7 = vmul.f32 %v5789_v28, %v11675_v32 }
0x1207   :  { %v8531_v48 = vpop.eup %8530  ;;  %v5839_v18 = vadd.f32 %v5838_v43, %v5837_v17  ;;  %v5851_v58 = vadd.f32 %v5850_v1, %v5849_v61  ;;  %v5788_v0 = vmul.f32 %v8529_v45, %v11165_v49  ;;  %v5742_v24 = vadd.f32 1.0, %v8525_v39  ;;  %v6960_v39 = vld [vmem:[%s11404_s7 + $0x308] sm:$0xff]  ;;  %v11238_v1 = vld [vmem:[%s11404_s7 + $0x318] sm:$0xff] }
0x1208   :  { %v8533_v31 = vpop.eup %8532  ;;  %v5827_v11 = vadd.f32 %v5826_v4, %v5825_v22  ;;  %v5832_v21 = vadd.f32 %v5831_v38, %v5830_v51  ;;  %v5844_v5 = vadd.f32 %v5843_v8, %v5842_v47  ;;  %v5863_v55 = vsel %vm512_vm5, %v5805_v7, 0.0 }
0x1209   :  { %v8535_v42 = vpop.eup %8534  ;;  %v5820_v9 = vadd.f32 %v5819_v10, %v5818_v35  ;;  %v5852_v19 = vrot.slane %v5851_v58, 2  ;;  %v5864_v63 = vrot.slane %v5863_v55, 4  ;;  %v5804_v62 = vmul.f32 %v5788_v0, %v11676_v54  ;;  %v6961_v35 = vld [vmem:[%s11404_s7 + $0x310] sm:$0xff] }
0x120a   :  { %v5833_v14 = vrot.slane %v5832_v21, 1  ;;  %v5845_v23 = vrot.slane %v5844_v5, 2  ;;  %8536 = vrcp.f32 %v5743_v26  ;;  %v5745_v37 = vadd.f32 1.0, %v8527_v16  ;;  %v11678_v54 = vld [vmem:[#allocation24_spill] sm:$0xff] }
0x120b   :  { %v5840_v46 = vrot.slane %v5839_v18, 1  ;;  %v5853_v20 = vadd.f32 %v5852_v19, %v5851_v58  ;;  %v5865_v49 = vadd.f32 %v5864_v63, %v5863_v55  ;;  %v5856_v34 = vsel %vm512_vm5, %v5804_v62, 0.0  ;;  %v11677_v55 = vld [vmem:[#allocation29_spill] sm:$0xff] }
0x120c   :  { %v5834_v12 = vadd.f32 %v5833_v14, %v5832_v21  ;;  %v5846_v36 = vadd.f32 %v5845_v23, %v5844_v5  ;;  %v5857_v30 = vrot.slane %v5856_v34, 4  ;;  %8538 = vrcp.f32 %v5742_v24 }
0x120d   :  { %v5854_v60 = vrot.slane %v5853_v20, 1  ;;  %v5866_v41 = vrot.slane %v5865_v49, 2  ;;  %8540 = vrcp.f32 %v5745_v37  ;;  %v5744_v57 = vadd.f32 1.0, %v8531_v48 }
0x120e   :  { %v5847_v33 = vrot.slane %v5846_v36, 1  ;;  %v5858_v25 = vadd.f32 %v5857_v30, %v5856_v34  ;;  %v5747_v22 = vadd.f32 1.0, %v8533_v31  ;;  %v5746_v17 = vadd.f32 1.0, %v8535_v42 }
0x120f   :  { %v5841_v29 = vadd.f32 %v5840_v46, %v5839_v18  ;;  %8542 = vrcp.f32 %v5744_v57  ;;  %v7032_v53 = vmul.f32 -1.442695, %v11209_v6  ;;  %v5867_v26 = vadd.f32 %v5866_v41, %v5865_v49  ;;  %v11679_v46 = vld [vmem:[#allocation33_spill] sm:$0xff]  ;;  %v11680_v57 = vld [vmem:[#allocation31_spill] sm:$0xff] }
0x1210   :  { %v5848_v51 = vadd.f32 %v5847_v33, %v5846_v36  ;;  %v5859_v61 = vrot.slane %v5858_v25, 2  ;;  %8544 = vrcp.f32 %v5747_v22  ;;  %v5942_v28 = vsel %vm331_vm7, %v5827_v11, %v5820_v9  ;;  %v11681_v22 = vld [vmem:[#allocation35_spill] sm:$0xff] }
0x1211   :  { %8546 = vrcp.f32 %v5746_v17  ;;  %v5855_v16 = vadd.f32 %v5854_v60, %v5853_v20  ;;  %v5943_v4 = vsel %vm332_vm8, %v5834_v12, %v5942_v28  ;;  %v5992_v43 = vrot.slane %v6960_v39, 6  ;;  %v36_v12 = vld [vmem:[%s11409_s2] sm:$0xff] }
0x1212   :  { %v5860_v47 = vadd.f32 %v5859_v61, %v5858_v25  ;;  %8548 = vpow2.f32 %v11215_v59  ;;  %v5944_v45 = vsel %vm334_vm9, %v5841_v29, %v5943_v4  ;;  %v5994_v10 = vrot.slane %v6961_v35, 6 }
0x1213   :  { %8550 = vpow2.f32 %v7032_v53  ;;  %v5868_v38 = vrot.slane %v5867_v26, 1  ;;  %v5945_v8 = vsel %vm336_vm10, %v5848_v51, %v5944_v45  ;;  %v5993_v32 = vsel %vm1776_vm6, %v5990_v27, %v5992_v43 }
0x1214   :  { %v8537_v7 = vpop.eup %8536  ;;  %v5861_v48 = vrot.slane %v5860_v47, 1  ;;  %v5946_v18 = vsel %vm338_vm11, %v5855_v16, %v5945_v8  ;;  %v5995_v58 = vsel %vm1776_vm6, %v5992_v43, %v5994_v10  ;;  %v5996_v0 = vrot.slane %v11238_v1, 6  ;;  %v11682_v16 = vld [vmem:[#allocation34_spill] sm:$0xff] }
0x1215   :  { %v5791_v59 = vmul.f32 %v8537_v7, %v11170_v56  ;;  %v7930_v24 = vpack.c.bf16 %v5995_v58, %v5993_v32  ;;  %v5869_v42 = vadd.f32 %v5868_v38, %v5867_v26 }
0x1216   :  { %v8539_v31 = vpop.eup %8538  ;;  %v5862_v11 = vadd.f32 %v5861_v48, %v5860_v47  ;;  %v5997_v21 = vsel %vm1776_vm6, %v5994_v10, %v5996_v0 }
0x1217   :  { %v8541_v5 = vpop.eup %8540  ;;  %v5807_v3 = vmul.f32 %v5791_v59, %v11677_v55  ;;  %v5790_v27 = vmul.f32 %v8539_v31, %v11173_v15  ;;  %7931 = vmatprep.subr.bf16.mxu0 %v7930_v24 }
0x1218   :  { %v5793_v9 = vmul.f32 %v8541_v5, %v11177_v40  ;;  %v5947_v19 = vsel %vm340_vm12, %v5862_v11, %v5946_v18  ;;  %7933 = vmatpush3.bf16.msra.mxu0 %v7930_v24 }
0x1219   :  { %v8543_v63 = vpop.eup %8542  ;;  %v5877_v56 = vsel %vm512_vm5, %v5807_v3, 0.0  ;;  %v5806_v62 = vmul.f32 %v5790_v27, %v11678_v54  ;;  %v5948_v14 = vsel %vm342_vm13, %v5869_v42, %v5947_v19  ;;  %7722 = vmatprep.subr.msk.mxu0 %vm85_vm0, %v5997_v21 }
0x121a   :  { %v8545_v23 = vpop.eup %8544  ;;  %v5878_v37 = vrot.slane %v5877_v56, 4  ;;  %v5809_v15 = vmul.f32 %v5793_v9, %v11679_v46  ;;  %v5792_v20 = vmul.f32 %v8543_v63, %v11181_v44  ;;  %5956 = vrot.lane.b32.xlu0 %v5948_v14, %s8627_s22 }
0x121b   :  { %v8547_v40 = vpop.eup %8546  ;;  %v5870_v49 = vsel %vm512_vm5, %v5806_v62, 0.0  ;;  %v5795_v34 = vmul.f32 %v8545_v23, %v11188_v13 }
0x121c   :  { %v8549_v36 = vpop.eup %8548  ;;  %v5879_v30 = vadd.f32 %v5878_v37, %v5877_v56  ;;  %v5871_v60 = vrot.slane %v5870_v49, 4  ;;  %v5891_v41 = vsel %vm512_vm5, %v5809_v15, 0.0  ;;  %v5808_v33 = vmul.f32 %v5792_v20, %v11680_v57  ;;  %7723 = vmatpush3.msk.msra.mxu0 %vm85_vm0, %v5997_v21 }
0x121d   :  { %v8551_v44 = vpop.eup %8550  ;;  %v5892_v25 = vrot.slane %v5891_v41, 4  ;;  %v5811_v17 = vmul.f32 %v5795_v34, %v11681_v22  ;;  %v5794_v29 = vmul.f32 %v8547_v40, %v11192_v52  ;;  %v5749_v13 = vadd.f32 1.0, %v8549_v36  ;;  %v11683_v40 = vld [vmem:[#allocation36_spill] sm:$0xff] }
0x121e   :  { %v5880_v53 = vrot.slane %v5879_v30, 2  ;;  %v5872_v26 = vadd.f32 %v5871_v60, %v5870_v49  ;;  %v5884_v39 = vsel %vm512_vm5, %v5808_v33, 0.0  ;;  %v5748_v35 = vadd.f32 1.0, %v8551_v44  ;;  %6431 = vperm.xlu0 %7989, %v36_v12   ;;  %v11684_v12 = vld [vmem:[#allocation37_spill] sm:$0xff] }
0x121f   :  { %v5893_v51 = vadd.f32 %v5892_v25, %v5891_v41  ;;  %v5885_v61 = vrot.slane %v5884_v39, 4  ;;  %v5905_v28 = vsel %vm512_vm5, %v5811_v17, 0.0  ;;  %v5810_v4 = vmul.f32 %v5794_v29, %v11682_v16  ;;  %v11685_v16 = vld [vmem:[#allocation41_spill] sm:$0xff] }
0x1220   :  { %v5881_v43 = vadd.f32 %v5880_v53, %v5879_v30  ;;  %v5873_v47 = vrot.slane %v5872_v26, 2  ;;  %v5906_v45 = vrot.slane %v5905_v28, 4  ;;  %8552 = vrcp.f32 %v5749_v13 }
0x1221   :  { %v5894_v10 = vrot.slane %v5893_v51, 2  ;;  %v5886_v38 = vadd.f32 %v5885_v61, %v5884_v39  ;;  %v5898_v52 = vsel %vm512_vm5, %v5810_v4, 0.0  ;;  %8554 = vrcp.f32 %v5748_v35  ;;  %v37_v61 = vld [vmem:[%s11409_s2 + $0x8] sm:$0xff] }
0x1222   :  { %v5882_v8 = vrot.slane %v5881_v43, 1  ;;  %v5874_v32 = vadd.f32 %v5873_v47, %v5872_v26  ;;  %v5907_v7 = vadd.f32 %v5906_v45, %v5905_v28  ;;  %v5899_v48 = vrot.slane %v5898_v52, 4 }
0x1223   :  { %v5895_v18 = vadd.f32 %v5894_v10, %v5893_v51  ;;  %v5887_v58 = vrot.slane %v5886_v38, 2  ;;  %v11687_v10 = vld [vmem:[#allocation44_spill] sm:$0xff]  ;;  %vm6334_vm0 = vcmask 1046528  }
0x1224   :  { %v5883_v0 = vadd.f32 %v5882_v8, %v5881_v43  ;;  %v5875_v59 = vrot.slane %v5874_v32, 1  ;;  %v5908_v24 = vrot.slane %v5907_v7, 2  ;;  %v5900_v31 = vadd.f32 %v5899_v48, %v5898_v52  ;;  %v11686_v43 = vld [vmem:[#allocation38_spill] sm:$0xff]  ;;  %v11688_v52 = vld [vmem:[#allocation39_spill] sm:$0xff] }
0x1225   :  { %v5888_v11 = vadd.f32 %v5887_v58, %v5886_v38  ;;  %v5896_v5 = vrot.slane %v5895_v18, 1  ;;  %v6107_v48 = vrot.slane %v11238_v1, 3 }
0x1226   :  { %v5876_v21 = vadd.f32 %v5875_v59, %v5874_v32  ;;  %v5909_v55 = vadd.f32 %v5908_v24, %v5907_v7  ;;  %v5901_v3 = vrot.slane %v5900_v31, 2  ;;  %v6963_v32 = vld [vmem:[%s11404_s7 + $0x320] sm:$0xff]  ;;  %v6964_v7 = vld [vmem:[%s11404_s7 + $0x328] sm:$0xff] }
0x1227   :  { %v5889_v27 = vrot.slane %v5888_v11, 1  ;;  %v5897_v54 = vadd.f32 %v5896_v5, %v5895_v18  ;;  %v6108_v18 = vrot.slane %v6963_v32, 3  ;;  %v6110_v58 = vrot.slane %v6964_v7, 3 }
0x1228   :  { %v5902_v42 = vadd.f32 %v5901_v3, %v5900_v31  ;;  %v5949_v9 = vsel %vm331_vm7, %v5883_v0, %v5876_v21  ;;  %v5910_v63 = vrot.slane %v5909_v55, 1  ;;  %v6965_v31 = vld [vmem:[%s11404_s7 + $0x330] sm:$0xff] }
0x1229   :  { %v5890_v19 = vadd.f32 %v5889_v27, %v5888_v11  ;;  %v6109_v0 = vsel %vm1906_vm1, %v6107_v48, %v6108_v18  ;;  %v6111_v59 = vsel %vm1906_vm1, %v6108_v18, %v6110_v58  ;;  %v6966_v11 = vld [vmem:[%s11404_s7 + $0x338] sm:$0xf]  ;;  %v6112_v21 = vrot.slane %v6965_v31, 3 }
0x122a   :  { %v8553_v56 = vpop.eup %8552  ;;  %v5903_v62 = vrot.slane %v5902_v42, 1  ;;  %v5911_v34 = vadd.f32 %v5910_v63, %v5909_v55  ;;  %v7934_v24 = vpack.c.bf16 %v6111_v59, %v6109_v0  ;;  %v6114_v5 = vrot.slane %v6966_v11, 3  ;;  %v11689_v63 = vld [vmem:[#allocation3_spill] sm:$0xff] }
0x122b   :  { %v8555_v14 = vpop.eup %8554  ;;  %v5797_v23 = vmul.f32 %v8553_v56, %v11203_v50  ;;  %v5950_v37 = vsel %vm332_vm8, %v5890_v19, %v5949_v9  ;;  %v6113_v55 = vsel %vm1906_vm1, %v6110_v58, %v6112_v21  ;;  %v6210_v9 = vld [vmem:[%s11410_s8 + $0x8] sm:$0xff]  ;;  %v5969_v56 = vrot.slane %v11238_v1, %v11689_v63  ;;  %v6211_v1 = vld [vmem:[%s11410_s8 + $0x10] sm:$0xff] }
0x122c   :  { %v5904_v46 = vadd.f32 %v5903_v62, %v5902_v42  ;;  %v5796_v15 = vmul.f32 %v8555_v14, %v11209_v6  ;;  %v5951_v20 = vsel %vm334_vm9, %v5897_v54, %v5950_v37  ;;  %7935 = vmatprep.subr.bf16.mxu1 %v7934_v24  ;;  %v6115_v3 = vsel %vm1906_vm1, %v6112_v21, %v6114_v5  ;;  %v6209_v42 = vld [vmem:[%s11410_s8] sm:$0xff] }
0x122d   :  { %v5813_v49 = vmul.f32 %v5797_v23, %v11683_v40  ;;  %7937 = vmatpush3.bf16.msra.mxu1 %v7934_v24  ;;  %v7938_v27 = vpack.c.bf16 %v6115_v3, %v6113_v55  ;;  %v7942_v19 = vpack.c.bf16 %v6210_v9, %v6209_v42 }
0x122e   :  { %v5812_v36 = vmul.f32 %v5796_v15, %v11684_v12  ;;  %v5952_v30 = vsel %vm336_vm10, %v5904_v46, %v5951_v20 }
0x122f   :  { %v5919_v60 = vsel %vm512_vm5, %v5813_v49, 0.0  ;;  %v5953_v41 = vsel %vm338_vm11, %v5911_v34, %v5952_v30  ;;  %7939 = vmatprep.subr.bf16.mxu1 %v7938_v27  ;;  %7943 = vmatprep.subr.bf16.mxu0 %v7942_v19 }
0x1230   :  { %v5920_v57 = vrot.slane %v5919_v60, 4  ;;  %v5912_v50 = vsel %vm512_vm5, %v5812_v36, 0.0 }
0x1231   :  { %v5913_v33 = vrot.slane %v5912_v50, 4  ;;  %7941 = vmatpush3.bf16.msra.mxu1 %v7938_v27  ;;  %v6219_v27 = vld [vmem:[%s11410_s8 + $0x50] sm:$0xff] }
0x1232   :  { %v5921_v44 = vadd.f32 %v5920_v57, %v5919_v60  ;;  %v6212_v60 = vld [vmem:[%s11410_s8 + $0x18] sm:$0xff] }
0x1233   :  { %v5914_v25 = vadd.f32 %v5913_v33, %v5912_v50  ;;  %v11690_v50 = vld [vmem:[#allocation4_spill] sm:$0xff] }
0x1234   :  { %v5922_v6 = vrot.slane %v5921_v44, 2  ;;  %v6206_v33 = vrot.slane %v6966_v11, %v11690_v50 }
0x1235   :  { %v5915_v22 = vrot.slane %v5914_v25, 2 }
0x1236   :  { %v5923_v17 = vadd.f32 %v5922_v6, %v5921_v44 }
0x1237   :  { %v5916_v29 = vadd.f32 %v5915_v22, %v5914_v25 }
0x1238   :  { %v5924_v13 = vrot.slane %v5923_v17, 1 }
0x1239   :  { %v5917_v53 = vrot.slane %v5916_v29, 1 }
0x123a   :  { %v5925_v39 = vadd.f32 %v5924_v13, %v5923_v17  ;;  %v6213_v13 = vld [vmem:[%s11410_s8 + $0x20] sm:$0xff] }
0x123b   :  { %v5918_v26 = vadd.f32 %v5917_v53, %v5916_v29  ;;  %v11691_v29 = vmov 0.0   ;;  %v6214_v53 = vld [vmem:[%s11410_s8 + $0x28] sm:$0xff] }
0x123d   :  { %v5954_v35 = vsel %vm340_vm12, %v5918_v26, %v5953_v41  ;;  %v7946_v41 = vpack.c.bf16 %v6212_v60, %v6211_v1  ;;  %v6215_v26 = vld [vmem:[%s11410_s8 + $0x30] sm:$0xff] }
0x123e   :  { %v5955_v51 = vsel %vm342_vm13, %v5925_v39, %v5954_v35  ;;  %v6335_v39 = vrot.slane %v6213_v13, 1  ;;  %v6336_v35 = vrot.slane %v6214_v53, 1 }
0x123f   :  { %5958 = vrot.lane.b32.xlu1 %v5955_v51, %s8627_s22  ;;  %v6338_v51 = vrot.slane %v6215_v26, 1 }
0x1243   :  { %6436 = vperm.xlu1 %7988, %v37_v61   ;;  %v6337_v61 = vsel %vm6334_vm0, %v6335_v39, %v6336_v35 }
0x128c   :  { %v5957_v28 = vpop.permute.xlu0 %5956 }
0x128d   :  { %v5962_v4 = vsel %vm512_vm5, %v11685_v16, %v5957_v28  ;;  %v6339_v28 = vsel %vm6334_vm0, %v6336_v35, %v6338_v51 }
0x128e   :  { %v5964_v47 = vsel %vm1760_vm14, %v5962_v4, %v11686_v43  ;;  %v6216_v4 = vld [vmem:[%s11410_s8 + $0x38] sm:$0xff]  ;;  %v6217_v43 = vld [vmem:[%s11410_s8 + $0x40] sm:$0xff] }
0x128f   :  { %7724 = vmatprep.mubr.msk.f32.mxu0 %vm1804_vm15, %v5964_v47  ;;  %v6340_v47 = vrot.slane %v6216_v4, 1  ;;  %v6467_v42 = vrot.slane %v6217_v43, 2 }
0x12b1   :  { %v5959_v45 = vpop.permute.xlu1 %5958 }
0x12b2   :  { %v5963_v38 = vsel %vm512_vm5, %v11687_v10, %v5959_v45  ;;  %v6342_v45 = vrot.slane %v6217_v43, 1 }
0x12b3   :  { %v5965_v8 = vsel %vm1760_vm14, %v5963_v38, %v11688_v52 }
0x12b4   :  { %7725 = vmatmul.mubr.msk.f32.vlgmr.msra.gmra.mrb[80].mxu0 %vm1804_vm15, %v5965_v8  ;;  %v6343_v38 = vsel %vm6334_vm0, %v6340_v47, %v6342_v45  ;;  %v6229_v8 = vrot.slane %v6213_v13, %v8830_v2  ;;  %v6218_v2 = vld [vmem:[%s11410_s8 + $0x48] sm:$0xff] }
0x12b5   :  { %7945 = vmatpush3.bf16.msra.mxu0 %v7942_v19  ;;  %v6468_v9 = vrot.slane %v6218_v2, 2  ;;  %v6470_v19 = vrot.slane %v6219_v27, 2 }
0x12b6   :  { %7947 = vmatprep.subr.bf16.mxu0 %v7946_v41 }
0x12b9   :  { %7949 = vmatpush3.bf16.msra.mxu0 %v7946_v41 }
0x12c2   :  { %v6437_v60 = vpop.permute.xlu1 %6436 }
0x1387   :  { %v7726_v54 = vpop.f32.mrb[80].mxu0 }
0x1388   :  { %v6086_v62 = vadd.f32 %v7726_v54, %v5969_v56  ;;  %v6080_v14 = vpop.f32.mrb[81].mxu0  ;;  %v6471_v54 = vsel %vm6466_vm3, %v6468_v9, %v6470_v19 }
0x1389   :  { %v6081_v23 = vadd.f32 %v6080_v14, %v5969_v56  ;;  %v6469_v56 = vsel %vm6466_vm3, %v6467_v42, %v6468_v9  ;;  %v6220_v14 = vld [vmem:[%s11410_s8 + $0x58] sm:$0xff] }
0x138a   :  { %v7038_v37 = vmul.f32 -1.442695, %v6086_v62 }
0x138b   :  { %v7037_v46 = vmul.f32 -1.442695, %v6081_v23 }
0x138c   :  { %8556 = vpow2.f32 %v7038_v37  ;;  %v8633_v37 = vmov 0.0|0.0  }
0x138d   :  { %8558 = vpow2.f32 %v7037_v46  ;;  %7958 = vmatprep.subr.bf16.mxu0 %v8633_v37  ;;  %v6472_v46 = vrot.slane %v6220_v14, 2 }
0x1396   :  { %v8557_v15 = vpop.eup %8556 }
0x1397   :  { %v8559_v20 = vpop.eup %8558  ;;  %v6096_v40 = vadd.f32 1.0, %v8557_v15 }
0x1398   :  { %v6095_v49 = vadd.f32 1.0, %v8559_v20  ;;  %v6473_v20 = vsel %vm6466_vm3, %v6470_v19, %v6472_v46 }
0x1399   :  { %8560 = vrcp.f32 %v6096_v40 }
0x139a   :  { %8562 = vrcp.f32 %v6095_v49 }
0x13a3   :  { %v8561_v34 = vpop.eup %8560 }
0x13a4   :  { %v8563_v12 = vpop.eup %8562  ;;  %v6102_v30 = vmul.f32 %v8561_v34, %v6086_v62  ;;  %v7959_v62 = vpack.c.bf16 %v6471_v54, %v6469_v56  ;;  %v11692_v34 = vld [vmem:[#allocation2_spill] sm:$0xff] }
0x13a5   :  { %v6101_v36 = vmul.f32 %v8563_v12, %v6081_v23  ;;  %v6221_v23 = vld [vmem:[%s11410_s8 + $0x60] sm:$0xff]  ;;  %v6328_v12 = vrot.slane %v6217_v43, %v11692_v34  ;;  %v6222_v43 = vld [vmem:[%s11410_s8 + $0x68] sm:$0xff] }
0x13a6   :  { %v6474_v15 = vrot.slane %v6221_v23, 2  ;;  %v6567_v45 = vrot.slane %v6221_v23, 3 }
0x13a7   :  { %7735 = vmatprep.mubr.msk.f32.mxu1 %vm512_vm5, %v6101_v36 }
0x13a8   :  { %7736 = vmatmul.mubr.msk.f32.vlgmr.msra.gmra.mrb[74].mxu1 %vm512_vm5, %v6102_v30  ;;  %v6475_v40 = vsel %vm6466_vm3, %v6472_v46, %v6474_v15 }
0x13a9   :  { %v7962_v49 = vpack.c.bf16 %v6475_v40, %v6473_v20 }
0x147b   :  { %v7737_v57 = vpop.f32.mrb[74].mxu1 }
0x147c   :  { %v6202_v44 = vadd.f32 %v7737_v57, %v11687_v10  ;;  %v6192_v25 = vpop.f32.mrb[75].mxu1  ;;  %v6341_v10 = vsel %vm6334_vm0, %v6338_v51, %v6340_v47  ;;  %v6432_v57 = vpop.permute.xlu0 %6431  ;;  %v6223_v47 = vld [vmem:[%s11410_s8 + $0x70] sm:$0xff] }
0x147d   :  { %v6201_v6 = vadd.f32 %v6192_v25, %v11685_v16  ;;  %v7950_v16 = vpack.c.bf16 %v6339_v28, %v6337_v61  ;;  %v7954_v52 = vpack.c.bf16 %v6343_v38, %v6341_v10  ;;  %v6568_v10 = vrot.slane %v6222_v43, 3 }
0x147e   :  { %v6208_v17 = vadd.f32 %v6206_v33, %v6202_v44  ;;  %v6570_v38 = vrot.slane %v6223_v47, 3 }
0x147f   :  { %v6207_v22 = vadd.f32 %v6206_v33, %v6201_v6  ;;  %7951 = vmatprep.subr.bf16.mxu1 %v7950_v16 }
0x1480   :  { %7953 = vmatpush3.bf16.msra.mxu1 %v7950_v16 }
0x1481   :  { %7746 = vmatprep.mubr.msk.f32.mxu0 %vm512_vm5, %v6207_v22  ;;  %7955 = vmatprep.subr.bf16.mxu1 %v7954_v52 }
0x1482   :  { %7747 = vmatmul.mubr.msk.f32.vlgmr.msra.gmra.mrb[82].mxu0 %vm512_vm5, %v6208_v17 }
0x1483   :  { %7768 = vmatprep.mubr.msk.f32.mxu0 %vm8628_vm2, %v11691_v29  ;;  %7960 = vmatpush3.bf16.msra.mxu0 %v7959_v62 }
0x1484   :  { %7957 = vmatpush3.bf16.msra.mxu1 %v7954_v52  ;;  %7961 = vmatprep.subr.bf16.mxu0 %v8633_v37  ;;  %v6569_v52 = vsel %vm1906_vm1, %v6567_v45, %v6568_v10 }
0x1485   :  { %7964 = vmatprep.subr.bf16.mxu1 %v8633_v37 }
0x1487   :  { %7963 = vmatpush3.bf16.msra.mxu0 %v7962_v49 }
0x1555   :  { %v7748_v32 = vpop.f32.mrb[82].mxu0 }
0x1556   :  { %v6308_v7 = vadd.f32 %v7748_v32, %v6229_v8  ;;  %v6302_v48 = vpop.f32.mrb[83].mxu0 }
0x1557   :  { %v6303_v18 = vadd.f32 %v6302_v48, %v6229_v8  ;;  %v6571_v8 = vsel %vm1906_vm1, %v6568_v10, %v6570_v38  ;;  %v6225_v48 = vld [vmem:[%s11410_s8 + $0x80] sm:$0xf] }
0x1558   :  { %v7044_v58 = vmul.f32 -1.442695, %v6308_v7  ;;  %v7965_v32 = vpack.c.bf16 %v6571_v8, %v6569_v52  ;;  %v6562_v9 = vrot.slane %v6225_v48, %v11690_v50 }
0x1559   :  { %v7043_v0 = vmul.f32 -1.442695, %v6303_v18 }
0x155a   :  { %8564 = vpow2.f32 %v7044_v58  ;;  %v6574_v58 = vrot.slane %v6225_v48, 3 }
0x155b   :  { %8566 = vpow2.f32 %v7043_v0 }
0x1564   :  { %v8565_v59 = vpop.eup %8564 }
0x1565   :  { %v8567_v24 = vpop.eup %8566  ;;  %v6318_v31 = vadd.f32 1.0, %v8565_v59 }
0x1566   :  { %v6317_v11 = vadd.f32 1.0, %v8567_v24 }
0x1567   :  { %8568 = vrcp.f32 %v6318_v31  ;;  %v6458_v31 = vrot.slane %v6221_v23, %v11689_v63 }
0x1568   :  { %8570 = vrcp.f32 %v6317_v11 }
0x1571   :  { %v8569_v21 = vpop.eup %8568 }
0x1572   :  { %v8571_v5 = vpop.eup %8570  ;;  %v6324_v3 = vmul.f32 %v8569_v21, %v6308_v7  ;;  %v6224_v7 = vld [vmem:[%s11410_s8 + $0x78] sm:$0xff] }
0x1573   :  { %v6323_v55 = vmul.f32 %v8571_v5, %v6303_v18  ;;  %v6572_v18 = vrot.slane %v6224_v7, 3 }
0x1575   :  { %7757 = vmatprep.mubr.msk.f32.mxu1 %vm512_vm5, %v6323_v55  ;;  %v6573_v0 = vsel %vm1906_vm1, %v6570_v38, %v6572_v18  ;;  %v6575_v59 = vsel %vm1906_vm1, %v6572_v18, %v6574_v58 }
0x1576   :  { %7758 = vmatmul.mubr.msk.f32.vlgmr.msra.gmra.mrb[76].mxu1 %vm512_vm5, %v6324_v3  ;;  %v7968_v24 = vpack.c.bf16 %v6575_v59, %v6573_v0 }
0x1577   :  { %7779 = vmatprep.mubr.msk.f32.mxu1 %vm8628_vm2, %v11691_v29  ;;  %7966 = vmatpush3.bf16.msra.mxu1 %v7965_v32  ;;  %vm6653_vm2 = vcmask 254976  }
0x1578   :  { %7967 = vmatprep.subr.bf16.mxu1 %v8633_v37 }
0x157b   :  { %7969 = vmatpush3.bf16.msra.mxu1 %v7968_v24 }
0x1649   :  { %v7759_v36 = vpop.f32.mrb[76].mxu1 }
0x164a   :  { %v6426_v30 = vadd.f32 %v7759_v36, %v6328_v12  ;;  %v6420_v1 = vpop.f32.mrb[77].mxu1 }
0x164b   :  { %v6421_v41 = vadd.f32 %v6420_v1, %v6328_v12 }
0x164c   :  { %v6440_v33 = vmul.f32 %v6437_v60, %v6426_v30 }
0x164d   :  { %v6439_v44 = vmul.f32 %v6432_v57, %v6421_v41 }
0x164e   :  { %v6448_v25 = vsel %vm512_vm5, %v6440_v33, 0.0 }
0x164f   :  { %v6449_v6 = vrot.slane %v6448_v25, 4  ;;  %v6441_v22 = vsel %vm512_vm5, %v6439_v44, 0.0 }
0x1650   :  { %v6442_v17 = vrot.slane %v6441_v22, 4 }
0x1651   :  { %v6450_v29 = vadd.f32 %v6449_v6, %v6448_v25 }
0x1652   :  { %v6443_v13 = vadd.f32 %v6442_v17, %v6441_v22 }
0x1653   :  { %v6451_v53 = vrot.slane %v6450_v29, 2 }
0x1654   :  { %v6444_v26 = vrot.slane %v6443_v13, 2 }
0x1655   :  { %v6452_v39 = vadd.f32 %v6451_v53, %v6450_v29 }
0x1656   :  { %v6445_v35 = vadd.f32 %v6444_v26, %v6443_v13 }
0x1657   :  { %v6453_v51 = vrot.slane %v6452_v39, 1 }
0x1658   :  { %v6446_v61 = vrot.slane %v6445_v35, 1 }
0x1659   :  { %v6454_v28 = vadd.f32 %v6453_v51, %v6452_v39 }
0x165a   :  { %v6447_v16 = vadd.f32 %v6446_v61, %v6445_v35 }
0x165c   :  { %v6461_v4 = vsel %vm331_vm7, %v6454_v28, %v6447_v16 }
0x165d   :  { %7769 = vmatmul.mubr.msk.f32.vlgmr.msra.gmra.mrb[84].mxu0 %vm512_vm5, %v6461_v4 }
0x1730   :  { %v6548_v11 = vpop.f32.mrb[84].mxu0 }
0x1731   :  { %v6549_v21 = vadd.f32 %v6548_v11, %v6458_v31  ;;  %v7770_v5 = vpop.f32.mrb[85].mxu0 }
0x1733   :  { %v7048_v55 = vmul.f32 -1.442695, %v6549_v21 }
0x1735   :  { %8572 = vpow2.f32 %v7048_v55 }
0x173f   :  { %v8573_v3 = vpop.eup %8572 }
0x1740   :  { %v6555_v2 = vadd.f32 1.0, %v8573_v3 }
0x1742   :  { %8574 = vrcp.f32 %v6555_v2 }
0x174c   :  { %v8575_v27 = vpop.eup %8574 }
0x174d   :  { %v6558_v42 = vmul.f32 %v8575_v27, %v6549_v21 }
0x174f   :  { %7780 = vmatmul.mubr.msk.f32.vlgmr.msra.gmra.mrb[78].mxu1 %vm512_vm5, %v6558_v42 }
0x1822   :  { %v6649_v19 = vpop.f32.mrb[78].mxu1 }
0x1823   :  { %v6650_v56 = vadd.f32 %v6649_v19, %v6562_v9  ;;  %v7781_v54 = vpop.f32.mrb[79].mxu1 }
0x1825   :  { %6654 = vst.msk [vmem:[%s11411_s9] sm:$0x3] %vm6653_vm2, %v6650_v56 }

</bundles_post_ra>
